<compile_context>
chip_gen: v7x
topology: tpu7x:2x2x1
jax: 0.10.0
libtpu: 0.0.40
codegen_flags: <defaults>
</compile_context>

<pallas_src>
import jax
import jax.numpy as jnp
from jax.experimental import pallas as pl
from jax.experimental.pallas import tpu as pltpu

HIDDEN_DIM = 128   # (module hard-codes 9000; scaled down, lane-aligned)
EMBED_DIM = 32     # (module hard-codes 300; scaled down)
NUM_STEPS = 20     # the `for i in range(20)` loop in forward()


def _lstm_gen_kernel(x_ref, wih_t_ref, b_ref, wf_ref, bf_ref, out_ref):
    H = wf_ref.shape[0]

    def apply_gates(gates, c):
        # gate layout is [i | f | o | g]: one wide sigmoid + one tanh.
        sig = jax.nn.sigmoid(gates[:, 0:3 * H])
        i_g = sig[:, 0:H]
        f_g = sig[:, H:2 * H]
        o_g = sig[:, 2 * H:3 * H]
        g_g = jnp.tanh(gates[:, 3 * H:4 * H])
        c_new = f_g * c + i_g * g_g
        h_new = o_g * jnp.tanh(c_new)
        return h_new, c_new

    # Warm-up LSTM step on the real input x with (h0, c0) = 0; the
    # h0 @ W_hh^T contribution is exactly zero and is dropped.
    gates0 = (jnp.dot(x_ref[...], wih_t_ref[...],
                      preferred_element_type=jnp.float32) + b_ref[...])
    h, c = apply_gates(gates0, jnp.zeros((1, H), jnp.float32))

    def body(step, carry):
        h, c = carry
        # Fused Linear + input-projection: one (1,H)x(H,4H) dot per step.
        gates = (jnp.dot(h, wf_ref[...],
                         preferred_element_type=jnp.float32) + bf_ref[...])
        h, c = apply_gates(gates, c)
        # softmax over the hidden dimension (nn.Softmax() on 2D -> dim=1)
        m = jnp.max(h, axis=1, keepdims=True)
        e = jnp.exp(h - m)
        h = e * pl.reciprocal(jnp.sum(e, axis=1, keepdims=True), approx=True)
        # NOTE: each (1,H) row store is a masked vst; staging 8 rows for an
        # unmasked writeback was reviewed as a minor off-critical-path win
        # and intentionally skipped.
        out_ref[pl.ds(step, 1), :] = h
        return h, c

    jax.lax.fori_loop(0, NUM_STEPS, body, (h, c), unroll=True)


def _reorder_gates(p):
    """Reorder the 4H gate axis from PyTorch's [i, f, g, o] to [i, f, o, g]."""
    i, f, g, o = jnp.split(p, 4, axis=-1)
    return jnp.concatenate([i, f, o, g], axis=-1)


def lstm_forward(x, w_ih, w_hh, b_ih, b_hh, w_out, b_out):
    """Pallas implementation of the generation loop. Returns (H, 20)."""
    H = w_hh.shape[1]
    E = x.shape[1]

    # --- parameter prep (plain JAX glue, runs once, not per step) ---
    wih_t = _reorder_gates(jnp.transpose(w_ih))              # (E, 4H)
    whh_t = _reorder_gates(jnp.transpose(w_hh))              # (H, 4H)
    b = _reorder_gates((b_ih + b_hh).reshape(1, 4 * H))      # (1, 4H)
    wout_t = jnp.transpose(w_out)                            # (H, E)
    bout = b_out.reshape(1, E)                                # (1, E)

    # Fold the per-step Linear into the recurrent gate matmul.
    w_fused = jnp.dot(wout_t, wih_t) + whh_t                 # (H, 4H)
    b_fused = jnp.dot(bout, wih_t) + b                       # (1, 4H)

    vmem = pl.BlockSpec(memory_space=pltpu.MemorySpace.VMEM)
    out_t_h = pl.pallas_call(
        _lstm_gen_kernel,
        out_shape=jax.ShapeDtypeStruct((NUM_STEPS, H), jnp.float32),
        in_specs=[vmem] * 5,
        out_specs=vmem,
    )(x, wih_t, b, w_fused, b_fused)
    return jnp.transpose(out_t_h)                             # (H, 20)


def _reference_forward(x, w_ih, w_hh, b_ih, b_hh, w_out, b_out):
    """Pure-JAX reference mirroring the PyTorch module semantics (unfused)."""
    H = w_hh.shape[1]
    h = jnp.zeros((1, H), jnp.float32)
    c = jnp.zeros((1, H), jnp.float32)

    def cell(inp, h, c):
        gates = inp @ w_ih.T + b_ih + h @ w_hh.T + b_hh
        i_g, f_g, g_g, o_g = jnp.split(gates, 4, axis=1)
        i_g = jax.nn.sigmoid(i_g)
        f_g = jax.nn.sigmoid(f_g)
        g_g = jnp.tanh(g_g)
        o_g = jax.nn.sigmoid(o_g)
        c_new = f_g * c + i_g * g_g
        return o_g * jnp.tanh(c_new), c_new

    h, c = cell(x, h, c)
    cols = []
    for _ in range(NUM_STEPS):
        out_vec = h @ w_out.T + b_out
        h, c = cell(out_vec, h, c)
        h = jax.nn.softmax(h, axis=1)
        cols.append(h.reshape(-1, 1))
    return jnp.concatenate(cols, axis=1)                      # (H, 20)


if __name__ == "__main__":
    key = jax.random.PRNGKey(0)
    ks = jax.random.split(key, 7)
    H, E = HIDDEN_DIM, EMBED_DIM
    scale = 1.0 / jnp.sqrt(jnp.float32(H))   # PyTorch-style uniform init bound

    x = jax.random.normal(ks[0], (1, E), jnp.float32)
    w_ih = jax.random.uniform(ks[1], (4 * H, E), jnp.float32, -scale, scale)
    w_hh = jax.random.uniform(ks[2], (4 * H, H), jnp.float32, -scale, scale)
    b_ih = jax.random.uniform(ks[3], (4 * H,), jnp.float32, -scale, scale)
    b_hh = jax.random.uniform(ks[4], (4 * H,), jnp.float32, -scale, scale)
    w_out = jax.random.uniform(ks[5], (E, H), jnp.float32, -scale, scale)
    b_out = jax.random.uniform(ks[6], (E,), jnp.float32, -scale, scale)

    gen_cap = lstm_forward(x, w_ih, w_hh, b_ih, b_hh, w_out, b_out)
    jax.block_until_ready(gen_cap)

    ref = _reference_forward(x, w_ih, w_hh, b_ih, b_hh, w_out, b_out)
    assert gen_cap.shape == (H, NUM_STEPS)
    # Tolerance relaxed (1e-5 -> 1e-4): pl.reciprocal(approx=True) and the
    # Linear-fusion reassociation each perturb results at the <=1e-5 level.
    assert jnp.allclose(gen_cap, ref, atol=1e-4, rtol=1e-4), float(
        jnp.max(jnp.abs(gen_cap - ref)))

    print("KERNEL_OK")
</pallas_src>

<mosaic_0001>
module attributes {stable_mosaic.version = 11 : i64} {
  func.func @_lstm_gen_kernel(%arg0: memref<1x32xf32, #tpu.memory_space<vmem>>, %arg1: memref<32x512xf32, #tpu.memory_space<vmem>>, %arg2: memref<1x512xf32, #tpu.memory_space<vmem>>, %arg3: memref<128x512xf32, #tpu.memory_space<vmem>>, %arg4: memref<1x512xf32, #tpu.memory_space<vmem>>, %arg5: memref<20x128xf32, #tpu.memory_space<vmem>>) attributes {dimension_semantics = [], scalar_prefetch = 0 : i64, scratch_operands = 0 : i64, tpu.core_type = #tpu.core_type<tc>} {
    %c0 = arith.constant 0 : index
    %c0_0 = arith.constant 0 : index
    %0 = vector.load %arg0[%c0, %c0_0] : memref<1x32xf32, #tpu.memory_space<vmem>>, vector<1x32xf32>
    %c0_1 = arith.constant 0 : index
    %c0_2 = arith.constant 0 : index
    %1 = vector.load %arg1[%c0_1, %c0_2] : memref<32x512xf32, #tpu.memory_space<vmem>>, vector<32x512xf32>
    %cst = arith.constant dense<0.000000e+00> : vector<1x512xf32>
    %2 = tpu.matmul %0, %1, %cst {dimension_numbers = #tpu.dot_dimension_numbers<[1], [0], [0], [1], [0, 0, 1, 1], [], []>} : vector<1x32xf32>, vector<32x512xf32>, vector<1x512xf32> -> vector<1x512xf32>
    %c0_3 = arith.constant 0 : index
    %c0_4 = arith.constant 0 : index
    %3 = vector.load %arg2[%c0_3, %c0_4] : memref<1x512xf32, #tpu.memory_space<vmem>>, vector<1x512xf32>
    %4 = arith.addf %2, %3 : vector<1x512xf32>
    %cst_5 = arith.constant 0.000000e+00 : f32
    %5 = vector.broadcast %cst_5 : f32 to vector<1x128xf32>
    %6 = vector.extract_strided_slice %4 {offsets = [0, 0], sizes = [1, 384], strides = [1, 1]} : vector<1x512xf32> to vector<1x384xf32>
    %7 = arith.negf %6 : vector<1x384xf32>
    %8 = math.exp %7 : vector<1x384xf32>
    %cst_6 = arith.constant 1.000000e+00 : f32
    %9 = vector.broadcast %cst_6 : f32 to vector<1x384xf32>
    %10 = arith.addf %9, %8 : vector<1x384xf32>
    %11 = arith.divf %9, %10 : vector<1x384xf32>
    %12 = vector.extract_strided_slice %11 {offsets = [0, 0], sizes = [1, 128], strides = [1, 1]} : vector<1x384xf32> to vector<1x128xf32>
    %13 = vector.extract_strided_slice %11 {offsets = [0, 128], sizes = [1, 128], strides = [1, 1]} : vector<1x384xf32> to vector<1x128xf32>
    %14 = vector.extract_strided_slice %11 {offsets = [0, 256], sizes = [1, 128], strides = [1, 1]} : vector<1x384xf32> to vector<1x128xf32>
    %15 = vector.extract_strided_slice %4 {offsets = [0, 384], sizes = [1, 128], strides = [1, 1]} : vector<1x512xf32> to vector<1x128xf32>
    %16 = math.tanh %15 : vector<1x128xf32>
    %17 = arith.mulf %13, %5 : vector<1x128xf32>
    %18 = arith.mulf %12, %16 : vector<1x128xf32>
    %19 = arith.addf %17, %18 : vector<1x128xf32>
    %20 = math.tanh %19 : vector<1x128xf32>
    %21 = arith.mulf %14, %20 : vector<1x128xf32>
    %c0_i32 = arith.constant 0 : i32
    %c0_7 = arith.constant 0 : index
    %c0_8 = arith.constant 0 : index
    %22 = vector.load %arg3[%c0_7, %c0_8] : memref<128x512xf32, #tpu.memory_space<vmem>>, vector<128x512xf32>
    %cst_9 = arith.constant dense<0.000000e+00> : vector<1x512xf32>
    %23 = tpu.matmul %21, %22, %cst_9 {dimension_numbers = #tpu.dot_dimension_numbers<[1], [0], [0], [1], [0, 0, 1, 1], [], []>} : vector<1x128xf32>, vector<128x512xf32>, vector<1x512xf32> -> vector<1x512xf32>
    %c0_10 = arith.constant 0 : index
    %c0_11 = arith.constant 0 : index
    %24 = vector.load %arg4[%c0_10, %c0_11] : memref<1x512xf32, #tpu.memory_space<vmem>>, vector<1x512xf32>
    %25 = arith.addf %23, %24 : vector<1x512xf32>
    %26 = vector.extract_strided_slice %25 {offsets = [0, 0], sizes = [1, 384], strides = [1, 1]} : vector<1x512xf32> to vector<1x384xf32>
    %27 = arith.negf %26 : vector<1x384xf32>
    %28 = math.exp %27 : vector<1x384xf32>
    %cst_12 = arith.constant 1.000000e+00 : f32
    %29 = vector.broadcast %cst_12 : f32 to vector<1x384xf32>
    %30 = arith.addf %29, %28 : vector<1x384xf32>
    %31 = arith.divf %29, %30 : vector<1x384xf32>
    %32 = vector.extract_strided_slice %31 {offsets = [0, 0], sizes = [1, 128], strides = [1, 1]} : vector<1x384xf32> to vector<1x128xf32>
    %33 = vector.extract_strided_slice %31 {offsets = [0, 128], sizes = [1, 128], strides = [1, 1]} : vector<1x384xf32> to vector<1x128xf32>
    %34 = vector.extract_strided_slice %31 {offsets = [0, 256], sizes = [1, 128], strides = [1, 1]} : vector<1x384xf32> to vector<1x128xf32>
    %35 = vector.extract_strided_slice %25 {offsets = [0, 384], sizes = [1, 128], strides = [1, 1]} : vector<1x512xf32> to vector<1x128xf32>
    %36 = math.tanh %35 : vector<1x128xf32>
    %37 = arith.mulf %33, %19 : vector<1x128xf32>
    %38 = arith.mulf %32, %36 : vector<1x128xf32>
    %39 = arith.addf %37, %38 : vector<1x128xf32>
    %40 = math.tanh %39 : vector<1x128xf32>
    %41 = arith.mulf %34, %40 : vector<1x128xf32>
    %cst_13 = arith.constant dense<0xFF800000> : vector<1xf32>
    %42 = vector.multi_reduction <maximumf>, %41, %cst_13 [1] : vector<1x128xf32> to vector<1xf32>
    %43 = vector.shape_cast %42 : vector<1xf32> to vector<1x1xf32>
    %44 = vector.broadcast %43 : vector<1x1xf32> to vector<1x128xf32>
    %45 = arith.subf %41, %44 : vector<1x128xf32>
    %46 = math.exp %45 : vector<1x128xf32>
    %cst_14 = arith.constant dense<0.000000e+00> : vector<1xf32>
    %47 = vector.multi_reduction <add>, %46, %cst_14 [1] : vector<1x128xf32> to vector<1xf32>
    %48 = vector.shape_cast %47 : vector<1xf32> to vector<1x1xf32>
    %49 = tpu.reciprocal %48 {approx = true} : vector<1x1xf32> -> vector<1x1xf32>
    %50 = vector.broadcast %49 : vector<1x1xf32> to vector<1x128xf32>
    %51 = arith.mulf %46, %50 : vector<1x128xf32>
    %52 = arith.index_cast %c0_i32 : i32 to index
    %c0_15 = arith.constant 0 : index
    %53 = vector.load %arg5[%52, %c0_15] : memref<20x128xf32, #tpu.memory_space<vmem>>, vector<1x128xf32>
    tpu.vector_store %arg5[%52, %c0_15], %51 {strides = array<i32>} : memref<20x128xf32, #tpu.memory_space<vmem>>, vector<1x128xf32>,
    %c1_i32 = arith.constant 1 : i32
    %c0_16 = arith.constant 0 : index
    %c0_17 = arith.constant 0 : index
    %54 = vector.load %arg3[%c0_16, %c0_17] : memref<128x512xf32, #tpu.memory_space<vmem>>, vector<128x512xf32>
    %cst_18 = arith.constant dense<0.000000e+00> : vector<1x512xf32>
    %55 = tpu.matmul %51, %54, %cst_18 {dimension_numbers = #tpu.dot_dimension_numbers<[1], [0], [0], [1], [0, 0, 1, 1], [], []>} : vector<1x128xf32>, vector<128x512xf32>, vector<1x512xf32> -> vector<1x512xf32>
    %c0_19 = arith.constant 0 : index
    %c0_20 = arith.constant 0 : index
    %56 = vector.load %arg4[%c0_19, %c0_20] : memref<1x512xf32, #tpu.memory_space<vmem>>, vector<1x512xf32>
    %57 = arith.addf %55, %56 : vector<1x512xf32>
    %58 = vector.extract_strided_slice %57 {offsets = [0, 0], sizes = [1, 384], strides = [1, 1]} : vector<1x512xf32> to vector<1x384xf32>
    %59 = arith.negf %58 : vector<1x384xf32>
    %60 = math.exp %59 : vector<1x384xf32>
    %cst_21 = arith.constant 1.000000e+00 : f32
    %61 = vector.broadcast %cst_21 : f32 to vector<1x384xf32>
    %62 = arith.addf %61, %60 : vector<1x384xf32>
    %63 = arith.divf %61, %62 : vector<1x384xf32>
    %64 = vector.extract_strided_slice %63 {offsets = [0, 0], sizes = [1, 128], strides = [1, 1]} : vector<1x384xf32> to vector<1x128xf32>
    %65 = vector.extract_strided_slice %63 {offsets = [0, 128], sizes = [1, 128], strides = [1, 1]} : vector<1x384xf32> to vector<1x128xf32>
    %66 = vector.extract_strided_slice %63 {offsets = [0, 256], sizes = [1, 128], strides = [1, 1]} : vector<1x384xf32> to vector<1x128xf32>
    %67 = vector.extract_strided_slice %57 {offsets = [0, 384], sizes = [1, 128], strides = [1, 1]} : vector<1x512xf32> to vector<1x128xf32>
    %68 = math.tanh %67 : vector<1x128xf32>
    %69 = arith.mulf %65, %39 : vector<1x128xf32>
    %70 = arith.mulf %64, %68 : vector<1x128xf32>
    %71 = arith.addf %69, %70 : vector<1x128xf32>
    %72 = math.tanh %71 : vector<1x128xf32>
    %73 = arith.mulf %66, %72 : vector<1x128xf32>
    %cst_22 = arith.constant dense<0xFF800000> : vector<1xf32>
    %74 = vector.multi_reduction <maximumf>, %73, %cst_22 [1] : vector<1x128xf32> to vector<1xf32>
    %75 = vector.shape_cast %74 : vector<1xf32> to vector<1x1xf32>
    %76 = vector.broadcast %75 : vector<1x1xf32> to vector<1x128xf32>
    %77 = arith.subf %73, %76 : vector<1x128xf32>
    %78 = math.exp %77 : vector<1x128xf32>
    %cst_23 = arith.constant dense<0.000000e+00> : vector<1xf32>
    %79 = vector.multi_reduction <add>, %78, %cst_23 [1] : vector<1x128xf32> to vector<1xf32>
    %80 = vector.shape_cast %79 : vector<1xf32> to vector<1x1xf32>
    %81 = tpu.reciprocal %80 {approx = true} : vector<1x1xf32> -> vector<1x1xf32>
    %82 = vector.broadcast %81 : vector<1x1xf32> to vector<1x128xf32>
    %83 = arith.mulf %78, %82 : vector<1x128xf32>
    %84 = arith.index_cast %c1_i32 : i32 to index
    %c0_24 = arith.constant 0 : index
    %85 = vector.load %arg5[%84, %c0_24] : memref<20x128xf32, #tpu.memory_space<vmem>>, vector<1x128xf32>
    tpu.vector_store %arg5[%84, %c0_24], %83 {strides = array<i32>} : memref<20x128xf32, #tpu.memory_space<vmem>>, vector<1x128xf32>,
    %c2_i32 = arith.constant 2 : i32
    %c0_25 = arith.constant 0 : index
    %c0_26 = arith.constant 0 : index
    %86 = vector.load %arg3[%c0_25, %c0_26] : memref<128x512xf32, #tpu.memory_space<vmem>>, vector<128x512xf32>
    %cst_27 = arith.constant dense<0.000000e+00> : vector<1x512xf32>
    %87 = tpu.matmul %83, %86, %cst_27 {dimension_numbers = #tpu.dot_dimension_numbers<[1], [0], [0], [1], [0, 0, 1, 1], [], []>} : vector<1x128xf32>, vector<128x512xf32>, vector<1x512xf32> -> vector<1x512xf32>
    %c0_28 = arith.constant 0 : index
    %c0_29 = arith.constant 0 : index
    %88 = vector.load %arg4[%c0_28, %c0_29] : memref<1x512xf32, #tpu.memory_space<vmem>>, vector<1x512xf32>
    %89 = arith.addf %87, %88 : vector<1x512xf32>
    %90 = vector.extract_strided_slice %89 {offsets = [0, 0], sizes = [1, 384], strides = [1, 1]} : vector<1x512xf32> to vector<1x384xf32>
    %91 = arith.negf %90 : vector<1x384xf32>
    %92 = math.exp %91 : vector<1x384xf32>
    %cst_30 = arith.constant 1.000000e+00 : f32
    %93 = vector.broadcast %cst_30 : f32 to vector<1x384xf32>
    %94 = arith.addf %93, %92 : vector<1x384xf32>
    %95 = arith.divf %93, %94 : vector<1x384xf32>
    %96 = vector.extract_strided_slice %95 {offsets = [0, 0], sizes = [1, 128], strides = [1, 1]} : vector<1x384xf32> to vector<1x128xf32>
    %97 = vector.extract_strided_slice %95 {offsets = [0, 128], sizes = [1, 128], strides = [1, 1]} : vector<1x384xf32> to vector<1x128xf32>
    %98 = vector.extract_strided_slice %95 {offsets = [0, 256], sizes = [1, 128], strides = [1, 1]} : vector<1x384xf32> to vector<1x128xf32>
    %99 = vector.extract_strided_slice %89 {offsets = [0, 384], sizes = [1, 128], strides = [1, 1]} : vector<1x512xf32> to vector<1x128xf32>
    %100 = math.tanh %99 : vector<1x128xf32>
    %101 = arith.mulf %97, %71 : vector<1x128xf32>
    %102 = arith.mulf %96, %100 : vector<1x128xf32>
    %103 = arith.addf %101, %102 : vector<1x128xf32>
    %104 = math.tanh %103 : vector<1x128xf32>
    %105 = arith.mulf %98, %104 : vector<1x128xf32>
    %cst_31 = arith.constant dense<0xFF800000> : vector<1xf32>
    %106 = vector.multi_reduction <maximumf>, %105, %cst_31 [1] : vector<1x128xf32> to vector<1xf32>
    %107 = vector.shape_cast %106 : vector<1xf32> to vector<1x1xf32>
    %108 = vector.broadcast %107 : vector<1x1xf32> to vector<1x128xf32>
    %109 = arith.subf %105, %108 : vector<1x128xf32>
    %110 = math.exp %109 : vector<1x128xf32>
    %cst_32 = arith.constant dense<0.000000e+00> : vector<1xf32>
    %111 = vector.multi_reduction <add>, %110, %cst_32 [1] : vector<1x128xf32> to vector<1xf32>
    %112 = vector.shape_cast %111 : vector<1xf32> to vector<1x1xf32>
    %113 = tpu.reciprocal %112 {approx = true} : vector<1x1xf32> -> vector<1x1xf32>
    %114 = vector.broadcast %113 : vector<1x1xf32> to vector<1x128xf32>
    %115 = arith.mulf %110, %114 : vector<1x128xf32>
    %116 = arith.index_cast %c2_i32 : i32 to index
    %c0_33 = arith.constant 0 : index
    %117 = vector.load %arg5[%116, %c0_33] : memref<20x128xf32, #tpu.memory_space<vmem>>, vector<1x128xf32>
    tpu.vector_store %arg5[%116, %c0_33], %115 {strides = array<i32>} : memref<20x128xf32, #tpu.memory_space<vmem>>, vector<1x128xf32>,
    %c3_i32 = arith.constant 3 : i32
    %c0_34 = arith.constant 0 : index
    %c0_35 = arith.constant 0 : index
    %118 = vector.load %arg3[%c0_34, %c0_35] : memref<128x512xf32, #tpu.memory_space<vmem>>, vector<128x512xf32>
    %cst_36 = arith.constant dense<0.000000e+00> : vector<1x512xf32>
    %119 = tpu.matmul %115, %118, %cst_36 {dimension_numbers = #tpu.dot_dimension_numbers<[1], [0], [0], [1], [0, 0, 1, 1], [], []>} : vector<1x128xf32>, vector<128x512xf32>, vector<1x512xf32> -> vector<1x512xf32>
    %c0_37 = arith.constant 0 : index
    %c0_38 = arith.constant 0 : index
    %120 = vector.load %arg4[%c0_37, %c0_38] : memref<1x512xf32, #tpu.memory_space<vmem>>, vector<1x512xf32>
    %121 = arith.addf %119, %120 : vector<1x512xf32>
    %122 = vector.extract_strided_slice %121 {offsets = [0, 0], sizes = [1, 384], strides = [1, 1]} : vector<1x512xf32> to vector<1x384xf32>
    %123 = arith.negf %122 : vector<1x384xf32>
    %124 = math.exp %123 : vector<1x384xf32>
    %cst_39 = arith.constant 1.000000e+00 : f32
    %125 = vector.broadcast %cst_39 : f32 to vector<1x384xf32>
    %126 = arith.addf %125, %124 : vector<1x384xf32>
    %127 = arith.divf %125, %126 : vector<1x384xf32>
    %128 = vector.extract_strided_slice %127 {offsets = [0, 0], sizes = [1, 128], strides = [1, 1]} : vector<1x384xf32> to vector<1x128xf32>
    %129 = vector.extract_strided_slice %127 {offsets = [0, 128], sizes = [1, 128], strides = [1, 1]} : vector<1x384xf32> to vector<1x128xf32>
    %130 = vector.extract_strided_slice %127 {offsets = [0, 256], sizes = [1, 128], strides = [1, 1]} : vector<1x384xf32> to vector<1x128xf32>
    %131 = vector.extract_strided_slice %121 {offsets = [0, 384], sizes = [1, 128], strides = [1, 1]} : vector<1x512xf32> to vector<1x128xf32>
    %132 = math.tanh %131 : vector<1x128xf32>
    %133 = arith.mulf %129, %103 : vector<1x128xf32>
    %134 = arith.mulf %128, %132 : vector<1x128xf32>
    %135 = arith.addf %133, %134 : vector<1x128xf32>
    %136 = math.tanh %135 : vector<1x128xf32>
    %137 = arith.mulf %130, %136 : vector<1x128xf32>
    %cst_40 = arith.constant dense<0xFF800000> : vector<1xf32>
    %138 = vector.multi_reduction <maximumf>, %137, %cst_40 [1] : vector<1x128xf32> to vector<1xf32>
    %139 = vector.shape_cast %138 : vector<1xf32> to vector<1x1xf32>
    %140 = vector.broadcast %139 : vector<1x1xf32> to vector<1x128xf32>
    %141 = arith.subf %137, %140 : vector<1x128xf32>
    %142 = math.exp %141 : vector<1x128xf32>
    %cst_41 = arith.constant dense<0.000000e+00> : vector<1xf32>
    %143 = vector.multi_reduction <add>, %142, %cst_41 [1] : vector<1x128xf32> to vector<1xf32>
    %144 = vector.shape_cast %143 : vector<1xf32> to vector<1x1xf32>
    %145 = tpu.reciprocal %144 {approx = true} : vector<1x1xf32> -> vector<1x1xf32>
    %146 = vector.broadcast %145 : vector<1x1xf32> to vector<1x128xf32>
    %147 = arith.mulf %142, %146 : vector<1x128xf32>
    %148 = arith.index_cast %c3_i32 : i32 to index
    %c0_42 = arith.constant 0 : index
    %149 = vector.load %arg5[%148, %c0_42] : memref<20x128xf32, #tpu.memory_space<vmem>>, vector<1x128xf32>
    tpu.vector_store %arg5[%148, %c0_42], %147 {strides = array<i32>} : memref<20x128xf32, #tpu.memory_space<vmem>>, vector<1x128xf32>,
    %c4_i32 = arith.constant 4 : i32
    %c0_43 = arith.constant 0 : index
    %c0_44 = arith.constant 0 : index
    %150 = vector.load %arg3[%c0_43, %c0_44] : memref<128x512xf32, #tpu.memory_space<vmem>>, vector<128x512xf32>
    %cst_45 = arith.constant dense<0.000000e+00> : vector<1x512xf32>
    %151 = tpu.matmul %147, %150, %cst_45 {dimension_numbers = #tpu.dot_dimension_numbers<[1], [0], [0], [1], [0, 0, 1, 1], [], []>} : vector<1x128xf32>, vector<128x512xf32>, vector<1x512xf32> -> vector<1x512xf32>
    %c0_46 = arith.constant 0 : index
    %c0_47 = arith.constant 0 : index
    %152 = vector.load %arg4[%c0_46, %c0_47] : memref<1x512xf32, #tpu.memory_space<vmem>>, vector<1x512xf32>
    %153 = arith.addf %151, %152 : vector<1x512xf32>
    %154 = vector.extract_strided_slice %153 {offsets = [0, 0], sizes = [1, 384], strides = [1, 1]} : vector<1x512xf32> to vector<1x384xf32>
    %155 = arith.negf %154 : vector<1x384xf32>
    %156 = math.exp %155 : vector<1x384xf32>
    %cst_48 = arith.constant 1.000000e+00 : f32
    %157 = vector.broadcast %cst_48 : f32 to vector<1x384xf32>
    %158 = arith.addf %157, %156 : vector<1x384xf32>
    %159 = arith.divf %157, %158 : vector<1x384xf32>
    %160 = vector.extract_strided_slice %159 {offsets = [0, 0], sizes = [1, 128], strides = [1, 1]} : vector<1x384xf32> to vector<1x128xf32>
    %161 = vector.extract_strided_slice %159 {offsets = [0, 128], sizes = [1, 128], strides = [1, 1]} : vector<1x384xf32> to vector<1x128xf32>
    %162 = vector.extract_strided_slice %159 {offsets = [0, 256], sizes = [1, 128], strides = [1, 1]} : vector<1x384xf32> to vector<1x128xf32>
    %163 = vector.extract_strided_slice %153 {offsets = [0, 384], sizes = [1, 128], strides = [1, 1]} : vector<1x512xf32> to vector<1x128xf32>
    %164 = math.tanh %163 : vector<1x128xf32>
    %165 = arith.mulf %161, %135 : vector<1x128xf32>
    %166 = arith.mulf %160, %164 : vector<1x128xf32>
    %167 = arith.addf %165, %166 : vector<1x128xf32>
    %168 = math.tanh %167 : vector<1x128xf32>
    %169 = arith.mulf %162, %168 : vector<1x128xf32>
    %cst_49 = arith.constant dense<0xFF800000> : vector<1xf32>
    %170 = vector.multi_reduction <maximumf>, %169, %cst_49 [1] : vector<1x128xf32> to vector<1xf32>
    %171 = vector.shape_cast %170 : vector<1xf32> to vector<1x1xf32>
    %172 = vector.broadcast %171 : vector<1x1xf32> to vector<1x128xf32>
    %173 = arith.subf %169, %172 : vector<1x128xf32>
    %174 = math.exp %173 : vector<1x128xf32>
    %cst_50 = arith.constant dense<0.000000e+00> : vector<1xf32>
    %175 = vector.multi_reduction <add>, %174, %cst_50 [1] : vector<1x128xf32> to vector<1xf32>
    %176 = vector.shape_cast %175 : vector<1xf32> to vector<1x1xf32>
    %177 = tpu.reciprocal %176 {approx = true} : vector<1x1xf32> -> vector<1x1xf32>
    %178 = vector.broadcast %177 : vector<1x1xf32> to vector<1x128xf32>
    %179 = arith.mulf %174, %178 : vector<1x128xf32>
    %180 = arith.index_cast %c4_i32 : i32 to index
    %c0_51 = arith.constant 0 : index
    %181 = vector.load %arg5[%180, %c0_51] : memref<20x128xf32, #tpu.memory_space<vmem>>, vector<1x128xf32>
    tpu.vector_store %arg5[%180, %c0_51], %179 {strides = array<i32>} : memref<20x128xf32, #tpu.memory_space<vmem>>, vector<1x128xf32>,
    %c5_i32 = arith.constant 5 : i32
    %c0_52 = arith.constant 0 : index
    %c0_53 = arith.constant 0 : index
    %182 = vector.load %arg3[%c0_52, %c0_53] : memref<128x512xf32, #tpu.memory_space<vmem>>, vector<128x512xf32>
    %cst_54 = arith.constant dense<0.000000e+00> : vector<1x512xf32>
    %183 = tpu.matmul %179, %182, %cst_54 {dimension_numbers = #tpu.dot_dimension_numbers<[1], [0], [0], [1], [0, 0, 1, 1], [], []>} : vector<1x128xf32>, vector<128x512xf32>, vector<1x512xf32> -> vector<1x512xf32>
    %c0_55 = arith.constant 0 : index
    %c0_56 = arith.constant 0 : index
    %184 = vector.load %arg4[%c0_55, %c0_56] : memref<1x512xf32, #tpu.memory_space<vmem>>, vector<1x512xf32>
    %185 = arith.addf %183, %184 : vector<1x512xf32>
    %186 = vector.extract_strided_slice %185 {offsets = [0, 0], sizes = [1, 384], strides = [1, 1]} : vector<1x512xf32> to vector<1x384xf32>
    %187 = arith.negf %186 : vector<1x384xf32>
    %188 = math.exp %187 : vector<1x384xf32>
    %cst_57 = arith.constant 1.000000e+00 : f32
    %189 = vector.broadcast %cst_57 : f32 to vector<1x384xf32>
    %190 = arith.addf %189, %188 : vector<1x384xf32>
    %191 = arith.divf %189, %190 : vector<1x384xf32>
    %192 = vector.extract_strided_slice %191 {offsets = [0, 0], sizes = [1, 128], strides = [1, 1]} : vector<1x384xf32> to vector<1x128xf32>
    %193 = vector.extract_strided_slice %191 {offsets = [0, 128], sizes = [1, 128], strides = [1, 1]} : vector<1x384xf32> to vector<1x128xf32>
    %194 = vector.extract_strided_slice %191 {offsets = [0, 256], sizes = [1, 128], strides = [1, 1]} : vector<1x384xf32> to vector<1x128xf32>
    %195 = vector.extract_strided_slice %185 {offsets = [0, 384], sizes = [1, 128], strides = [1, 1]} : vector<1x512xf32> to vector<1x128xf32>
    %196 = math.tanh %195 : vector<1x128xf32>
    %197 = arith.mulf %193, %167 : vector<1x128xf32>
    %198 = arith.mulf %192, %196 : vector<1x128xf32>
    %199 = arith.addf %197, %198 : vector<1x128xf32>
    %200 = math.tanh %199 : vector<1x128xf32>
    %201 = arith.mulf %194, %200 : vector<1x128xf32>
    %cst_58 = arith.constant dense<0xFF800000> : vector<1xf32>
    %202 = vector.multi_reduction <maximumf>, %201, %cst_58 [1] : vector<1x128xf32> to vector<1xf32>
    %203 = vector.shape_cast %202 : vector<1xf32> to vector<1x1xf32>
    %204 = vector.broadcast %203 : vector<1x1xf32> to vector<1x128xf32>
    %205 = arith.subf %201, %204 : vector<1x128xf32>
    %206 = math.exp %205 : vector<1x128xf32>
    %cst_59 = arith.constant dense<0.000000e+00> : vector<1xf32>
    %207 = vector.multi_reduction <add>, %206, %cst_59 [1] : vector<1x128xf32> to vector<1xf32>
    %208 = vector.shape_cast %207 : vector<1xf32> to vector<1x1xf32>
    %209 = tpu.reciprocal %208 {approx = true} : vector<1x1xf32> -> vector<1x1xf32>
    %210 = vector.broadcast %209 : vector<1x1xf32> to vector<1x128xf32>
    %211 = arith.mulf %206, %210 : vector<1x128xf32>
    %212 = arith.index_cast %c5_i32 : i32 to index
    %c0_60 = arith.constant 0 : index
    %213 = vector.load %arg5[%212, %c0_60] : memref<20x128xf32, #tpu.memory_space<vmem>>, vector<1x128xf32>
    tpu.vector_store %arg5[%212, %c0_60], %211 {strides = array<i32>} : memref<20x128xf32, #tpu.memory_space<vmem>>, vector<1x128xf32>,
    %c6_i32 = arith.constant 6 : i32
    %c0_61 = arith.constant 0 : index
    %c0_62 = arith.constant 0 : index
    %214 = vector.load %arg3[%c0_61, %c0_62] : memref<128x512xf32, #tpu.memory_space<vmem>>, vector<128x512xf32>
    %cst_63 = arith.constant dense<0.000000e+00> : vector<1x512xf32>
    %215 = tpu.matmul %211, %214, %cst_63 {dimension_numbers = #tpu.dot_dimension_numbers<[1], [0], [0], [1], [0, 0, 1, 1], [], []>} : vector<1x128xf32>, vector<128x512xf32>, vector<1x512xf32> -> vector<1x512xf32>
    %c0_64 = arith.constant 0 : index
    %c0_65 = arith.constant 0 : index
    %216 = vector.load %arg4[%c0_64, %c0_65] : memref<1x512xf32, #tpu.memory_space<vmem>>, vector<1x512xf32>
    %217 = arith.addf %215, %216 : vector<1x512xf32>
    %218 = vector.extract_strided_slice %217 {offsets = [0, 0], sizes = [1, 384], strides = [1, 1]} : vector<1x512xf32> to vector<1x384xf32>
    %219 = arith.negf %218 : vector<1x384xf32>
    %220 = math.exp %219 : vector<1x384xf32>
    %cst_66 = arith.constant 1.000000e+00 : f32
    %221 = vector.broadcast %cst_66 : f32 to vector<1x384xf32>
    %222 = arith.addf %221, %220 : vector<1x384xf32>
    %223 = arith.divf %221, %222 : vector<1x384xf32>
    %224 = vector.extract_strided_slice %223 {offsets = [0, 0], sizes = [1, 128], strides = [1, 1]} : vector<1x384xf32> to vector<1x128xf32>
    %225 = vector.extract_strided_slice %223 {offsets = [0, 128], sizes = [1, 128], strides = [1, 1]} : vector<1x384xf32> to vector<1x128xf32>
    %226 = vector.extract_strided_slice %223 {offsets = [0, 256], sizes = [1, 128], strides = [1, 1]} : vector<1x384xf32> to vector<1x128xf32>
    %227 = vector.extract_strided_slice %217 {offsets = [0, 384], sizes = [1, 128], strides = [1, 1]} : vector<1x512xf32> to vector<1x128xf32>
    %228 = math.tanh %227 : vector<1x128xf32>
    %229 = arith.mulf %225, %199 : vector<1x128xf32>
    %230 = arith.mulf %224, %228 : vector<1x128xf32>
    %231 = arith.addf %229, %230 : vector<1x128xf32>
    %232 = math.tanh %231 : vector<1x128xf32>
    %233 = arith.mulf %226, %232 : vector<1x128xf32>
    %cst_67 = arith.constant dense<0xFF800000> : vector<1xf32>
    %234 = vector.multi_reduction <maximumf>, %233, %cst_67 [1] : vector<1x128xf32> to vector<1xf32>
    %235 = vector.shape_cast %234 : vector<1xf32> to vector<1x1xf32>
    %236 = vector.broadcast %235 : vector<1x1xf32> to vector<1x128xf32>
    %237 = arith.subf %233, %236 : vector<1x128xf32>
    %238 = math.exp %237 : vector<1x128xf32>
    %cst_68 = arith.constant dense<0.000000e+00> : vector<1xf32>
    %239 = vector.multi_reduction <add>, %238, %cst_68 [1] : vector<1x128xf32> to vector<1xf32>
    %240 = vector.shape_cast %239 : vector<1xf32> to vector<1x1xf32>
    %241 = tpu.reciprocal %240 {approx = true} : vector<1x1xf32> -> vector<1x1xf32>
    %242 = vector.broadcast %241 : vector<1x1xf32> to vector<1x128xf32>
    %243 = arith.mulf %238, %242 : vector<1x128xf32>
    %244 = arith.index_cast %c6_i32 : i32 to index
    %c0_69 = arith.constant 0 : index
    %245 = vector.load %arg5[%244, %c0_69] : memref<20x128xf32, #tpu.memory_space<vmem>>, vector<1x128xf32>
    tpu.vector_store %arg5[%244, %c0_69], %243 {strides = array<i32>} : memref<20x128xf32, #tpu.memory_space<vmem>>, vector<1x128xf32>,
    %c7_i32 = arith.constant 7 : i32
    %c0_70 = arith.constant 0 : index
    %c0_71 = arith.constant 0 : index
    %246 = vector.load %arg3[%c0_70, %c0_71] : memref<128x512xf32, #tpu.memory_space<vmem>>, vector<128x512xf32>
    %cst_72 = arith.constant dense<0.000000e+00> : vector<1x512xf32>
    %247 = tpu.matmul %243, %246, %cst_72 {dimension_numbers = #tpu.dot_dimension_numbers<[1], [0], [0], [1], [0, 0, 1, 1], [], []>} : vector<1x128xf32>, vector<128x512xf32>, vector<1x512xf32> -> vector<1x512xf32>
    %c0_73 = arith.constant 0 : index
    %c0_74 = arith.constant 0 : index
    %248 = vector.load %arg4[%c0_73, %c0_74] : memref<1x512xf32, #tpu.memory_space<vmem>>, vector<1x512xf32>
    %249 = arith.addf %247, %248 : vector<1x512xf32>
    %250 = vector.extract_strided_slice %249 {offsets = [0, 0], sizes = [1, 384], strides = [1, 1]} : vector<1x512xf32> to vector<1x384xf32>
    %251 = arith.negf %250 : vector<1x384xf32>
    %252 = math.exp %251 : vector<1x384xf32>
    %cst_75 = arith.constant 1.000000e+00 : f32
    %253 = vector.broadcast %cst_75 : f32 to vector<1x384xf32>
    %254 = arith.addf %253, %252 : vector<1x384xf32>
    %255 = arith.divf %253, %254 : vector<1x384xf32>
    %256 = vector.extract_strided_slice %255 {offsets = [0, 0], sizes = [1, 128], strides = [1, 1]} : vector<1x384xf32> to vector<1x128xf32>
    %257 = vector.extract_strided_slice %255 {offsets = [0, 128], sizes = [1, 128], strides = [1, 1]} : vector<1x384xf32> to vector<1x128xf32>
    %258 = vector.extract_strided_slice %255 {offsets = [0, 256], sizes = [1, 128], strides = [1, 1]} : vector<1x384xf32> to vector<1x128xf32>
    %259 = vector.extract_strided_slice %249 {offsets = [0, 384], sizes = [1, 128], strides = [1, 1]} : vector<1x512xf32> to vector<1x128xf32>
    %260 = math.tanh %259 : vector<1x128xf32>
    %261 = arith.mulf %257, %231 : vector<1x128xf32>
    %262 = arith.mulf %256, %260 : vector<1x128xf32>
    %263 = arith.addf %261, %262 : vector<1x128xf32>
    %264 = math.tanh %263 : vector<1x128xf32>
    %265 = arith.mulf %258, %264 : vector<1x128xf32>
    %cst_76 = arith.constant dense<0xFF800000> : vector<1xf32>
    %266 = vector.multi_reduction <maximumf>, %265, %cst_76 [1] : vector<1x128xf32> to vector<1xf32>
    %267 = vector.shape_cast %266 : vector<1xf32> to vector<1x1xf32>
    %268 = vector.broadcast %267 : vector<1x1xf32> to vector<1x128xf32>
    %269 = arith.subf %265, %268 : vector<1x128xf32>
    %270 = math.exp %269 : vector<1x128xf32>
    %cst_77 = arith.constant dense<0.000000e+00> : vector<1xf32>
    %271 = vector.multi_reduction <add>, %270, %cst_77 [1] : vector<1x128xf32> to vector<1xf32>
    %272 = vector.shape_cast %271 : vector<1xf32> to vector<1x1xf32>
    %273 = tpu.reciprocal %272 {approx = true} : vector<1x1xf32> -> vector<1x1xf32>
    %274 = vector.broadcast %273 : vector<1x1xf32> to vector<1x128xf32>
    %275 = arith.mulf %270, %274 : vector<1x128xf32>
    %276 = arith.index_cast %c7_i32 : i32 to index
    %c0_78 = arith.constant 0 : index
    %277 = vector.load %arg5[%276, %c0_78] : memref<20x128xf32, #tpu.memory_space<vmem>>, vector<1x128xf32>
    tpu.vector_store %arg5[%276, %c0_78], %275 {strides = array<i32>} : memref<20x128xf32, #tpu.memory_space<vmem>>, vector<1x128xf32>,
    %c8_i32 = arith.constant 8 : i32
    %c0_79 = arith.constant 0 : index
    %c0_80 = arith.constant 0 : index
    %278 = vector.load %arg3[%c0_79, %c0_80] : memref<128x512xf32, #tpu.memory_space<vmem>>, vector<128x512xf32>
    %cst_81 = arith.constant dense<0.000000e+00> : vector<1x512xf32>
    %279 = tpu.matmul %275, %278, %cst_81 {dimension_numbers = #tpu.dot_dimension_numbers<[1], [0], [0], [1], [0, 0, 1, 1], [], []>} : vector<1x128xf32>, vector<128x512xf32>, vector<1x512xf32> -> vector<1x512xf32>
    %c0_82 = arith.constant 0 : index
    %c0_83 = arith.constant 0 : index
    %280 = vector.load %arg4[%c0_82, %c0_83] : memref<1x512xf32, #tpu.memory_space<vmem>>, vector<1x512xf32>
    %281 = arith.addf %279, %280 : vector<1x512xf32>
    %282 = vector.extract_strided_slice %281 {offsets = [0, 0], sizes = [1, 384], strides = [1, 1]} : vector<1x512xf32> to vector<1x384xf32>
    %283 = arith.negf %282 : vector<1x384xf32>
    %284 = math.exp %283 : vector<1x384xf32>
    %cst_84 = arith.constant 1.000000e+00 : f32
    %285 = vector.broadcast %cst_84 : f32 to vector<1x384xf32>
    %286 = arith.addf %285, %284 : vector<1x384xf32>
    %287 = arith.divf %285, %286 : vector<1x384xf32>
    %288 = vector.extract_strided_slice %287 {offsets = [0, 0], sizes = [1, 128], strides = [1, 1]} : vector<1x384xf32> to vector<1x128xf32>
    %289 = vector.extract_strided_slice %287 {offsets = [0, 128], sizes = [1, 128], strides = [1, 1]} : vector<1x384xf32> to vector<1x128xf32>
    %290 = vector.extract_strided_slice %287 {offsets = [0, 256], sizes = [1, 128], strides = [1, 1]} : vector<1x384xf32> to vector<1x128xf32>
    %291 = vector.extract_strided_slice %281 {offsets = [0, 384], sizes = [1, 128], strides = [1, 1]} : vector<1x512xf32> to vector<1x128xf32>
    %292 = math.tanh %291 : vector<1x128xf32>
    %293 = arith.mulf %289, %263 : vector<1x128xf32>
    %294 = arith.mulf %288, %292 : vector<1x128xf32>
    %295 = arith.addf %293, %294 : vector<1x128xf32>
    %296 = math.tanh %295 : vector<1x128xf32>
    %297 = arith.mulf %290, %296 : vector<1x128xf32>
    %cst_85 = arith.constant dense<0xFF800000> : vector<1xf32>
    %298 = vector.multi_reduction <maximumf>, %297, %cst_85 [1] : vector<1x128xf32> to vector<1xf32>
    %299 = vector.shape_cast %298 : vector<1xf32> to vector<1x1xf32>
    %300 = vector.broadcast %299 : vector<1x1xf32> to vector<1x128xf32>
    %301 = arith.subf %297, %300 : vector<1x128xf32>
    %302 = math.exp %301 : vector<1x128xf32>
    %cst_86 = arith.constant dense<0.000000e+00> : vector<1xf32>
    %303 = vector.multi_reduction <add>, %302, %cst_86 [1] : vector<1x128xf32> to vector<1xf32>
    %304 = vector.shape_cast %303 : vector<1xf32> to vector<1x1xf32>
    %305 = tpu.reciprocal %304 {approx = true} : vector<1x1xf32> -> vector<1x1xf32>
    %306 = vector.broadcast %305 : vector<1x1xf32> to vector<1x128xf32>
    %307 = arith.mulf %302, %306 : vector<1x128xf32>
    %308 = arith.index_cast %c8_i32 : i32 to index
    %c0_87 = arith.constant 0 : index
    %309 = vector.load %arg5[%308, %c0_87] : memref<20x128xf32, #tpu.memory_space<vmem>>, vector<1x128xf32>
    tpu.vector_store %arg5[%308, %c0_87], %307 {strides = array<i32>} : memref<20x128xf32, #tpu.memory_space<vmem>>, vector<1x128xf32>,
    %c9_i32 = arith.constant 9 : i32
    %c0_88 = arith.constant 0 : index
    %c0_89 = arith.constant 0 : index
    %310 = vector.load %arg3[%c0_88, %c0_89] : memref<128x512xf32, #tpu.memory_space<vmem>>, vector<128x512xf32>
    %cst_90 = arith.constant dense<0.000000e+00> : vector<1x512xf32>
    %311 = tpu.matmul %307, %310, %cst_90 {dimension_numbers = #tpu.dot_dimension_numbers<[1], [0], [0], [1], [0, 0, 1, 1], [], []>} : vector<1x128xf32>, vector<128x512xf32>, vector<1x512xf32> -> vector<1x512xf32>
    %c0_91 = arith.constant 0 : index
    %c0_92 = arith.constant 0 : index
    %312 = vector.load %arg4[%c0_91, %c0_92] : memref<1x512xf32, #tpu.memory_space<vmem>>, vector<1x512xf32>
    %313 = arith.addf %311, %312 : vector<1x512xf32>
    %314 = vector.extract_strided_slice %313 {offsets = [0, 0], sizes = [1, 384], strides = [1, 1]} : vector<1x512xf32> to vector<1x384xf32>
    %315 = arith.negf %314 : vector<1x384xf32>
    %316 = math.exp %315 : vector<1x384xf32>
    %cst_93 = arith.constant 1.000000e+00 : f32
    %317 = vector.broadcast %cst_93 : f32 to vector<1x384xf32>
    %318 = arith.addf %317, %316 : vector<1x384xf32>
    %319 = arith.divf %317, %318 : vector<1x384xf32>
    %320 = vector.extract_strided_slice %319 {offsets = [0, 0], sizes = [1, 128], strides = [1, 1]} : vector<1x384xf32> to vector<1x128xf32>
    %321 = vector.extract_strided_slice %319 {offsets = [0, 128], sizes = [1, 128], strides = [1, 1]} : vector<1x384xf32> to vector<1x128xf32>
    %322 = vector.extract_strided_slice %319 {offsets = [0, 256], sizes = [1, 128], strides = [1, 1]} : vector<1x384xf32> to vector<1x128xf32>
    %323 = vector.extract_strided_slice %313 {offsets = [0, 384], sizes = [1, 128], strides = [1, 1]} : vector<1x512xf32> to vector<1x128xf32>
    %324 = math.tanh %323 : vector<1x128xf32>
    %325 = arith.mulf %321, %295 : vector<1x128xf32>
    %326 = arith.mulf %320, %324 : vector<1x128xf32>
    %327 = arith.addf %325, %326 : vector<1x128xf32>
    %328 = math.tanh %327 : vector<1x128xf32>
    %329 = arith.mulf %322, %328 : vector<1x128xf32>
    %cst_94 = arith.constant dense<0xFF800000> : vector<1xf32>
    %330 = vector.multi_reduction <maximumf>, %329, %cst_94 [1] : vector<1x128xf32> to vector<1xf32>
    %331 = vector.shape_cast %330 : vector<1xf32> to vector<1x1xf32>
    %332 = vector.broadcast %331 : vector<1x1xf32> to vector<1x128xf32>
    %333 = arith.subf %329, %332 : vector<1x128xf32>
    %334 = math.exp %333 : vector<1x128xf32>
    %cst_95 = arith.constant dense<0.000000e+00> : vector<1xf32>
    %335 = vector.multi_reduction <add>, %334, %cst_95 [1] : vector<1x128xf32> to vector<1xf32>
    %336 = vector.shape_cast %335 : vector<1xf32> to vector<1x1xf32>
    %337 = tpu.reciprocal %336 {approx = true} : vector<1x1xf32> -> vector<1x1xf32>
    %338 = vector.broadcast %337 : vector<1x1xf32> to vector<1x128xf32>
    %339 = arith.mulf %334, %338 : vector<1x128xf32>
    %340 = arith.index_cast %c9_i32 : i32 to index
    %c0_96 = arith.constant 0 : index
    %341 = vector.load %arg5[%340, %c0_96] : memref<20x128xf32, #tpu.memory_space<vmem>>, vector<1x128xf32>
    tpu.vector_store %arg5[%340, %c0_96], %339 {strides = array<i32>} : memref<20x128xf32, #tpu.memory_space<vmem>>, vector<1x128xf32>,
    %c10_i32 = arith.constant 10 : i32
    %c0_97 = arith.constant 0 : index
    %c0_98 = arith.constant 0 : index
    %342 = vector.load %arg3[%c0_97, %c0_98] : memref<128x512xf32, #tpu.memory_space<vmem>>, vector<128x512xf32>
    %cst_99 = arith.constant dense<0.000000e+00> : vector<1x512xf32>
    %343 = tpu.matmul %339, %342, %cst_99 {dimension_numbers = #tpu.dot_dimension_numbers<[1], [0], [0], [1], [0, 0, 1, 1], [], []>} : vector<1x128xf32>, vector<128x512xf32>, vector<1x512xf32> -> vector<1x512xf32>
    %c0_100 = arith.constant 0 : index
    %c0_101 = arith.constant 0 : index
    %344 = vector.load %arg4[%c0_100, %c0_101] : memref<1x512xf32, #tpu.memory_space<vmem>>, vector<1x512xf32>
    %345 = arith.addf %343, %344 : vector<1x512xf32>
    %346 = vector.extract_strided_slice %345 {offsets = [0, 0], sizes = [1, 384], strides = [1, 1]} : vector<1x512xf32> to vector<1x384xf32>
    %347 = arith.negf %346 : vector<1x384xf32>
    %348 = math.exp %347 : vector<1x384xf32>
    %cst_102 = arith.constant 1.000000e+00 : f32
    %349 = vector.broadcast %cst_102 : f32 to vector<1x384xf32>
    %350 = arith.addf %349, %348 : vector<1x384xf32>
    %351 = arith.divf %349, %350 : vector<1x384xf32>
    %352 = vector.extract_strided_slice %351 {offsets = [0, 0], sizes = [1, 128], strides = [1, 1]} : vector<1x384xf32> to vector<1x128xf32>
    %353 = vector.extract_strided_slice %351 {offsets = [0, 128], sizes = [1, 128], strides = [1, 1]} : vector<1x384xf32> to vector<1x128xf32>
    %354 = vector.extract_strided_slice %351 {offsets = [0, 256], sizes = [1, 128], strides = [1, 1]} : vector<1x384xf32> to vector<1x128xf32>
    %355 = vector.extract_strided_slice %345 {offsets = [0, 384], sizes = [1, 128], strides = [1, 1]} : vector<1x512xf32> to vector<1x128xf32>
    %356 = math.tanh %355 : vector<1x128xf32>
    %357 = arith.mulf %353, %327 : vector<1x128xf32>
    %358 = arith.mulf %352, %356 : vector<1x128xf32>
    %359 = arith.addf %357, %358 : vector<1x128xf32>
    %360 = math.tanh %359 : vector<1x128xf32>
    %361 = arith.mulf %354, %360 : vector<1x128xf32>
    %cst_103 = arith.constant dense<0xFF800000> : vector<1xf32>
    %362 = vector.multi_reduction <maximumf>, %361, %cst_103 [1] : vector<1x128xf32> to vector<1xf32>
    %363 = vector.shape_cast %362 : vector<1xf32> to vector<1x1xf32>
    %364 = vector.broadcast %363 : vector<1x1xf32> to vector<1x128xf32>
    %365 = arith.subf %361, %364 : vector<1x128xf32>
    %366 = math.exp %365 : vector<1x128xf32>
    %cst_104 = arith.constant dense<0.000000e+00> : vector<1xf32>
    %367 = vector.multi_reduction <add>, %366, %cst_104 [1] : vector<1x128xf32> to vector<1xf32>
    %368 = vector.shape_cast %367 : vector<1xf32> to vector<1x1xf32>
    %369 = tpu.reciprocal %368 {approx = true} : vector<1x1xf32> -> vector<1x1xf32>
    %370 = vector.broadcast %369 : vector<1x1xf32> to vector<1x128xf32>
    %371 = arith.mulf %366, %370 : vector<1x128xf32>
    %372 = arith.index_cast %c10_i32 : i32 to index
    %c0_105 = arith.constant 0 : index
    %373 = vector.load %arg5[%372, %c0_105] : memref<20x128xf32, #tpu.memory_space<vmem>>, vector<1x128xf32>
    tpu.vector_store %arg5[%372, %c0_105], %371 {strides = array<i32>} : memref<20x128xf32, #tpu.memory_space<vmem>>, vector<1x128xf32>,
    %c11_i32 = arith.constant 11 : i32
    %c0_106 = arith.constant 0 : index
    %c0_107 = arith.constant 0 : index
    %374 = vector.load %arg3[%c0_106, %c0_107] : memref<128x512xf32, #tpu.memory_space<vmem>>, vector<128x512xf32>
    %cst_108 = arith.constant dense<0.000000e+00> : vector<1x512xf32>
    %375 = tpu.matmul %371, %374, %cst_108 {dimension_numbers = #tpu.dot_dimension_numbers<[1], [0], [0], [1], [0, 0, 1, 1], [], []>} : vector<1x128xf32>, vector<128x512xf32>, vector<1x512xf32> -> vector<1x512xf32>
    %c0_109 = arith.constant 0 : index
    %c0_110 = arith.constant 0 : index
    %376 = vector.load %arg4[%c0_109, %c0_110] : memref<1x512xf32, #tpu.memory_space<vmem>>, vector<1x512xf32>
    %377 = arith.addf %375, %376 : vector<1x512xf32>
    %378 = vector.extract_strided_slice %377 {offsets = [0, 0], sizes = [1, 384], strides = [1, 1]} : vector<1x512xf32> to vector<1x384xf32>
    %379 = arith.negf %378 : vector<1x384xf32>
    %380 = math.exp %379 : vector<1x384xf32>
    %cst_111 = arith.constant 1.000000e+00 : f32
    %381 = vector.broadcast %cst_111 : f32 to vector<1x384xf32>
    %382 = arith.addf %381, %380 : vector<1x384xf32>
    %383 = arith.divf %381, %382 : vector<1x384xf32>
    %384 = vector.extract_strided_slice %383 {offsets = [0, 0], sizes = [1, 128], strides = [1, 1]} : vector<1x384xf32> to vector<1x128xf32>
    %385 = vector.extract_strided_slice %383 {offsets = [0, 128], sizes = [1, 128], strides = [1, 1]} : vector<1x384xf32> to vector<1x128xf32>
    %386 = vector.extract_strided_slice %383 {offsets = [0, 256], sizes = [1, 128], strides = [1, 1]} : vector<1x384xf32> to vector<1x128xf32>
    %387 = vector.extract_strided_slice %377 {offsets = [0, 384], sizes = [1, 128], strides = [1, 1]} : vector<1x512xf32> to vector<1x128xf32>
    %388 = math.tanh %387 : vector<1x128xf32>
    %389 = arith.mulf %385, %359 : vector<1x128xf32>
    %390 = arith.mulf %384, %388 : vector<1x128xf32>
    %391 = arith.addf %389, %390 : vector<1x128xf32>
    %392 = math.tanh %391 : vector<1x128xf32>
    %393 = arith.mulf %386, %392 : vector<1x128xf32>
    %cst_112 = arith.constant dense<0xFF800000> : vector<1xf32>
    %394 = vector.multi_reduction <maximumf>, %393, %cst_112 [1] : vector<1x128xf32> to vector<1xf32>
    %395 = vector.shape_cast %394 : vector<1xf32> to vector<1x1xf32>
    %396 = vector.broadcast %395 : vector<1x1xf32> to vector<1x128xf32>
    %397 = arith.subf %393, %396 : vector<1x128xf32>
    %398 = math.exp %397 : vector<1x128xf32>
    %cst_113 = arith.constant dense<0.000000e+00> : vector<1xf32>
    %399 = vector.multi_reduction <add>, %398, %cst_113 [1] : vector<1x128xf32> to vector<1xf32>
    %400 = vector.shape_cast %399 : vector<1xf32> to vector<1x1xf32>
    %401 = tpu.reciprocal %400 {approx = true} : vector<1x1xf32> -> vector<1x1xf32>
    %402 = vector.broadcast %401 : vector<1x1xf32> to vector<1x128xf32>
    %403 = arith.mulf %398, %402 : vector<1x128xf32>
    %404 = arith.index_cast %c11_i32 : i32 to index
    %c0_114 = arith.constant 0 : index
    %405 = vector.load %arg5[%404, %c0_114] : memref<20x128xf32, #tpu.memory_space<vmem>>, vector<1x128xf32>
    tpu.vector_store %arg5[%404, %c0_114], %403 {strides = array<i32>} : memref<20x128xf32, #tpu.memory_space<vmem>>, vector<1x128xf32>,
    %c12_i32 = arith.constant 12 : i32
    %c0_115 = arith.constant 0 : index
    %c0_116 = arith.constant 0 : index
    %406 = vector.load %arg3[%c0_115, %c0_116] : memref<128x512xf32, #tpu.memory_space<vmem>>, vector<128x512xf32>
    %cst_117 = arith.constant dense<0.000000e+00> : vector<1x512xf32>
    %407 = tpu.matmul %403, %406, %cst_117 {dimension_numbers = #tpu.dot_dimension_numbers<[1], [0], [0], [1], [0, 0, 1, 1], [], []>} : vector<1x128xf32>, vector<128x512xf32>, vector<1x512xf32> -> vector<1x512xf32>
    %c0_118 = arith.constant 0 : index
    %c0_119 = arith.constant 0 : index
    %408 = vector.load %arg4[%c0_118, %c0_119] : memref<1x512xf32, #tpu.memory_space<vmem>>, vector<1x512xf32>
    %409 = arith.addf %407, %408 : vector<1x512xf32>
    %410 = vector.extract_strided_slice %409 {offsets = [0, 0], sizes = [1, 384], strides = [1, 1]} : vector<1x512xf32> to vector<1x384xf32>
    %411 = arith.negf %410 : vector<1x384xf32>
    %412 = math.exp %411 : vector<1x384xf32>
    %cst_120 = arith.constant 1.000000e+00 : f32
    %413 = vector.broadcast %cst_120 : f32 to vector<1x384xf32>
    %414 = arith.addf %413, %412 : vector<1x384xf32>
    %415 = arith.divf %413, %414 : vector<1x384xf32>
    %416 = vector.extract_strided_slice %415 {offsets = [0, 0], sizes = [1, 128], strides = [1, 1]} : vector<1x384xf32> to vector<1x128xf32>
    %417 = vector.extract_strided_slice %415 {offsets = [0, 128], sizes = [1, 128], strides = [1, 1]} : vector<1x384xf32> to vector<1x128xf32>
    %418 = vector.extract_strided_slice %415 {offsets = [0, 256], sizes = [1, 128], strides = [1, 1]} : vector<1x384xf32> to vector<1x128xf32>
    %419 = vector.extract_strided_slice %409 {offsets = [0, 384], sizes = [1, 128], strides = [1, 1]} : vector<1x512xf32> to vector<1x128xf32>
    %420 = math.tanh %419 : vector<1x128xf32>
    %421 = arith.mulf %417, %391 : vector<1x128xf32>
    %422 = arith.mulf %416, %420 : vector<1x128xf32>
    %423 = arith.addf %421, %422 : vector<1x128xf32>
    %424 = math.tanh %423 : vector<1x128xf32>
    %425 = arith.mulf %418, %424 : vector<1x128xf32>
    %cst_121 = arith.constant dense<0xFF800000> : vector<1xf32>
    %426 = vector.multi_reduction <maximumf>, %425, %cst_121 [1] : vector<1x128xf32> to vector<1xf32>
    %427 = vector.shape_cast %426 : vector<1xf32> to vector<1x1xf32>
    %428 = vector.broadcast %427 : vector<1x1xf32> to vector<1x128xf32>
    %429 = arith.subf %425, %428 : vector<1x128xf32>
    %430 = math.exp %429 : vector<1x128xf32>
    %cst_122 = arith.constant dense<0.000000e+00> : vector<1xf32>
    %431 = vector.multi_reduction <add>, %430, %cst_122 [1] : vector<1x128xf32> to vector<1xf32>
    %432 = vector.shape_cast %431 : vector<1xf32> to vector<1x1xf32>
    %433 = tpu.reciprocal %432 {approx = true} : vector<1x1xf32> -> vector<1x1xf32>
    %434 = vector.broadcast %433 : vector<1x1xf32> to vector<1x128xf32>
    %435 = arith.mulf %430, %434 : vector<1x128xf32>
    %436 = arith.index_cast %c12_i32 : i32 to index
    %c0_123 = arith.constant 0 : index
    %437 = vector.load %arg5[%436, %c0_123] : memref<20x128xf32, #tpu.memory_space<vmem>>, vector<1x128xf32>
    tpu.vector_store %arg5[%436, %c0_123], %435 {strides = array<i32>} : memref<20x128xf32, #tpu.memory_space<vmem>>, vector<1x128xf32>,
    %c13_i32 = arith.constant 13 : i32
    %c0_124 = arith.constant 0 : index
    %c0_125 = arith.constant 0 : index
    %438 = vector.load %arg3[%c0_124, %c0_125] : memref<128x512xf32, #tpu.memory_space<vmem>>, vector<128x512xf32>
    %cst_126 = arith.constant dense<0.000000e+00> : vector<1x512xf32>
    %439 = tpu.matmul %435, %438, %cst_126 {dimension_numbers = #tpu.dot_dimension_numbers<[1], [0], [0], [1], [0, 0, 1, 1], [], []>} : vector<1x128xf32>, vector<128x512xf32>, vector<1x512xf32> -> vector<1x512xf32>
    %c0_127 = arith.constant 0 : index
    %c0_128 = arith.constant 0 : index
    %440 = vector.load %arg4[%c0_127, %c0_128] : memref<1x512xf32, #tpu.memory_space<vmem>>, vector<1x512xf32>
    %441 = arith.addf %439, %440 : vector<1x512xf32>
    %442 = vector.extract_strided_slice %441 {offsets = [0, 0], sizes = [1, 384], strides = [1, 1]} : vector<1x512xf32> to vector<1x384xf32>
    %443 = arith.negf %442 : vector<1x384xf32>
    %444 = math.exp %443 : vector<1x384xf32>
    %cst_129 = arith.constant 1.000000e+00 : f32
    %445 = vector.broadcast %cst_129 : f32 to vector<1x384xf32>
    %446 = arith.addf %445, %444 : vector<1x384xf32>
    %447 = arith.divf %445, %446 : vector<1x384xf32>
    %448 = vector.extract_strided_slice %447 {offsets = [0, 0], sizes = [1, 128], strides = [1, 1]} : vector<1x384xf32> to vector<1x128xf32>
    %449 = vector.extract_strided_slice %447 {offsets = [0, 128], sizes = [1, 128], strides = [1, 1]} : vector<1x384xf32> to vector<1x128xf32>
    %450 = vector.extract_strided_slice %447 {offsets = [0, 256], sizes = [1, 128], strides = [1, 1]} : vector<1x384xf32> to vector<1x128xf32>
    %451 = vector.extract_strided_slice %441 {offsets = [0, 384], sizes = [1, 128], strides = [1, 1]} : vector<1x512xf32> to vector<1x128xf32>
    %452 = math.tanh %451 : vector<1x128xf32>
    %453 = arith.mulf %449, %423 : vector<1x128xf32>
    %454 = arith.mulf %448, %452 : vector<1x128xf32>
    %455 = arith.addf %453, %454 : vector<1x128xf32>
    %456 = math.tanh %455 : vector<1x128xf32>
    %457 = arith.mulf %450, %456 : vector<1x128xf32>
    %cst_130 = arith.constant dense<0xFF800000> : vector<1xf32>
    %458 = vector.multi_reduction <maximumf>, %457, %cst_130 [1] : vector<1x128xf32> to vector<1xf32>
    %459 = vector.shape_cast %458 : vector<1xf32> to vector<1x1xf32>
    %460 = vector.broadcast %459 : vector<1x1xf32> to vector<1x128xf32>
    %461 = arith.subf %457, %460 : vector<1x128xf32>
    %462 = math.exp %461 : vector<1x128xf32>
    %cst_131 = arith.constant dense<0.000000e+00> : vector<1xf32>
    %463 = vector.multi_reduction <add>, %462, %cst_131 [1] : vector<1x128xf32> to vector<1xf32>
    %464 = vector.shape_cast %463 : vector<1xf32> to vector<1x1xf32>
    %465 = tpu.reciprocal %464 {approx = true} : vector<1x1xf32> -> vector<1x1xf32>
    %466 = vector.broadcast %465 : vector<1x1xf32> to vector<1x128xf32>
    %467 = arith.mulf %462, %466 : vector<1x128xf32>
    %468 = arith.index_cast %c13_i32 : i32 to index
    %c0_132 = arith.constant 0 : index
    %469 = vector.load %arg5[%468, %c0_132] : memref<20x128xf32, #tpu.memory_space<vmem>>, vector<1x128xf32>
    tpu.vector_store %arg5[%468, %c0_132], %467 {strides = array<i32>} : memref<20x128xf32, #tpu.memory_space<vmem>>, vector<1x128xf32>,
    %c14_i32 = arith.constant 14 : i32
    %c0_133 = arith.constant 0 : index
    %c0_134 = arith.constant 0 : index
    %470 = vector.load %arg3[%c0_133, %c0_134] : memref<128x512xf32, #tpu.memory_space<vmem>>, vector<128x512xf32>
    %cst_135 = arith.constant dense<0.000000e+00> : vector<1x512xf32>
    %471 = tpu.matmul %467, %470, %cst_135 {dimension_numbers = #tpu.dot_dimension_numbers<[1], [0], [0], [1], [0, 0, 1, 1], [], []>} : vector<1x128xf32>, vector<128x512xf32>, vector<1x512xf32> -> vector<1x512xf32>
    %c0_136 = arith.constant 0 : index
    %c0_137 = arith.constant 0 : index
    %472 = vector.load %arg4[%c0_136, %c0_137] : memref<1x512xf32, #tpu.memory_space<vmem>>, vector<1x512xf32>
    %473 = arith.addf %471, %472 : vector<1x512xf32>
    %474 = vector.extract_strided_slice %473 {offsets = [0, 0], sizes = [1, 384], strides = [1, 1]} : vector<1x512xf32> to vector<1x384xf32>
    %475 = arith.negf %474 : vector<1x384xf32>
    %476 = math.exp %475 : vector<1x384xf32>
    %cst_138 = arith.constant 1.000000e+00 : f32
    %477 = vector.broadcast %cst_138 : f32 to vector<1x384xf32>
    %478 = arith.addf %477, %476 : vector<1x384xf32>
    %479 = arith.divf %477, %478 : vector<1x384xf32>
    %480 = vector.extract_strided_slice %479 {offsets = [0, 0], sizes = [1, 128], strides = [1, 1]} : vector<1x384xf32> to vector<1x128xf32>
    %481 = vector.extract_strided_slice %479 {offsets = [0, 128], sizes = [1, 128], strides = [1, 1]} : vector<1x384xf32> to vector<1x128xf32>
    %482 = vector.extract_strided_slice %479 {offsets = [0, 256], sizes = [1, 128], strides = [1, 1]} : vector<1x384xf32> to vector<1x128xf32>
    %483 = vector.extract_strided_slice %473 {offsets = [0, 384], sizes = [1, 128], strides = [1, 1]} : vector<1x512xf32> to vector<1x128xf32>
    %484 = math.tanh %483 : vector<1x128xf32>
    %485 = arith.mulf %481, %455 : vector<1x128xf32>
    %486 = arith.mulf %480, %484 : vector<1x128xf32>
    %487 = arith.addf %485, %486 : vector<1x128xf32>
    %488 = math.tanh %487 : vector<1x128xf32>
    %489 = arith.mulf %482, %488 : vector<1x128xf32>
    %cst_139 = arith.constant dense<0xFF800000> : vector<1xf32>
    %490 = vector.multi_reduction <maximumf>, %489, %cst_139 [1] : vector<1x128xf32> to vector<1xf32>
    %491 = vector.shape_cast %490 : vector<1xf32> to vector<1x1xf32>
    %492 = vector.broadcast %491 : vector<1x1xf32> to vector<1x128xf32>
    %493 = arith.subf %489, %492 : vector<1x128xf32>
    %494 = math.exp %493 : vector<1x128xf32>
    %cst_140 = arith.constant dense<0.000000e+00> : vector<1xf32>
    %495 = vector.multi_reduction <add>, %494, %cst_140 [1] : vector<1x128xf32> to vector<1xf32>
    %496 = vector.shape_cast %495 : vector<1xf32> to vector<1x1xf32>
    %497 = tpu.reciprocal %496 {approx = true} : vector<1x1xf32> -> vector<1x1xf32>
    %498 = vector.broadcast %497 : vector<1x1xf32> to vector<1x128xf32>
    %499 = arith.mulf %494, %498 : vector<1x128xf32>
    %500 = arith.index_cast %c14_i32 : i32 to index
    %c0_141 = arith.constant 0 : index
    %501 = vector.load %arg5[%500, %c0_141] : memref<20x128xf32, #tpu.memory_space<vmem>>, vector<1x128xf32>
    tpu.vector_store %arg5[%500, %c0_141], %499 {strides = array<i32>} : memref<20x128xf32, #tpu.memory_space<vmem>>, vector<1x128xf32>,
    %c15_i32 = arith.constant 15 : i32
    %c0_142 = arith.constant 0 : index
    %c0_143 = arith.constant 0 : index
    %502 = vector.load %arg3[%c0_142, %c0_143] : memref<128x512xf32, #tpu.memory_space<vmem>>, vector<128x512xf32>
    %cst_144 = arith.constant dense<0.000000e+00> : vector<1x512xf32>
    %503 = tpu.matmul %499, %502, %cst_144 {dimension_numbers = #tpu.dot_dimension_numbers<[1], [0], [0], [1], [0, 0, 1, 1], [], []>} : vector<1x128xf32>, vector<128x512xf32>, vector<1x512xf32> -> vector<1x512xf32>
    %c0_145 = arith.constant 0 : index
    %c0_146 = arith.constant 0 : index
    %504 = vector.load %arg4[%c0_145, %c0_146] : memref<1x512xf32, #tpu.memory_space<vmem>>, vector<1x512xf32>
    %505 = arith.addf %503, %504 : vector<1x512xf32>
    %506 = vector.extract_strided_slice %505 {offsets = [0, 0], sizes = [1, 384], strides = [1, 1]} : vector<1x512xf32> to vector<1x384xf32>
    %507 = arith.negf %506 : vector<1x384xf32>
    %508 = math.exp %507 : vector<1x384xf32>
    %cst_147 = arith.constant 1.000000e+00 : f32
    %509 = vector.broadcast %cst_147 : f32 to vector<1x384xf32>
    %510 = arith.addf %509, %508 : vector<1x384xf32>
    %511 = arith.divf %509, %510 : vector<1x384xf32>
    %512 = vector.extract_strided_slice %511 {offsets = [0, 0], sizes = [1, 128], strides = [1, 1]} : vector<1x384xf32> to vector<1x128xf32>
    %513 = vector.extract_strided_slice %511 {offsets = [0, 128], sizes = [1, 128], strides = [1, 1]} : vector<1x384xf32> to vector<1x128xf32>
    %514 = vector.extract_strided_slice %511 {offsets = [0, 256], sizes = [1, 128], strides = [1, 1]} : vector<1x384xf32> to vector<1x128xf32>
    %515 = vector.extract_strided_slice %505 {offsets = [0, 384], sizes = [1, 128], strides = [1, 1]} : vector<1x512xf32> to vector<1x128xf32>
    %516 = math.tanh %515 : vector<1x128xf32>
    %517 = arith.mulf %513, %487 : vector<1x128xf32>
    %518 = arith.mulf %512, %516 : vector<1x128xf32>
    %519 = arith.addf %517, %518 : vector<1x128xf32>
    %520 = math.tanh %519 : vector<1x128xf32>
    %521 = arith.mulf %514, %520 : vector<1x128xf32>
    %cst_148 = arith.constant dense<0xFF800000> : vector<1xf32>
    %522 = vector.multi_reduction <maximumf>, %521, %cst_148 [1] : vector<1x128xf32> to vector<1xf32>
    %523 = vector.shape_cast %522 : vector<1xf32> to vector<1x1xf32>
    %524 = vector.broadcast %523 : vector<1x1xf32> to vector<1x128xf32>
    %525 = arith.subf %521, %524 : vector<1x128xf32>
    %526 = math.exp %525 : vector<1x128xf32>
    %cst_149 = arith.constant dense<0.000000e+00> : vector<1xf32>
    %527 = vector.multi_reduction <add>, %526, %cst_149 [1] : vector<1x128xf32> to vector<1xf32>
    %528 = vector.shape_cast %527 : vector<1xf32> to vector<1x1xf32>
    %529 = tpu.reciprocal %528 {approx = true} : vector<1x1xf32> -> vector<1x1xf32>
    %530 = vector.broadcast %529 : vector<1x1xf32> to vector<1x128xf32>
    %531 = arith.mulf %526, %530 : vector<1x128xf32>
    %532 = arith.index_cast %c15_i32 : i32 to index
    %c0_150 = arith.constant 0 : index
    %533 = vector.load %arg5[%532, %c0_150] : memref<20x128xf32, #tpu.memory_space<vmem>>, vector<1x128xf32>
    tpu.vector_store %arg5[%532, %c0_150], %531 {strides = array<i32>} : memref<20x128xf32, #tpu.memory_space<vmem>>, vector<1x128xf32>,
    %c16_i32 = arith.constant 16 : i32
    %c0_151 = arith.constant 0 : index
    %c0_152 = arith.constant 0 : index
    %534 = vector.load %arg3[%c0_151, %c0_152] : memref<128x512xf32, #tpu.memory_space<vmem>>, vector<128x512xf32>
    %cst_153 = arith.constant dense<0.000000e+00> : vector<1x512xf32>
    %535 = tpu.matmul %531, %534, %cst_153 {dimension_numbers = #tpu.dot_dimension_numbers<[1], [0], [0], [1], [0, 0, 1, 1], [], []>} : vector<1x128xf32>, vector<128x512xf32>, vector<1x512xf32> -> vector<1x512xf32>
    %c0_154 = arith.constant 0 : index
    %c0_155 = arith.constant 0 : index
    %536 = vector.load %arg4[%c0_154, %c0_155] : memref<1x512xf32, #tpu.memory_space<vmem>>, vector<1x512xf32>
    %537 = arith.addf %535, %536 : vector<1x512xf32>
    %538 = vector.extract_strided_slice %537 {offsets = [0, 0], sizes = [1, 384], strides = [1, 1]} : vector<1x512xf32> to vector<1x384xf32>
    %539 = arith.negf %538 : vector<1x384xf32>
    %540 = math.exp %539 : vector<1x384xf32>
    %cst_156 = arith.constant 1.000000e+00 : f32
    %541 = vector.broadcast %cst_156 : f32 to vector<1x384xf32>
    %542 = arith.addf %541, %540 : vector<1x384xf32>
    %543 = arith.divf %541, %542 : vector<1x384xf32>
    %544 = vector.extract_strided_slice %543 {offsets = [0, 0], sizes = [1, 128], strides = [1, 1]} : vector<1x384xf32> to vector<1x128xf32>
    %545 = vector.extract_strided_slice %543 {offsets = [0, 128], sizes = [1, 128], strides = [1, 1]} : vector<1x384xf32> to vector<1x128xf32>
    %546 = vector.extract_strided_slice %543 {offsets = [0, 256], sizes = [1, 128], strides = [1, 1]} : vector<1x384xf32> to vector<1x128xf32>
    %547 = vector.extract_strided_slice %537 {offsets = [0, 384], sizes = [1, 128], strides = [1, 1]} : vector<1x512xf32> to vector<1x128xf32>
    %548 = math.tanh %547 : vector<1x128xf32>
    %549 = arith.mulf %545, %519 : vector<1x128xf32>
    %550 = arith.mulf %544, %548 : vector<1x128xf32>
    %551 = arith.addf %549, %550 : vector<1x128xf32>
    %552 = math.tanh %551 : vector<1x128xf32>
    %553 = arith.mulf %546, %552 : vector<1x128xf32>
    %cst_157 = arith.constant dense<0xFF800000> : vector<1xf32>
    %554 = vector.multi_reduction <maximumf>, %553, %cst_157 [1] : vector<1x128xf32> to vector<1xf32>
    %555 = vector.shape_cast %554 : vector<1xf32> to vector<1x1xf32>
    %556 = vector.broadcast %555 : vector<1x1xf32> to vector<1x128xf32>
    %557 = arith.subf %553, %556 : vector<1x128xf32>
    %558 = math.exp %557 : vector<1x128xf32>
    %cst_158 = arith.constant dense<0.000000e+00> : vector<1xf32>
    %559 = vector.multi_reduction <add>, %558, %cst_158 [1] : vector<1x128xf32> to vector<1xf32>
    %560 = vector.shape_cast %559 : vector<1xf32> to vector<1x1xf32>
    %561 = tpu.reciprocal %560 {approx = true} : vector<1x1xf32> -> vector<1x1xf32>
    %562 = vector.broadcast %561 : vector<1x1xf32> to vector<1x128xf32>
    %563 = arith.mulf %558, %562 : vector<1x128xf32>
    %564 = arith.index_cast %c16_i32 : i32 to index
    %c0_159 = arith.constant 0 : index
    %565 = vector.load %arg5[%564, %c0_159] : memref<20x128xf32, #tpu.memory_space<vmem>>, vector<1x128xf32>
    tpu.vector_store %arg5[%564, %c0_159], %563 {strides = array<i32>} : memref<20x128xf32, #tpu.memory_space<vmem>>, vector<1x128xf32>,
    %c17_i32 = arith.constant 17 : i32
    %c0_160 = arith.constant 0 : index
    %c0_161 = arith.constant 0 : index
    %566 = vector.load %arg3[%c0_160, %c0_161] : memref<128x512xf32, #tpu.memory_space<vmem>>, vector<128x512xf32>
    %cst_162 = arith.constant dense<0.000000e+00> : vector<1x512xf32>
    %567 = tpu.matmul %563, %566, %cst_162 {dimension_numbers = #tpu.dot_dimension_numbers<[1], [0], [0], [1], [0, 0, 1, 1], [], []>} : vector<1x128xf32>, vector<128x512xf32>, vector<1x512xf32> -> vector<1x512xf32>
    %c0_163 = arith.constant 0 : index
    %c0_164 = arith.constant 0 : index
    %568 = vector.load %arg4[%c0_163, %c0_164] : memref<1x512xf32, #tpu.memory_space<vmem>>, vector<1x512xf32>
    %569 = arith.addf %567, %568 : vector<1x512xf32>
    %570 = vector.extract_strided_slice %569 {offsets = [0, 0], sizes = [1, 384], strides = [1, 1]} : vector<1x512xf32> to vector<1x384xf32>
    %571 = arith.negf %570 : vector<1x384xf32>
    %572 = math.exp %571 : vector<1x384xf32>
    %cst_165 = arith.constant 1.000000e+00 : f32
    %573 = vector.broadcast %cst_165 : f32 to vector<1x384xf32>
    %574 = arith.addf %573, %572 : vector<1x384xf32>
    %575 = arith.divf %573, %574 : vector<1x384xf32>
    %576 = vector.extract_strided_slice %575 {offsets = [0, 0], sizes = [1, 128], strides = [1, 1]} : vector<1x384xf32> to vector<1x128xf32>
    %577 = vector.extract_strided_slice %575 {offsets = [0, 128], sizes = [1, 128], strides = [1, 1]} : vector<1x384xf32> to vector<1x128xf32>
    %578 = vector.extract_strided_slice %575 {offsets = [0, 256], sizes = [1, 128], strides = [1, 1]} : vector<1x384xf32> to vector<1x128xf32>
    %579 = vector.extract_strided_slice %569 {offsets = [0, 384], sizes = [1, 128], strides = [1, 1]} : vector<1x512xf32> to vector<1x128xf32>
    %580 = math.tanh %579 : vector<1x128xf32>
    %581 = arith.mulf %577, %551 : vector<1x128xf32>
    %582 = arith.mulf %576, %580 : vector<1x128xf32>
    %583 = arith.addf %581, %582 : vector<1x128xf32>
    %584 = math.tanh %583 : vector<1x128xf32>
    %585 = arith.mulf %578, %584 : vector<1x128xf32>
    %cst_166 = arith.constant dense<0xFF800000> : vector<1xf32>
    %586 = vector.multi_reduction <maximumf>, %585, %cst_166 [1] : vector<1x128xf32> to vector<1xf32>
    %587 = vector.shape_cast %586 : vector<1xf32> to vector<1x1xf32>
    %588 = vector.broadcast %587 : vector<1x1xf32> to vector<1x128xf32>
    %589 = arith.subf %585, %588 : vector<1x128xf32>
    %590 = math.exp %589 : vector<1x128xf32>
    %cst_167 = arith.constant dense<0.000000e+00> : vector<1xf32>
    %591 = vector.multi_reduction <add>, %590, %cst_167 [1] : vector<1x128xf32> to vector<1xf32>
    %592 = vector.shape_cast %591 : vector<1xf32> to vector<1x1xf32>
    %593 = tpu.reciprocal %592 {approx = true} : vector<1x1xf32> -> vector<1x1xf32>
    %594 = vector.broadcast %593 : vector<1x1xf32> to vector<1x128xf32>
    %595 = arith.mulf %590, %594 : vector<1x128xf32>
    %596 = arith.index_cast %c17_i32 : i32 to index
    %c0_168 = arith.constant 0 : index
    %597 = vector.load %arg5[%596, %c0_168] : memref<20x128xf32, #tpu.memory_space<vmem>>, vector<1x128xf32>
    tpu.vector_store %arg5[%596, %c0_168], %595 {strides = array<i32>} : memref<20x128xf32, #tpu.memory_space<vmem>>, vector<1x128xf32>,
    %c18_i32 = arith.constant 18 : i32
    %c0_169 = arith.constant 0 : index
    %c0_170 = arith.constant 0 : index
    %598 = vector.load %arg3[%c0_169, %c0_170] : memref<128x512xf32, #tpu.memory_space<vmem>>, vector<128x512xf32>
    %cst_171 = arith.constant dense<0.000000e+00> : vector<1x512xf32>
    %599 = tpu.matmul %595, %598, %cst_171 {dimension_numbers = #tpu.dot_dimension_numbers<[1], [0], [0], [1], [0, 0, 1, 1], [], []>} : vector<1x128xf32>, vector<128x512xf32>, vector<1x512xf32> -> vector<1x512xf32>
    %c0_172 = arith.constant 0 : index
    %c0_173 = arith.constant 0 : index
    %600 = vector.load %arg4[%c0_172, %c0_173] : memref<1x512xf32, #tpu.memory_space<vmem>>, vector<1x512xf32>
    %601 = arith.addf %599, %600 : vector<1x512xf32>
    %602 = vector.extract_strided_slice %601 {offsets = [0, 0], sizes = [1, 384], strides = [1, 1]} : vector<1x512xf32> to vector<1x384xf32>
    %603 = arith.negf %602 : vector<1x384xf32>
    %604 = math.exp %603 : vector<1x384xf32>
    %cst_174 = arith.constant 1.000000e+00 : f32
    %605 = vector.broadcast %cst_174 : f32 to vector<1x384xf32>
    %606 = arith.addf %605, %604 : vector<1x384xf32>
    %607 = arith.divf %605, %606 : vector<1x384xf32>
    %608 = vector.extract_strided_slice %607 {offsets = [0, 0], sizes = [1, 128], strides = [1, 1]} : vector<1x384xf32> to vector<1x128xf32>
    %609 = vector.extract_strided_slice %607 {offsets = [0, 128], sizes = [1, 128], strides = [1, 1]} : vector<1x384xf32> to vector<1x128xf32>
    %610 = vector.extract_strided_slice %607 {offsets = [0, 256], sizes = [1, 128], strides = [1, 1]} : vector<1x384xf32> to vector<1x128xf32>
    %611 = vector.extract_strided_slice %601 {offsets = [0, 384], sizes = [1, 128], strides = [1, 1]} : vector<1x512xf32> to vector<1x128xf32>
    %612 = math.tanh %611 : vector<1x128xf32>
    %613 = arith.mulf %609, %583 : vector<1x128xf32>
    %614 = arith.mulf %608, %612 : vector<1x128xf32>
    %615 = arith.addf %613, %614 : vector<1x128xf32>
    %616 = math.tanh %615 : vector<1x128xf32>
    %617 = arith.mulf %610, %616 : vector<1x128xf32>
    %cst_175 = arith.constant dense<0xFF800000> : vector<1xf32>
    %618 = vector.multi_reduction <maximumf>, %617, %cst_175 [1] : vector<1x128xf32> to vector<1xf32>
    %619 = vector.shape_cast %618 : vector<1xf32> to vector<1x1xf32>
    %620 = vector.broadcast %619 : vector<1x1xf32> to vector<1x128xf32>
    %621 = arith.subf %617, %620 : vector<1x128xf32>
    %622 = math.exp %621 : vector<1x128xf32>
    %cst_176 = arith.constant dense<0.000000e+00> : vector<1xf32>
    %623 = vector.multi_reduction <add>, %622, %cst_176 [1] : vector<1x128xf32> to vector<1xf32>
    %624 = vector.shape_cast %623 : vector<1xf32> to vector<1x1xf32>
    %625 = tpu.reciprocal %624 {approx = true} : vector<1x1xf32> -> vector<1x1xf32>
    %626 = vector.broadcast %625 : vector<1x1xf32> to vector<1x128xf32>
    %627 = arith.mulf %622, %626 : vector<1x128xf32>
    %628 = arith.index_cast %c18_i32 : i32 to index
    %c0_177 = arith.constant 0 : index
    %629 = vector.load %arg5[%628, %c0_177] : memref<20x128xf32, #tpu.memory_space<vmem>>, vector<1x128xf32>
    tpu.vector_store %arg5[%628, %c0_177], %627 {strides = array<i32>} : memref<20x128xf32, #tpu.memory_space<vmem>>, vector<1x128xf32>,
    %c19_i32 = arith.constant 19 : i32
    %c0_178 = arith.constant 0 : index
    %c0_179 = arith.constant 0 : index
    %630 = vector.load %arg3[%c0_178, %c0_179] : memref<128x512xf32, #tpu.memory_space<vmem>>, vector<128x512xf32>
    %cst_180 = arith.constant dense<0.000000e+00> : vector<1x512xf32>
    %631 = tpu.matmul %627, %630, %cst_180 {dimension_numbers = #tpu.dot_dimension_numbers<[1], [0], [0], [1], [0, 0, 1, 1], [], []>} : vector<1x128xf32>, vector<128x512xf32>, vector<1x512xf32> -> vector<1x512xf32>
    %c0_181 = arith.constant 0 : index
    %c0_182 = arith.constant 0 : index
    %632 = vector.load %arg4[%c0_181, %c0_182] : memref<1x512xf32, #tpu.memory_space<vmem>>, vector<1x512xf32>
    %633 = arith.addf %631, %632 : vector<1x512xf32>
    %634 = vector.extract_strided_slice %633 {offsets = [0, 0], sizes = [1, 384], strides = [1, 1]} : vector<1x512xf32> to vector<1x384xf32>
    %635 = arith.negf %634 : vector<1x384xf32>
    %636 = math.exp %635 : vector<1x384xf32>
    %cst_183 = arith.constant 1.000000e+00 : f32
    %637 = vector.broadcast %cst_183 : f32 to vector<1x384xf32>
    %638 = arith.addf %637, %636 : vector<1x384xf32>
    %639 = arith.divf %637, %638 : vector<1x384xf32>
    %640 = vector.extract_strided_slice %639 {offsets = [0, 0], sizes = [1, 128], strides = [1, 1]} : vector<1x384xf32> to vector<1x128xf32>
    %641 = vector.extract_strided_slice %639 {offsets = [0, 128], sizes = [1, 128], strides = [1, 1]} : vector<1x384xf32> to vector<1x128xf32>
    %642 = vector.extract_strided_slice %639 {offsets = [0, 256], sizes = [1, 128], strides = [1, 1]} : vector<1x384xf32> to vector<1x128xf32>
    %643 = vector.extract_strided_slice %633 {offsets = [0, 384], sizes = [1, 128], strides = [1, 1]} : vector<1x512xf32> to vector<1x128xf32>
    %644 = math.tanh %643 : vector<1x128xf32>
    %645 = arith.mulf %641, %615 : vector<1x128xf32>
    %646 = arith.mulf %640, %644 : vector<1x128xf32>
    %647 = arith.addf %645, %646 : vector<1x128xf32>
    %648 = math.tanh %647 : vector<1x128xf32>
    %649 = arith.mulf %642, %648 : vector<1x128xf32>
    %cst_184 = arith.constant dense<0xFF800000> : vector<1xf32>
    %650 = vector.multi_reduction <maximumf>, %649, %cst_184 [1] : vector<1x128xf32> to vector<1xf32>
    %651 = vector.shape_cast %650 : vector<1xf32> to vector<1x1xf32>
    %652 = vector.broadcast %651 : vector<1x1xf32> to vector<1x128xf32>
    %653 = arith.subf %649, %652 : vector<1x128xf32>
    %654 = math.exp %653 : vector<1x128xf32>
    %cst_185 = arith.constant dense<0.000000e+00> : vector<1xf32>
    %655 = vector.multi_reduction <add>, %654, %cst_185 [1] : vector<1x128xf32> to vector<1xf32>
    %656 = vector.shape_cast %655 : vector<1xf32> to vector<1x1xf32>
    %657 = tpu.reciprocal %656 {approx = true} : vector<1x1xf32> -> vector<1x1xf32>
    %658 = vector.broadcast %657 : vector<1x1xf32> to vector<1x128xf32>
    %659 = arith.mulf %654, %658 : vector<1x128xf32>
    %660 = arith.index_cast %c19_i32 : i32 to index
    %c0_186 = arith.constant 0 : index
    %661 = vector.load %arg5[%660, %c0_186] : memref<20x128xf32, #tpu.memory_space<vmem>>, vector<1x128xf32>
    tpu.vector_store %arg5[%660, %c0_186], %659 {strides = array<i32>} : memref<20x128xf32, #tpu.memory_space<vmem>>, vector<1x128xf32>,
    %c20_i32 = arith.constant 20 : i32
    return
  }
}

</mosaic_0001>

<bundles_post_ra>
// kernel: tpu_custom_call.1
= control target key start
LH: loop header
LB: loop body
LE: loop exit
PB: predicated region body
PF: predicated region fallthrough
CT: control target
= control target key end

     0   :  { %10 = vsyncpa [#allocation3], 0  ;;  %s8910_s0 = inlined_call_operand.hbm [shape: f32[1,32], index: 0, kind: input, shape index: {}]   ;;  %s8911_s1 = inlined_call_operand.hbm [shape: f32[32,512], index: 1, kind: input, shape index: {}]   ;;  %s8912_s2 = inlined_call_operand.vmem [shape: f32[1,512], index: 2, kind: input, shape index: {}]   ;;  %s8913_s3 = inlined_call_operand.hbm [shape: f32[128,512], index: 3, kind: input, shape index: {}]   ;;  %s8914_s4 = inlined_call_operand.vmem [shape: f32[1,512], index: 4, kind: input, shape index: {}]   ;;  %s8915_s5 = inlined_call_operand.hbm [shape: f32[20,128], index: 5, kind: output, shape index: {}]  }
   0x1   :  { %11 = vsyncpa [#allocation6], 0 }
   0x2   :  { %12 = vsyncpa [#allocation4], 0  ;;  %s7448_s18 = smov [#allocation5]   ;;  %s7354_s22 = scalar_lea.hbm %s8911_s1, 2048 }
   0x3   :  { %s28_s19 = sshll.u32 %s7448_s18, 4  ;;  %p7355_p0 = scmp.ne.s32.totalorder %s8911_s1, %s7354_s22  ;;  %s29_s19 = int_to_ptr.vmem [resolvable:$true] %s28_s19 }
   0x4   :  { %p7358_p1 = scmp.lt.u32.totalorder %s7354_s22, %s8911_s1 }
   0x6   :  { %p7360_p2 = pnand %p7358_p1, %p7355_p0 }
   0x8   :  { %7363 = shalt.err (!%p7360_p2)
}
   0x9   :  { %s7364_s27 = scalar_lea.vmem %s29_s19, 2048  ;;  %p7369_p4 = scmp.lt.s32.totalorder %s29_s19, %s29_s19 }
   0xa   :  { %p7365_p3 = scmp.ne.s32.totalorder %s29_s19, %s7364_s27  ;;  %p7370_p5 = scmp.lt.s32.totalorder %s7364_s27, %s7364_s27 }
   0xc   :  { %p7371_p6 = por %p7370_p5, %p7369_p4 }
   0xe   :  { %p7372_p7 = pnand %p7371_p6, %p7365_p3 }
  0x10   :  { %7375 = shalt.err (!%p7372_p7)
}
  0x11   :  { %s7449_s28 = smov 512   ;;  %s7450_s29 = smov 32  }
  0x12   :  { %34 = dma.hbm_to_vmem [thread:$0]  %s8911_s1, 2048, %s29_s19, [#allocation6], %s7449_s28, %s7449_s28, %s7450_s29  }
  0x13   :  { %s7451_s7 = smov [#allocation2]   ;;  %s7452_s9 = smov [#allocation7]  }
  0x14   :  { %s19_s8 = sshll.u32 %s7451_s7, 4  ;;  %s42_s10 = sshll.u32 %s7452_s9, 4  ;;  %s20_s8 = int_to_ptr.vmem [resolvable:$true] %s19_s8  ;;  %s43_s10 = int_to_ptr.vmem [resolvable:$true] %s42_s10 }
  0x15   :  { %s7376_s13 = scalar_lea.hbm %s8910_s0, 16 }
  0x16   :  { %p7377_p8 = scmp.ne.s32.totalorder %s8910_s0, %s7376_s13  ;;  %p7380_p9 = scmp.lt.u32.totalorder %s7376_s13, %s8910_s0 }
  0x18   :  { %p7382_p10 = pnand %p7380_p9, %p7377_p8 }
  0x1a   :  { %7385 = shalt.err (!%p7382_p10)
}
  0x1b   :  { %s7386_s1 = scalar_lea.vmem %s20_s8, 16  ;;  %s7390_s18 = scalar_lea.vmem %s20_s8, 32 }
  0x1c   :  { %p7387_p11 = scmp.ne.s32.totalorder %s20_s8, %s7386_s1  ;;  %p7391_p12 = scmp.lt.s32.totalorder %s20_s8, %s20_s8 }
  0x1d   :  { %p7392_p13 = scmp.lt.s32.totalorder %s7390_s18, %s7386_s1 }
  0x1f   :  { %p7393_p0 = por %p7392_p13, %p7391_p12 }
  0x21   :  { %p7394_p1 = pnand %p7393_p0, %p7387_p11 }
  0x23   :  { %7397 = shalt.err (!%p7394_p1)
}
  0x24   :  { %22 = dma.hbm_to_vmem [thread:$0]  %s8910_s0, 16, %s20_s8, [#allocation3]  }
  0x25   :  { %s7398_s23 = scalar_lea.hbm %s8913_s3, 8192 }
  0x26   :  { %p7399_p2 = scmp.ne.s32.totalorder %s8913_s3, %s7398_s23  ;;  %p7402_p3 = scmp.lt.u32.totalorder %s7398_s23, %s8913_s3 }
  0x28   :  { %p7404_p4 = pnand %p7402_p3, %p7399_p2 }
  0x2a   :  { %7407 = shalt.err (!%p7404_p4)
}
  0x2b   :  { %s7408_s30 = scalar_lea.vmem %s43_s10, 8192  ;;  %p7413_p6 = scmp.lt.s32.totalorder %s43_s10, %s43_s10 }
  0x2c   :  { %p7409_p5 = scmp.ne.s32.totalorder %s43_s10, %s7408_s30  ;;  %p7414_p7 = scmp.lt.s32.totalorder %s7408_s30, %s7408_s30 }
  0x2e   :  { %p7415_p8 = por %p7414_p7, %p7413_p6 }
  0x30   :  { %p7416_p9 = pnand %p7415_p8, %p7409_p5 }
  0x32   :  { %7419 = shalt.err (!%p7416_p9)
}
  0x33   :  { %48 = dma.hbm_to_vmem [thread:$0]  %s8913_s3, 8192, %s43_s10, [#allocation6], %s7449_s28, %s7449_s28, %s7450_s29  }
  0x34   :  { %7442 = dma.done.wait [#allocation3], 16  }
  0x35   :  { %7443 = vsyncadd [#allocation3], 4294967280 }
  0x36   :  { %7444 = dma.done.wait [#allocation6], 10240  }
  0x37   :  { %7445 = vsyncadd [#allocation6], 4294957056  ;;  %v7453_v0 = vmov 0.0   ;;  %v62_v1 = vld [vmem:[#allocation5 + $0x8] sm:$0xff]  ;;  %v61_v3 = vld [vmem:[#allocation5] sm:$0xff]  ;;  %vm99_vm0 = vcmask 261120  }
  0x38   :  { %167 = vmatprep.mubr.f32.mxu0 %v7453_v0  ;;  %238 = vmatprep.mubr.f32.mxu1 %v7453_v0  ;;  %v66_v2 = vld [vmem:[#allocation5 + $0x28] sm:$0xff]  ;;  %v65_v5 = vld [vmem:[#allocation5 + $0x20] sm:$0xff]  ;;  %v64_v12 = vld [vmem:[#allocation5 + $0x18] sm:$0xff]  ;;  %vm521_vm1 = vcmask 1040384  }
  0x39   :  { %v5633_v4 = vpack.c.bf16 %v66_v2, %v62_v1  ;;  %v70_v6 = vld [vmem:[#allocation5 + $0x48] sm:$0xff]  ;;  %v5635_v8 = vpack.c.bf16 %v65_v5, %v61_v3  ;;  %v69_v10 = vld [vmem:[#allocation5 + $0x40] sm:$0xff]  ;;  %v68_v13 = vld [vmem:[#allocation5 + $0x38] sm:$0xff] }
  0x3a   :  { %v74_v7 = vld [vmem:[#allocation5 + $0x68] sm:$0xff]  ;;  %v73_v11 = vld [vmem:[#allocation5 + $0x60] sm:$0xff]  ;;  %v63_v14 = vld [vmem:[#allocation5 + $0x10] sm:$0xff]  ;;  %v5641_v16 = vpack.c.bf16 %v68_v13, %v64_v12 }
  0x3b   :  { %v5637_v9 = vpack.c.bf16 %v74_v7, %v70_v6  ;;  %5634 = vmatprep.subr.bf16.mxu0 %v5633_v4  ;;  %v5639_v15 = vpack.c.bf16 %v73_v11, %v69_v10  ;;  %v67_v17 = vld [vmem:[#allocation5 + $0x30] sm:$0xff]  ;;  %v72_v18 = vld [vmem:[#allocation5 + $0x58] sm:$0xff]  ;;  %v270_v26 = vld [vmem:[#allocation7 + $0x8] sm:$0xff] }
  0x3c   :  { %5636 = vmatpush1.bf16.msra.mxu0 %v5635_v8  ;;  %v76_v19 = vld [vmem:[#allocation5 + $0x78] sm:$0xff]  ;;  %v5643_v20 = vpack.c.bf16 %v67_v17, %v63_v14  ;;  %v71_v22 = vld [vmem:[#allocation5 + $0x50] sm:$0xff]  ;;  %5642 = vmatprep.subr.bf16.mxu1 %v5641_v16  ;;  %v274_v27 = vld [vmem:[#allocation7 + $0x28] sm:$0xff] }
  0x3d   :  { %5638 = vmatprep.subr.bf16.mxu0 %v5637_v9  ;;  %v5645_v21 = vpack.c.bf16 %v76_v19, %v72_v18  ;;  %v75_v23 = vld [vmem:[#allocation5 + $0x70] sm:$0xff]  ;;  %v60_v25 = vld [vmem:[#allocation2] sm:$0x1]  ;;  %v7533_v29 = vpack.c.bf16 %v274_v27, %v270_v26  ;;  %v269_v31 = vld [vmem:[#allocation7] sm:$0xff] }
  0x3e   :  { %5644 = vmatpush1.bf16.msra.mxu1 %v5643_v20  ;;  %v5647_v24 = vpack.c.bf16 %v75_v23, %v71_v22  ;;  %v272_v28 = vld [vmem:[#allocation7 + $0x18] sm:$0xff]  ;;  %v273_v32 = vld [vmem:[#allocation7 + $0x20] sm:$0xff]  ;;  %v271_v35 = vld [vmem:[#allocation7 + $0x10] sm:$0xff] }
  0x3f   :  { %5646 = vmatprep.subr.bf16.mxu1 %v5645_v21  ;;  %v276_v30 = vld [vmem:[#allocation7 + $0x38] sm:$0xff]  ;;  %v7537_v34 = vpack.c.bf16 %v273_v32, %v269_v31  ;;  %v275_v36 = vld [vmem:[#allocation7 + $0x30] sm:$0xff]  ;;  %v278_v38 = vld [vmem:[#allocation7 + $0x48] sm:$0xff] }
  0x40   :  { %5640 = vmatpush1.bf16.msra.mxu0 %v5639_v15  ;;  %v7535_v33 = vpack.c.bf16 %v276_v30, %v272_v28  ;;  %v7540_v37 = vpack.c.bf16 %v275_v36, %v271_v35  ;;  %v282_v39 = vld [vmem:[#allocation7 + $0x68] sm:$0xff]  ;;  %v280_v40 = vld [vmem:[#allocation7 + $0x58] sm:$0xff]  ;;  %v277_v43 = vld [vmem:[#allocation7 + $0x40] sm:$0xff] }
  0x41   :  { %5650 = vmatprep.subr.bf16.mxu0 %v7533_v29  ;;  %v7545_v41 = vpack.c.bf16 %v282_v39, %v278_v38  ;;  %v284_v42 = vld [vmem:[#allocation7 + $0x78] sm:$0xff]  ;;  %v281_v44 = vld [vmem:[#allocation7 + $0x60] sm:$0xff]  ;;  %v279_v47 = vld [vmem:[#allocation7 + $0x50] sm:$0xff] }
  0x42   :  { %5648 = vmatpush1.bf16.msra.mxu1 %v5647_v24  ;;  %v7547_v45 = vpack.c.bf16 %v284_v42, %v280_v40  ;;  %v7549_v46 = vpack.c.bf16 %v281_v44, %v277_v43  ;;  %v283_v48 = vld [vmem:[#allocation7 + $0x70] sm:$0xff]  ;;  %v286_v50 = vld [vmem:[#allocation7 + $0x88] sm:$0xff]  ;;  %v288_v52 = vld [vmem:[#allocation7 + $0x98] sm:$0xff] }
  0x43   :  { %5568 = vmatmul.mubr.msk.f32.vlgmr.msra.gmra.mrb[0].mxu0 %vm99_vm0, %v60_v25  ;;  %5682 = vmatprep.subr.bf16.mxu1 %v7535_v33  ;;  %v7552_v49 = vpack.c.bf16 %v283_v48, %v279_v47  ;;  %v290_v51 = vld [vmem:[#allocation7 + $0xa8] sm:$0xff]  ;;  %v292_v54 = vld [vmem:[#allocation7 + $0xb8] sm:$0xff]  ;;  %v285_v55 = vld [vmem:[#allocation7 + $0x80] sm:$0xff] }
  0x44   :  { %419 = vmatprep.mubr.f32.mxu0 %v7453_v0  ;;  %5652 = vmatpush1.bf16.msra.mxu0 %v7537_v34  ;;  %v7557_v53 = vpack.c.bf16 %v290_v51, %v286_v50  ;;  %v289_v56 = vld [vmem:[#allocation7 + $0xa0] sm:$0xff]  ;;  %v7559_v57 = vpack.c.bf16 %v292_v54, %v288_v52  ;;  %v287_v59 = vld [vmem:[#allocation7 + $0x90] sm:$0xff]  ;;  %v294_v62 = vld [vmem:[#allocation7 + $0xc8] sm:$0xff] }
  0x45   :  { %5569 = vmatmul.mubr.msk.f32.vlgmr.msra.gmra.mrb[0].mxu1 %vm99_vm0, %v60_v25  ;;  %5654 = vmatprep.subr.bf16.mxu0 %v7545_v41  ;;  %v7561_v58 = vpack.c.bf16 %v289_v56, %v285_v55  ;;  %v291_v60 = vld [vmem:[#allocation7 + $0xb0] sm:$0xff]  ;;  %v298_v63 = vld [vmem:[#allocation7 + $0xe8] sm:$0xff]  ;;  %v296_v1 = vld [vmem:[#allocation7 + $0xd8] sm:$0xff] }
  0x46   :  { %490 = vmatprep.mubr.f32.mxu1 %v7453_v0  ;;  %5684 = vmatpush1.bf16.msra.mxu1 %v7540_v37  ;;  %v7564_v61 = vpack.c.bf16 %v291_v60, %v287_v59  ;;  %v7569_v2 = vpack.c.bf16 %v298_v63, %v294_v62  ;;  %v300_v3 = vld [vmem:[#allocation7 + $0xf8] sm:$0xff]  ;;  %v293_v4 = vld [vmem:[#allocation7 + $0xc0] sm:$0xff]  ;;  %v295_v8 = vld [vmem:[#allocation7 + $0xd0] sm:$0xff] }
  0x47   :  { %5686 = vmatprep.subr.bf16.mxu1 %v7547_v45  ;;  %v297_v5 = vld [vmem:[#allocation7 + $0xe0] sm:$0xff]  ;;  %v7571_v6 = vpack.c.bf16 %v300_v3, %v296_v1  ;;  %v299_v9 = vld [vmem:[#allocation7 + $0xf0] sm:$0xff]  ;;  %v302_v11 = vld [vmem:[#allocation7 + $0x108] sm:$0xff] }
  0x48   :  { %5656 = vmatpush1.bf16.msra.mxu0 %v7549_v46  ;;  %v7573_v7 = vpack.c.bf16 %v297_v5, %v293_v4  ;;  %v7576_v10 = vpack.c.bf16 %v299_v9, %v295_v8  ;;  %v306_v12 = vld [vmem:[#allocation7 + $0x128] sm:$0xff]  ;;  %v304_v13 = vld [vmem:[#allocation7 + $0x118] sm:$0xff]  ;;  %v301_v16 = vld [vmem:[#allocation7 + $0x100] sm:$0xff] }
  0x49   :  { %5658 = vmatprep.subr.bf16.mxu0 %v7557_v53  ;;  %v7581_v14 = vpack.c.bf16 %v306_v12, %v302_v11  ;;  %v308_v15 = vld [vmem:[#allocation7 + $0x138] sm:$0xff]  ;;  %v305_v17 = vld [vmem:[#allocation7 + $0x120] sm:$0xff]  ;;  %v303_v20 = vld [vmem:[#allocation7 + $0x110] sm:$0xff]  ;;  %v79_v12 = vlaneseq }
  0x4a   :  { %5688 = vmatpush1.bf16.msra.mxu1 %v7552_v49  ;;  %v7583_v18 = vpack.c.bf16 %v308_v15, %v304_v13  ;;  %v7585_v19 = vpack.c.bf16 %v305_v17, %v301_v16  ;;  %v307_v21 = vld [vmem:[#allocation7 + $0x130] sm:$0xff]  ;;  %v310_v23 = vld [vmem:[#allocation7 + $0x148] sm:$0xff]  ;;  %v312_v25 = vld [vmem:[#allocation7 + $0x158] sm:$0xff] }
  0x4b   :  { %5690 = vmatprep.subr.bf16.mxu1 %v7559_v57  ;;  %v7588_v22 = vpack.c.bf16 %v307_v21, %v303_v20  ;;  %v314_v24 = vld [vmem:[#allocation7 + $0x168] sm:$0xff]  ;;  %v316_v27 = vld [vmem:[#allocation7 + $0x178] sm:$0xff]  ;;  %v309_v28 = vld [vmem:[#allocation7 + $0x140] sm:$0xff]  ;;  %v80_v13 = vshrl.u32 %v79_v12, 7 }
  0x4c   :  { %5660 = vmatpush1.bf16.msra.mxu0 %v7561_v58  ;;  %v7593_v26 = vpack.c.bf16 %v314_v24, %v310_v23  ;;  %v313_v30 = vld [vmem:[#allocation7 + $0x160] sm:$0xff]  ;;  %v7595_v31 = vpack.c.bf16 %v316_v27, %v312_v25  ;;  %v311_v35 = vld [vmem:[#allocation7 + $0x150] sm:$0xff]  ;;  %v318_v38 = vld [vmem:[#allocation7 + $0x188] sm:$0xff] }
  0x4d   :  { %5662 = vmatprep.subr.bf16.mxu0 %v7569_v2  ;;  %v7597_v32 = vpack.c.bf16 %v313_v30, %v309_v28  ;;  %v315_v36 = vld [vmem:[#allocation7 + $0x170] sm:$0xff]  ;;  %v322_v40 = vld [vmem:[#allocation7 + $0x1a8] sm:$0xff]  ;;  %v320_v42 = vld [vmem:[#allocation7 + $0x198] sm:$0xff]  ;;  %v7631_v15 = vsub.s32 0, %v80_v13  ;;  %v7636_v17 = vsub.s32 1, %v80_v13  ;;  %v7640_v23 = vsub.s32 2, %v80_v13 }
  0x4e   :  { %5692 = vmatpush1.bf16.msra.mxu1 %v7564_v61  ;;  %v7600_v39 = vpack.c.bf16 %v315_v36, %v311_v35  ;;  %v324_v43 = vld [vmem:[#allocation7 + $0x1b8] sm:$0xff]  ;;  %v7604_v44 = vpack.c.bf16 %v322_v40, %v318_v38  ;;  %v317_v48 = vld [vmem:[#allocation7 + $0x180] sm:$0xff]  ;;  %v319_v51 = vld [vmem:[#allocation7 + $0x190] sm:$0xff]  ;;  %v7643_v40 = vsub.s32 3, %v80_v13 }
  0x4f   :  { %5694 = vmatprep.subr.bf16.mxu1 %v7571_v6  ;;  %v7606_v47 = vpack.c.bf16 %v324_v43, %v320_v42  ;;  %v321_v50 = vld [vmem:[#allocation7 + $0x1a0] sm:$0xff]  ;;  %v323_v54 = vld [vmem:[#allocation7 + $0x1b0] sm:$0xff]  ;;  %v326_v55 = vld [vmem:[#allocation7 + $0x1c8] sm:$0xff] }
  0x50   :  { %5664 = vmatpush1.bf16.msra.mxu0 %v7573_v7  ;;  %v7609_v52 = vpack.c.bf16 %v321_v50, %v317_v48  ;;  %v330_v56 = vld [vmem:[#allocation7 + $0x1e8] sm:$0xff]  ;;  %v7613_v59 = vpack.c.bf16 %v323_v54, %v319_v51  ;;  %v328_v62 = vld [vmem:[#allocation7 + $0x1d8] sm:$0xff]  ;;  %v325_v1 = vld [vmem:[#allocation7 + $0x1c0] sm:$0xff] }
  0x51   :  { %5666 = vmatprep.subr.bf16.mxu0 %v7581_v14  ;;  %v7615_v60 = vpack.c.bf16 %v330_v56, %v326_v55  ;;  %v332_v63 = vld [vmem:[#allocation7 + $0x1f8] sm:$0xff]  ;;  %v329_v4 = vld [vmem:[#allocation7 + $0x1e0] sm:$0xff]  ;;  %v327_v5 = vld [vmem:[#allocation7 + $0x1d0] sm:$0xff] }
  0x52   :  { %5696 = vmatpush1.bf16.msra.mxu1 %v7576_v10  ;;  %v7617_v3 = vpack.c.bf16 %v332_v63, %v328_v62  ;;  %v331_v8 = vld [vmem:[#allocation7 + $0x1f0] sm:$0xff]  ;;  %v7620_v9 = vpack.c.bf16 %v329_v4, %v325_v1 }
  0x53   :  { %5698 = vmatprep.subr.bf16.mxu1 %v7583_v18  ;;  %v7624_v11 = vpack.c.bf16 %v331_v8, %v327_v5  ;;  %v77_v16 = vld [vmem:[%s8912_s2] sm:$0xf] }
  0x54   :  { %5668 = vmatpush1.bf16.msra.mxu0 %v7585_v19  ;;  %v82_v20 = vrot.slane %v77_v16, %v7631_v15  ;;  %v86_v21 = vrot.slane %v77_v16, %v7636_v17  ;;  %v90_v35 = vrot.slane %v77_v16, %v7640_v23  ;;  %v94_v48 = vrot.slane %v77_v16, %v7643_v40 }
  0x55   :  { %5670 = vmatprep.subr.bf16.mxu0 %v7593_v26 }
  0x56   :  { %5700 = vmatpush1.bf16.msra.mxu1 %v7588_v22 }
  0x57   :  { %5702 = vmatprep.subr.bf16.mxu1 %v7595_v31 }
  0x58   :  { %5672 = vmatpush1.bf16.msra.mxu0 %v7597_v32 }
  0x59   :  { %5674 = vmatprep.subr.bf16.mxu0 %v7604_v44 }
  0x5a   :  { %5704 = vmatpush1.bf16.msra.mxu1 %v7600_v39 }
  0x5b   :  { %5706 = vmatprep.subr.bf16.mxu1 %v7606_v47 }
  0x5c   :  { %5676 = vmatpush1.bf16.msra.mxu0 %v7609_v52 }
  0x5d   :  { %5678 = vmatprep.subr.bf16.mxu0 %v7615_v60 }
  0x5e   :  { %5708 = vmatpush1.bf16.msra.mxu1 %v7613_v59 }
  0x5f   :  { %5710 = vmatprep.subr.bf16.mxu1 %v7617_v3 }
  0x60   :  { %5680 = vmatpush1.bf16.msra.mxu0 %v7620_v9 }
  0x61   :  { %5714 = vmatprep.subr.bf16.mxu0 %v7533_v29 }
  0x62   :  { %5712 = vmatpush1.bf16.msra.mxu1 %v7624_v11 }
  0x63   :  { %5746 = vmatprep.subr.bf16.mxu1 %v7535_v33 }
 0x116   :  { %v169_v24 = vpop.f32.mrb[0].mxu0 }
 0x117   :  { %v170_v25 = vadd.f32 %v169_v24, %v82_v20  ;;  %v171_v27 = vpop.f32.mrb[1].mxu0 }
 0x118   :  { %v172_v28 = vadd.f32 %v171_v27, %v86_v21  ;;  %v240_v36 = vpop.f32.mrb[0].mxu1 }
 0x119   :  { %v5570_v30 = vmul.f32 -1.442695, %v170_v25  ;;  %v242_v42 = vpop.f32.mrb[1].mxu1  ;;  %v241_v43 = vadd.f32 %v240_v36, %v90_v35  ;;  %v333_v25 = vld [vmem:[%s8914_s4] sm:$0xf] }
 0x11a   :  { %v5571_v38 = vmul.f32 -1.442695, %v172_v28  ;;  %v243_v51 = vadd.f32 %v242_v42, %v94_v48  ;;  %v338_v27 = vrot.slane %v333_v25, %v7631_v15  ;;  %v342_v28 = vrot.slane %v333_v25, %v7636_v17 }
 0x11b   :  { %6938 = vpow2.f32 %v5570_v30  ;;  %v5572_v50 = vmul.f32 -1.442695, %v241_v43 }
 0x11c   :  { %6940 = vpow2.f32 %v5571_v38 }
 0x11d   :  { %6942 = vpow2.f32 %v5572_v50 }
 0x11e   :  { %6944 = vtanh.f32 %v243_v51 }
 0x125   :  { %v6939_v54 = vpop.eup %6938 }
 0x126   :  { %v6941_v55 = vpop.eup %6940  ;;  %v254_v56 = vadd.f32 1.0, %v6939_v54 }
 0x127   :  { %v255_v62 = vadd.f32 1.0, %v6941_v55  ;;  %v6943_v63 = vpop.eup %6942 }
 0x128   :  { %6946 = vrcp.f32 %v254_v56  ;;  %v6945_v1 = vpop.eup %6944  ;;  %v256_v5 = vadd.f32 1.0, %v6943_v63 }
 0x129   :  { %6948 = vrcp.f32 %v255_v62 }
 0x12a   :  { %6950 = vrcp.f32 %v256_v5 }
 0x132   :  { %v6947_v4 = vpop.eup %6946 }
 0x133   :  { %v6949_v8 = vpop.eup %6948  ;;  %v265_v12 = vmul.f32 %v6947_v4, %v6945_v1 }
 0x134   :  { %v264_v13 = vmul.f32 0.0, %v6949_v8  ;;  %v6951_v16 = vpop.eup %6950 }
 0x136   :  { %v7646_v20 = vadd.f32 %v265_v12, %v264_v13 }
 0x138   :  { %6952 = vtanh.f32 %v7646_v20 }
 0x142   :  { %v6953_v21 = vpop.eup %6952 }
 0x143   :  { %v268_v24 = vmul.f32 %v6953_v21, %v6951_v16 }
 0x145   :  { %420 = vmatmul.mubr.f32.vlgmr.msra.gmra.mrb[2].mxu0 %v268_v24  ;;  %491 = vmatmul.mubr.f32.vlgmr.msra.gmra.mrb[2].mxu1 %v268_v24 }
 0x146   :  { %5716 = vmatpush1.bf16.msra.mxu0 %v7537_v34  ;;  %5748 = vmatpush1.bf16.msra.mxu1 %v7540_v37 }
 0x147   :  { %5718 = vmatprep.subr.bf16.mxu0 %v7545_v41  ;;  %5750 = vmatprep.subr.bf16.mxu1 %v7547_v45 }
 0x148   :  { %684 = vmatprep.mubr.f32.mxu0 %v7453_v0  ;;  %755 = vmatprep.mubr.f32.mxu1 %v7453_v0 }
 0x14a   :  { %5720 = vmatpush1.bf16.msra.mxu0 %v7549_v46  ;;  %5752 = vmatpush1.bf16.msra.mxu1 %v7552_v49 }
 0x14b   :  { %5722 = vmatprep.subr.bf16.mxu0 %v7557_v53  ;;  %5754 = vmatprep.subr.bf16.mxu1 %v7559_v57 }
 0x14e   :  { %5724 = vmatpush1.bf16.msra.mxu0 %v7561_v58  ;;  %5756 = vmatpush1.bf16.msra.mxu1 %v7564_v61 }
 0x14f   :  { %5726 = vmatprep.subr.bf16.mxu0 %v7569_v2  ;;  %5758 = vmatprep.subr.bf16.mxu1 %v7571_v6 }
 0x152   :  { %5728 = vmatpush1.bf16.msra.mxu0 %v7573_v7  ;;  %5760 = vmatpush1.bf16.msra.mxu1 %v7576_v10 }
 0x153   :  { %5730 = vmatprep.subr.bf16.mxu0 %v7581_v14  ;;  %5762 = vmatprep.subr.bf16.mxu1 %v7583_v18 }
 0x156   :  { %5732 = vmatpush1.bf16.msra.mxu0 %v7585_v19  ;;  %5764 = vmatpush1.bf16.msra.mxu1 %v7588_v22 }
 0x157   :  { %5734 = vmatprep.subr.bf16.mxu0 %v7593_v26  ;;  %5766 = vmatprep.subr.bf16.mxu1 %v7595_v31 }
 0x15a   :  { %5736 = vmatpush1.bf16.msra.mxu0 %v7597_v32  ;;  %5768 = vmatpush1.bf16.msra.mxu1 %v7600_v39 }
 0x15b   :  { %5738 = vmatprep.subr.bf16.mxu0 %v7604_v44  ;;  %5770 = vmatprep.subr.bf16.mxu1 %v7606_v47 }
 0x15e   :  { %5740 = vmatpush1.bf16.msra.mxu0 %v7609_v52  ;;  %5772 = vmatpush1.bf16.msra.mxu1 %v7613_v59 }
 0x15f   :  { %5742 = vmatprep.subr.bf16.mxu0 %v7615_v60  ;;  %5774 = vmatprep.subr.bf16.mxu1 %v7617_v3 }
 0x162   :  { %5744 = vmatpush1.bf16.msra.mxu0 %v7620_v9  ;;  %5776 = vmatpush1.bf16.msra.mxu1 %v7624_v11 }
 0x163   :  { %5778 = vmatprep.subr.bf16.mxu0 %v7533_v29  ;;  %5810 = vmatprep.subr.bf16.mxu1 %v7535_v33  ;;  %v346_v29 = vrot.slane %v333_v25, %v7640_v23  ;;  %v350_v33 = vrot.slane %v333_v25, %v7643_v40 }
 0x218   :  { %v421_v30 = vpop.f32.mrb[2].mxu0  ;;  %v492_v35 = vpop.f32.mrb[2].mxu1 }
 0x219   :  { %v422_v36 = vadd.f32 %v421_v30, %v338_v27  ;;  %v423_v38 = vpop.f32.mrb[3].mxu0  ;;  %v494_v42 = vpop.f32.mrb[3].mxu1  ;;  %v493_v51 = vadd.f32 %v492_v35, %v346_v29 }
 0x21a   :  { %v424_v43 = vadd.f32 %v423_v38, %v342_v28  ;;  %v495_v54 = vadd.f32 %v494_v42, %v350_v33 }
 0x21b   :  { %v5573_v48 = vmul.f32 -1.442695, %v422_v36  ;;  %v5575_v55 = vmul.f32 -1.442695, %v493_v51 }
 0x21c   :  { %v5574_v50 = vmul.f32 -1.442695, %v424_v43 }
 0x21d   :  { %6954 = vpow2.f32 %v5573_v48 }
 0x21e   :  { %6956 = vpow2.f32 %v5574_v50 }
 0x21f   :  { %6958 = vtanh.f32 %v495_v54 }
 0x220   :  { %6960 = vpow2.f32 %v5575_v55 }
 0x227   :  { %v6955_v56 = vpop.eup %6954 }
 0x228   :  { %v506_v62 = vadd.f32 1.0, %v6955_v56  ;;  %v6957_v63 = vpop.eup %6956 }
 0x229   :  { %v507_v1 = vadd.f32 1.0, %v6957_v63  ;;  %v6959_v4 = vpop.eup %6958 }
 0x22a   :  { %6962 = vrcp.f32 %v506_v62  ;;  %v6961_v5 = vpop.eup %6960 }
 0x22b   :  { %6964 = vrcp.f32 %v507_v1  ;;  %v508_v16 = vadd.f32 1.0, %v6961_v5  ;;  %v862_v5 = vld [vmem:[%s8914_s4] sm:$0xf] }
 0x22d   :  { %6966 = vrcp.f32 %v508_v16 }
 0x234   :  { %v6963_v8 = vpop.eup %6962 }
 0x235   :  { %v517_v12 = vmul.f32 %v6963_v8, %v6959_v4  ;;  %v6965_v13 = vpop.eup %6964  ;;  %v867_v8 = vrot.slane %v862_v5, %v7631_v15 }
 0x236   :  { %v516_v21 = vmul.f32 %v6965_v13, %v7646_v20 }
 0x237   :  { %v6967_v25 = vpop.eup %6966 }
 0x238   :  { %v7691_v24 = vadd.f32 %v517_v12, %v516_v21  ;;  %v871_v12 = vrot.slane %v862_v5, %v7636_v17 }
 0x23a   :  { %6968 = vtanh.f32 %v7691_v24 }
 0x244   :  { %v6969_v27 = vpop.eup %6968 }
 0x245   :  { %v520_v28 = vmul.f32 %v6969_v27, %v6967_v25 }
 0x247   :  { %v522_v30 = vsel %vm521_vm1, %v520_v28, -inf }
 0x248   :  { %523 = vmax.xlane.f32.xlu0 %v522_v30 }
 0x2d5   :  { %v524_v35 = vpop.xlane.xlu0 %523 }
 0x2d6   :  { %v525_v36 = vsub.f32 %v520_v28, %v524_v35  ;;  %v875_v35 = vrot.slane %v862_v5, %v7640_v23 }
 0x2d8   :  { %v526_v38 = vmul.f32 1.442695, %v525_v36  ;;  %v879_v36 = vrot.slane %v862_v5, %v7643_v40  ;;  %v1081_v5 = vld [vmem:[#allocation7 + $0x98] sm:$0xff] }
 0x2da   :  { %6970 = vpow2.f32 %v526_v38 }
 0x2e4   :  { %v6971_v42 = vpop.eup %6970 }
 0x2e5   :  { %v528_v43 = vsel %vm521_vm1, %v6971_v42, 0.0 }
 0x2e6   :  { %529 = vadd.xlane.f32.xlu0 %v528_v43 }
 0x373   :  { %v530_v20 = vpop.xlane.xlu0 %529 }
 0x374   :  { %6972 = vrcp.f32 %v530_v20 }
 0x37e   :  { %v6973_v48 = vpop.eup %6972 }
 0x37f   :  { %v532_v50 = vmul.f32 %v6973_v48, %v6971_v42 }
 0x381   :  { %533 = vst [vmem:[#allocation8] sm:$0x1] %v532_v50  ;;  %685 = vmatmul.mubr.f32.vlgmr.msra.gmra.mrb[4].mxu0 %v532_v50  ;;  %756 = vmatmul.mubr.f32.vlgmr.msra.gmra.mrb[4].mxu1 %v532_v50 }
 0x382   :  { %5780 = vmatpush1.bf16.msra.mxu0 %v7537_v34  ;;  %5812 = vmatpush1.bf16.msra.mxu1 %v7540_v37  ;;  %v598_v34 = vld [vmem:[%s8914_s4] sm:$0xf] }
 0x383   :  { %5782 = vmatprep.subr.bf16.mxu0 %v7545_v41  ;;  %5814 = vmatprep.subr.bf16.mxu1 %v7547_v45  ;;  %v603_v37 = vrot.slane %v598_v34, %v7631_v15  ;;  %v607_v41 = vrot.slane %v598_v34, %v7636_v17 }
 0x384   :  { %948 = vmatprep.mubr.f32.mxu0 %v7453_v0  ;;  %1019 = vmatprep.mubr.f32.mxu1 %v7453_v0 }
 0x386   :  { %5784 = vmatpush1.bf16.msra.mxu0 %v7549_v46  ;;  %5816 = vmatpush1.bf16.msra.mxu1 %v7552_v49 }
 0x387   :  { %5786 = vmatprep.subr.bf16.mxu0 %v7557_v53  ;;  %5818 = vmatprep.subr.bf16.mxu1 %v7559_v57 }
 0x38a   :  { %5788 = vmatpush1.bf16.msra.mxu0 %v7561_v58  ;;  %5820 = vmatpush1.bf16.msra.mxu1 %v7564_v61 }
 0x38b   :  { %5790 = vmatprep.subr.bf16.mxu0 %v7569_v2  ;;  %5822 = vmatprep.subr.bf16.mxu1 %v7571_v6  ;;  %v611_v6 = vrot.slane %v598_v34, %v7640_v23 }
 0x38e   :  { %5792 = vmatpush1.bf16.msra.mxu0 %v7573_v7  ;;  %5824 = vmatpush1.bf16.msra.mxu1 %v7576_v10  ;;  %v615_v7 = vrot.slane %v598_v34, %v7643_v40 }
 0x38f   :  { %5794 = vmatprep.subr.bf16.mxu0 %v7581_v14  ;;  %5826 = vmatprep.subr.bf16.mxu1 %v7583_v18 }
 0x392   :  { %5796 = vmatpush1.bf16.msra.mxu0 %v7585_v19  ;;  %5828 = vmatpush1.bf16.msra.mxu1 %v7588_v22 }
 0x393   :  { %5798 = vmatprep.subr.bf16.mxu0 %v7593_v26  ;;  %5830 = vmatprep.subr.bf16.mxu1 %v7595_v31 }
 0x396   :  { %5800 = vmatpush1.bf16.msra.mxu0 %v7597_v32  ;;  %5832 = vmatpush1.bf16.msra.mxu1 %v7600_v39 }
 0x397   :  { %5802 = vmatprep.subr.bf16.mxu0 %v7604_v44  ;;  %5834 = vmatprep.subr.bf16.mxu1 %v7606_v47 }
 0x39a   :  { %5804 = vmatpush1.bf16.msra.mxu0 %v7609_v52  ;;  %5836 = vmatpush1.bf16.msra.mxu1 %v7613_v59 }
 0x39b   :  { %5806 = vmatprep.subr.bf16.mxu0 %v7615_v60  ;;  %5838 = vmatprep.subr.bf16.mxu1 %v7617_v3 }
 0x39e   :  { %5808 = vmatpush1.bf16.msra.mxu0 %v7620_v9  ;;  %5840 = vmatpush1.bf16.msra.mxu1 %v7624_v11 }
 0x454   :  { %v686_v45 = vpop.f32.mrb[4].mxu0  ;;  %v757_v46 = vpop.f32.mrb[4].mxu1 }
 0x455   :  { %v687_v49 = vadd.f32 %v686_v45, %v603_v37  ;;  %v688_v53 = vpop.f32.mrb[5].mxu0  ;;  %v759_v57 = vpop.f32.mrb[5].mxu1  ;;  %v758_v10 = vadd.f32 %v757_v46, %v611_v6 }
 0x456   :  { %v689_v58 = vadd.f32 %v688_v53, %v607_v41  ;;  %v760_v14 = vadd.f32 %v759_v57, %v615_v7 }
 0x457   :  { %v5576_v61 = vmul.f32 -1.442695, %v687_v49  ;;  %v5578_v18 = vmul.f32 -1.442695, %v758_v10  ;;  %v1063_v10 = vld [vmem:[#allocation7 + $0x8] sm:$0xff] }
 0x458   :  { %v5577_v2 = vmul.f32 -1.442695, %v689_v58 }
 0x459   :  { %6974 = vpow2.f32 %v5576_v61 }
 0x45a   :  { %6976 = vpow2.f32 %v5577_v2 }
 0x45b   :  { %6978 = vtanh.f32 %v760_v14  ;;  %v1067_v14 = vld [vmem:[#allocation7 + $0x28] sm:$0xff] }
 0x45c   :  { %6980 = vpow2.f32 %v5578_v18  ;;  %v1065_v18 = vld [vmem:[#allocation7 + $0x18] sm:$0xff] }
 0x463   :  { %v6975_v19 = vpop.eup %6974 }
 0x464   :  { %v771_v22 = vadd.f32 1.0, %v6975_v19  ;;  %v6977_v26 = vpop.eup %6976  ;;  %v7754_v19 = vpack.c.bf16 %v1067_v14, %v1063_v10  ;;  %v1100_v10 = vld [vmem:[#allocation7 + $0x130] sm:$0xff] }
 0x465   :  { %v772_v31 = vadd.f32 1.0, %v6977_v26  ;;  %v6979_v32 = vpop.eup %6978  ;;  %v1062_v26 = vld [vmem:[#allocation7] sm:$0xff] }
 0x466   :  { %6982 = vrcp.f32 %v771_v22  ;;  %v6981_v39 = vpop.eup %6980  ;;  %v1069_v22 = vld [vmem:[#allocation7 + $0x38] sm:$0xff]  ;;  %5842 = vmatprep.subr.bf16.mxu0 %v7754_v19 }
 0x467   :  { %6984 = vrcp.f32 %v772_v31  ;;  %v773_v59 = vadd.f32 1.0, %v6981_v39  ;;  %v1066_v31 = vld [vmem:[#allocation7 + $0x20] sm:$0xff] }
 0x468   :  { %v7758_v39 = vpack.c.bf16 %v1066_v31, %v1062_v26 }
 0x469   :  { %6986 = vrcp.f32 %v773_v59 }
 0x470   :  { %v6983_v44 = vpop.eup %6982 }
 0x471   :  { %v782_v47 = vmul.f32 %v6983_v44, %v6979_v32  ;;  %v6985_v52 = vpop.eup %6984  ;;  %v7756_v32 = vpack.c.bf16 %v1069_v22, %v1065_v18  ;;  %v1064_v44 = vld [vmem:[#allocation7 + $0x10] sm:$0xff] }
 0x472   :  { %v781_v60 = vmul.f32 %v6985_v52, %v7691_v24  ;;  %v1071_v52 = vld [vmem:[#allocation7 + $0x48] sm:$0xff] }
 0x473   :  { %v6987_v9 = vpop.eup %6986  ;;  %5874 = vmatprep.subr.bf16.mxu1 %v7756_v32 }
 0x474   :  { %v783_v3 = vadd.f32 %v782_v47, %v781_v60  ;;  %v1068_v47 = vld [vmem:[#allocation7 + $0x30] sm:$0xff]  ;;  %v1075_v60 = vld [vmem:[#allocation7 + $0x68] sm:$0xff] }
 0x475   :  { %v7761_v59 = vpack.c.bf16 %v1068_v47, %v1064_v44 }
 0x476   :  { %6988 = vtanh.f32 %v783_v3 }
 0x480   :  { %v6989_v11 = vpop.eup %6988 }
 0x481   :  { %v785_v29 = vmul.f32 %v6989_v11, %v6987_v9  ;;  %v1077_v9 = vld [vmem:[#allocation7 + $0x78] sm:$0xff]  ;;  %v7765_v11 = vpack.c.bf16 %v1075_v60, %v1071_v52  ;;  %v1103_v52 = vld [vmem:[#allocation7 + $0x148] sm:$0xff] }
 0x482   :  { %v1107_v60 = vld [vmem:[#allocation7 + $0x168] sm:$0xff] }
 0x483   :  { %v786_v33 = vsel %vm521_vm1, %v785_v29, -inf }
 0x484   :  { %787 = vmax.xlane.f32.xlu1 %v786_v33  ;;  %v1070_v33 = vld [vmem:[#allocation7 + $0x40] sm:$0xff] }
 0x511   :  { %v788_v51 = vpop.xlane.xlu1 %787 }
 0x512   :  { %v789_v54 = vsub.f32 %v785_v29, %v788_v51  ;;  %v1074_v51 = vld [vmem:[#allocation7 + $0x60] sm:$0xff] }
 0x514   :  { %v790_v55 = vmul.f32 1.442695, %v789_v54  ;;  %v1072_v54 = vld [vmem:[#allocation7 + $0x50] sm:$0xff] }
 0x516   :  { %6990 = vpow2.f32 %v790_v55  ;;  %v7770_v55 = vpack.c.bf16 %v1074_v51, %v1070_v33  ;;  %v1109_v33 = vld [vmem:[#allocation7 + $0x178] sm:$0xff]  ;;  %v1102_v51 = vld [vmem:[#allocation7 + $0x140] sm:$0xff] }
 0x520   :  { %v6991_v56 = vpop.eup %6990 }
 0x521   :  { %v792_v62 = vsel %vm521_vm1, %v6991_v56, 0.0 }
 0x522   :  { %793 = vadd.xlane.f32.xlu1 %v792_v62  ;;  %v1079_v62 = vld [vmem:[#allocation7 + $0x88] sm:$0xff] }
 0x5af   :  { %v794_v63 = vpop.xlane.xlu1 %793 }
 0x5b0   :  { %6992 = vrcp.f32 %v794_v63  ;;  %v1083_v63 = vld [vmem:[#allocation7 + $0xa8] sm:$0xff] }
 0x5ba   :  { %v6993_v1 = vpop.eup %6992 }
 0x5bb   :  { %v796_v4 = vmul.f32 %v6993_v1, %v6991_v56  ;;  %v1076_v56 = vld [vmem:[#allocation7 + $0x70] sm:$0xff] }
 0x5bc   :  { %v7774_v1 = vpack.c.bf16 %v1076_v56, %v1072_v54  ;;  %v1106_v54 = vld [vmem:[#allocation7 + $0x160] sm:$0xff] }
 0x5bd   :  { %797 = vst [vmem:[#allocation8 + $0x1] sm:$0x1] %v796_v4  ;;  %949 = vmatmul.mubr.f32.vlgmr.msra.gmra.mrb[6].mxu0 %v796_v4  ;;  %1020 = vmatmul.mubr.f32.vlgmr.msra.gmra.mrb[6].mxu1 %v796_v4  ;;  %v7776_v4 = vpack.c.bf16 %v1083_v63, %v1079_v62  ;;  %v7820_v62 = vpack.c.bf16 %v1106_v54, %v1102_v51  ;;  %v1104_v63 = vld [vmem:[#allocation7 + $0x150] sm:$0xff] }
 0x5be   :  { %1212 = vmatprep.mubr.f32.mxu0 %v7453_v0  ;;  %1283 = vmatprep.mubr.f32.mxu1 %v7453_v0 }
 0x5bf   :  { %5844 = vmatpush1.bf16.msra.mxu0 %v7758_v39  ;;  %5876 = vmatpush1.bf16.msra.mxu1 %v7761_v59 }
 0x5c0   :  { %5846 = vmatprep.subr.bf16.mxu0 %v7765_v11 }
 0x5c3   :  { %5848 = vmatpush1.bf16.msra.mxu0 %v7770_v55 }
 0x5c4   :  { %5850 = vmatprep.subr.bf16.mxu0 %v7776_v4 }
 0x690   :  { %v950_v13 = vpop.f32.mrb[6].mxu0  ;;  %v1021_v16 = vpop.f32.mrb[6].mxu1 }
 0x691   :  { %v951_v21 = vadd.f32 %v950_v13, %v867_v8  ;;  %v952_v24 = vpop.f32.mrb[7].mxu0  ;;  %v1023_v25 = vpop.f32.mrb[7].mxu1  ;;  %v1022_v38 = vadd.f32 %v1021_v16, %v875_v35  ;;  %v1085_v8 = vld [vmem:[#allocation7 + $0xb8] sm:$0xff]  ;;  %v1082_v16 = vld [vmem:[#allocation7 + $0xa0] sm:$0xff] }
 0x692   :  { %v953_v27 = vadd.f32 %v952_v24, %v871_v12  ;;  %v1024_v42 = vadd.f32 %v1023_v25, %v879_v36  ;;  %v1078_v12 = vld [vmem:[#allocation7 + $0x80] sm:$0xff]  ;;  %v7778_v13 = vpack.c.bf16 %v1085_v8, %v1081_v5  ;;  %v1084_v24 = vld [vmem:[#allocation7 + $0xb0] sm:$0xff]  ;;  %v1111_v5 = vld [vmem:[#allocation7 + $0x188] sm:$0xff] }
 0x693   :  { %v5579_v28 = vmul.f32 -1.442695, %v951_v21  ;;  %v5581_v43 = vmul.f32 -1.442695, %v1022_v38  ;;  %v1080_v21 = vld [vmem:[#allocation7 + $0x90] sm:$0xff]  ;;  %v7781_v25 = vpack.c.bf16 %v1082_v16, %v1078_v12  ;;  %v1093_v38 = vld [vmem:[#allocation7 + $0xf8] sm:$0xff] }
 0x694   :  { %v5580_v30 = vmul.f32 -1.442695, %v953_v27  ;;  %v1087_v27 = vld [vmem:[#allocation7 + $0xc8] sm:$0xff]  ;;  %v7785_v35 = vpack.c.bf16 %v1084_v24, %v1080_v21  ;;  %v1113_v16 = vld [vmem:[#allocation7 + $0x198] sm:$0xff] }
 0x695   :  { %6994 = vpow2.f32 %v5579_v28  ;;  %v1091_v28 = vld [vmem:[#allocation7 + $0xe8] sm:$0xff]  ;;  %5852 = vmatpush1.bf16.msra.mxu0 %v7781_v25  ;;  %v1117_v21 = vld [vmem:[#allocation7 + $0x1b8] sm:$0xff] }
 0x696   :  { %6996 = vpow2.f32 %v5580_v30  ;;  %v1089_v30 = vld [vmem:[#allocation7 + $0xd8] sm:$0xff]  ;;  %v7787_v36 = vpack.c.bf16 %v1091_v28, %v1087_v27  ;;  %v1115_v12 = vld [vmem:[#allocation7 + $0x1a8] sm:$0xff]  ;;  %v7829_v27 = vpack.c.bf16 %v1117_v21, %v1113_v16  ;;  %v1110_v28 = vld [vmem:[#allocation7 + $0x180] sm:$0xff] }
 0x697   :  { %6998 = vtanh.f32 %v1024_v42  ;;  %v1086_v42 = vld [vmem:[#allocation7 + $0xc0] sm:$0xff]  ;;  %v7827_v24 = vpack.c.bf16 %v1115_v12, %v1111_v5 }
 0x698   :  { %7000 = vpow2.f32 %v5581_v43  ;;  %v1090_v43 = vld [vmem:[#allocation7 + $0xe0] sm:$0xff]  ;;  %5854 = vmatprep.subr.bf16.mxu0 %v7787_v36 }
 0x69f   :  { %v6995_v20 = vpop.eup %6994 }
 0x6a0   :  { %v1035_v48 = vadd.f32 1.0, %v6995_v20  ;;  %v6997_v50 = vpop.eup %6996  ;;  %v7790_v20 = vpack.c.bf16 %v1093_v38, %v1089_v30  ;;  %v1114_v30 = vld [vmem:[#allocation7 + $0x1a0] sm:$0xff]  ;;  %v1112_v38 = vld [vmem:[#allocation7 + $0x190] sm:$0xff] }
 0x6a1   :  { %v1036_v34 = vadd.f32 1.0, %v6997_v50  ;;  %v6999_v37 = vpop.eup %6998  ;;  %v1092_v50 = vld [vmem:[#allocation7 + $0xf0] sm:$0xff] }
 0x6a2   :  { %7002 = vrcp.f32 %v1035_v48  ;;  %v7001_v41 = vpop.eup %7000  ;;  %v1088_v48 = vld [vmem:[#allocation7 + $0xd0] sm:$0xff] }
 0x6a3   :  { %7004 = vrcp.f32 %v1036_v34  ;;  %v1037_v53 = vadd.f32 1.0, %v7001_v41  ;;  %v1095_v34 = vld [vmem:[#allocation7 + $0x108] sm:$0xff]  ;;  %v1097_v41 = vld [vmem:[#allocation7 + $0x118] sm:$0xff] }
 0x6a5   :  { %7006 = vrcp.f32 %v1037_v53 }
 0x6ac   :  { %v7003_v45 = vpop.eup %7002 }
 0x6ad   :  { %v1046_v46 = vmul.f32 %v7003_v45, %v6999_v37  ;;  %v7005_v49 = vpop.eup %7004  ;;  %v1099_v37 = vld [vmem:[#allocation7 + $0x128] sm:$0xff]  ;;  %v1101_v45 = vld [vmem:[#allocation7 + $0x138] sm:$0xff] }
 0x6ae   :  { %v1045_v57 = vmul.f32 %v7005_v49, %v783_v3  ;;  %v1073_v3 = vld [vmem:[#allocation7 + $0x58] sm:$0xff]  ;;  %v7797_v49 = vpack.c.bf16 %v1092_v50, %v1088_v48  ;;  %v7799_v53 = vpack.c.bf16 %v1099_v37, %v1095_v34  ;;  %v1119_v48 = vld [vmem:[#allocation7 + $0x1c8] sm:$0xff] }
 0x6af   :  { %v7007_v61 = vpop.eup %7006  ;;  %v7767_v29 = vpack.c.bf16 %v1077_v9, %v1073_v3  ;;  %v1105_v3 = vld [vmem:[#allocation7 + $0x158] sm:$0xff]  ;;  %v7816_v9 = vpack.c.bf16 %v1107_v60, %v1103_v52  ;;  %v1123_v50 = vld [vmem:[#allocation7 + $0x1e8] sm:$0xff] }
 0x6b0   :  { %v7747_v58 = vadd.f32 %v1046_v46, %v1045_v57  ;;  %v7793_v46 = vpack.c.bf16 %v1090_v43, %v1086_v42  ;;  %v1094_v57 = vld [vmem:[#allocation7 + $0x100] sm:$0xff]  ;;  %v7818_v56 = vpack.c.bf16 %v1109_v33, %v1105_v3  ;;  %v7832_v42 = vpack.c.bf16 %v1114_v30, %v1110_v28  ;;  %v1116_v43 = vld [vmem:[#allocation7 + $0x1b0] sm:$0xff] }
 0x6b1   :  { %5878 = vmatprep.subr.bf16.mxu1 %v7767_v29  ;;  %v7836_v34 = vpack.c.bf16 %v1116_v43, %v1112_v38  ;;  %v7838_v37 = vpack.c.bf16 %v1123_v50, %v1119_v48 }
 0x6b2   :  { %7008 = vtanh.f32 %v7747_v58  ;;  %5880 = vmatpush1.bf16.msra.mxu1 %v7774_v1  ;;  %5856 = vmatpush1.bf16.msra.mxu0 %v7793_v46 }
 0x6b3   :  { %5882 = vmatprep.subr.bf16.mxu1 %v7778_v13  ;;  %5858 = vmatprep.subr.bf16.mxu0 %v7799_v53 }
 0x6b6   :  { %5884 = vmatpush1.bf16.msra.mxu1 %v7785_v35 }
 0x6b7   :  { %5886 = vmatprep.subr.bf16.mxu1 %v7790_v20 }
 0x6ba   :  { %5888 = vmatpush1.bf16.msra.mxu1 %v7797_v49 }
 0x6bc   :  { %v7009_v2 = vpop.eup %7008 }
 0x6bd   :  { %v7750_v6 = vmul.f32 %v7009_v2, %v7007_v61  ;;  %v1098_v61 = vld [vmem:[#allocation7 + $0x120] sm:$0xff]  ;;  %v7802_v2 = vpack.c.bf16 %v1101_v45, %v1097_v41  ;;  %v1121_v41 = vld [vmem:[#allocation7 + $0x1d8] sm:$0xff] }
 0x6be   :  { %v7805_v14 = vpack.c.bf16 %v1098_v61, %v1094_v57  ;;  %v1125_v45 = vld [vmem:[#allocation7 + $0x1f8] sm:$0xff]  ;;  %v1118_v57 = vld [vmem:[#allocation7 + $0x1c0] sm:$0xff] }
 0x6bf   :  { %v1050_v7 = vsel %vm521_vm1, %v7750_v6, -inf  ;;  %5890 = vmatprep.subr.bf16.mxu1 %v7802_v2  ;;  %v7840_v61 = vpack.c.bf16 %v1125_v45, %v1121_v41 }
 0x6c0   :  { %1051 = vmax.xlane.f32.xlu0 %v1050_v7  ;;  %v1096_v7 = vld [vmem:[#allocation7 + $0x110] sm:$0xff]  ;;  %5860 = vmatpush1.bf16.msra.mxu0 %v7805_v14 }
 0x6c1   :  { %v7809_v18 = vpack.c.bf16 %v1100_v10, %v1096_v7  ;;  %5862 = vmatprep.subr.bf16.mxu0 %v7816_v9  ;;  %v1122_v7 = vld [vmem:[#allocation7 + $0x1e0] sm:$0xff]  ;;  %v1120_v10 = vld [vmem:[#allocation7 + $0x1d0] sm:$0xff] }
 0x6c3   :  { %5892 = vmatpush1.bf16.msra.mxu1 %v7809_v18 }
 0x6c4   :  { %5894 = vmatprep.subr.bf16.mxu1 %v7818_v56  ;;  %5864 = vmatpush1.bf16.msra.mxu0 %v7820_v62 }
 0x6c5   :  { %5866 = vmatprep.subr.bf16.mxu0 %v7827_v24 }
 0x6c8   :  { %5868 = vmatpush1.bf16.msra.mxu0 %v7832_v42 }
 0x6c9   :  { %5870 = vmatprep.subr.bf16.mxu0 %v7838_v37 }
 0x74d   :  { %v1052_v22 = vpop.xlane.xlu0 %1051 }
 0x74e   :  { %v1053_v26 = vsub.f32 %v7750_v6, %v1052_v22  ;;  %v1108_v6 = vld [vmem:[#allocation7 + $0x170] sm:$0xff] }
 0x74f   :  { %v7823_v8 = vpack.c.bf16 %v1108_v6, %v1104_v63  ;;  %v1124_v22 = vld [vmem:[#allocation7 + $0x1f0] sm:$0xff] }
 0x750   :  { %v1054_v31 = vmul.f32 1.442695, %v1053_v26  ;;  %v7843_v26 = vpack.c.bf16 %v1122_v7, %v1118_v57 }
 0x751   :  { %5896 = vmatpush1.bf16.msra.mxu1 %v7823_v8 }
 0x752   :  { %7010 = vpow2.f32 %v1054_v31  ;;  %5898 = vmatprep.subr.bf16.mxu1 %v7829_v27  ;;  %v7847_v31 = vpack.c.bf16 %v1124_v22, %v1120_v10  ;;  %5872 = vmatpush1.bf16.msra.mxu0 %v7843_v26 }
 0x753   :  { %5906 = vmatprep.subr.bf16.mxu0 %v7754_v19 }
 0x755   :  { %5900 = vmatpush1.bf16.msra.mxu1 %v7836_v34 }
 0x756   :  { %5902 = vmatprep.subr.bf16.mxu1 %v7840_v61 }
 0x759   :  { %5904 = vmatpush1.bf16.msra.mxu1 %v7847_v31 }
 0x75a   :  { %5938 = vmatprep.subr.bf16.mxu1 %v7756_v32 }
 0x75c   :  { %v7011_v44 = vpop.eup %7010 }
 0x75d   :  { %v1056_v47 = vsel %vm521_vm1, %v7011_v44, 0.0 }
 0x75e   :  { %1057 = vadd.xlane.f32.xlu1 %v1056_v47 }
 0x7eb   :  { %v1058_v47 = vpop.xlane.xlu1 %1057 }
 0x7ec   :  { %7012 = vrcp.f32 %v1058_v47 }
 0x7f6   :  { %v7013_v52 = vpop.eup %7012 }
 0x7f7   :  { %v1060_v60 = vmul.f32 %v7013_v52, %v7011_v44  ;;  %v1126_v44 = vld [vmem:[%s8914_s4] sm:$0xf] }
 0x7f8   :  { %v1131_v3 = vrot.slane %v1126_v44, %v7631_v15  ;;  %v1135_v33 = vrot.slane %v1126_v44, %v7636_v17 }
 0x7f9   :  { %1061 = vst [vmem:[#allocation8 + $0x2] sm:$0x1] %v1060_v60  ;;  %1213 = vmatmul.mubr.f32.vlgmr.msra.gmra.mrb[8].mxu0 %v1060_v60  ;;  %1284 = vmatmul.mubr.f32.vlgmr.msra.gmra.mrb[8].mxu1 %v1060_v60 }
 0x7fa   :  { %5908 = vmatpush1.bf16.msra.mxu0 %v7758_v39  ;;  %5940 = vmatpush1.bf16.msra.mxu1 %v7761_v59 }
 0x7fb   :  { %5910 = vmatprep.subr.bf16.mxu0 %v7765_v11  ;;  %5942 = vmatprep.subr.bf16.mxu1 %v7767_v29 }
 0x7fc   :  { %1476 = vmatprep.mubr.f32.mxu0 %v7453_v0  ;;  %1547 = vmatprep.mubr.f32.mxu1 %v7453_v0 }
 0x7fe   :  { %5912 = vmatpush1.bf16.msra.mxu0 %v7770_v55  ;;  %5944 = vmatpush1.bf16.msra.mxu1 %v7774_v1 }
 0x7ff   :  { %5914 = vmatprep.subr.bf16.mxu0 %v7776_v4  ;;  %5946 = vmatprep.subr.bf16.mxu1 %v7778_v13 }
 0x802   :  { %5916 = vmatpush1.bf16.msra.mxu0 %v7781_v25  ;;  %5948 = vmatpush1.bf16.msra.mxu1 %v7785_v35 }
 0x803   :  { %5918 = vmatprep.subr.bf16.mxu0 %v7787_v36  ;;  %5950 = vmatprep.subr.bf16.mxu1 %v7790_v20 }
 0x806   :  { %5920 = vmatpush1.bf16.msra.mxu0 %v7793_v46  ;;  %5952 = vmatpush1.bf16.msra.mxu1 %v7797_v49 }
 0x807   :  { %5922 = vmatprep.subr.bf16.mxu0 %v7799_v53  ;;  %5954 = vmatprep.subr.bf16.mxu1 %v7802_v2 }
 0x80a   :  { %5924 = vmatpush1.bf16.msra.mxu0 %v7805_v14  ;;  %5956 = vmatpush1.bf16.msra.mxu1 %v7809_v18 }
 0x80b   :  { %5926 = vmatprep.subr.bf16.mxu0 %v7816_v9  ;;  %5958 = vmatprep.subr.bf16.mxu1 %v7818_v56 }
 0x80e   :  { %5928 = vmatpush1.bf16.msra.mxu0 %v7820_v62  ;;  %5960 = vmatpush1.bf16.msra.mxu1 %v7823_v8 }
 0x80f   :  { %5930 = vmatprep.subr.bf16.mxu0 %v7827_v24  ;;  %5962 = vmatprep.subr.bf16.mxu1 %v7829_v27 }
 0x812   :  { %5932 = vmatpush1.bf16.msra.mxu0 %v7832_v42  ;;  %5964 = vmatpush1.bf16.msra.mxu1 %v7836_v34 }
 0x813   :  { %5934 = vmatprep.subr.bf16.mxu0 %v7838_v37  ;;  %5966 = vmatprep.subr.bf16.mxu1 %v7840_v61 }
 0x816   :  { %5936 = vmatpush1.bf16.msra.mxu0 %v7843_v26  ;;  %5968 = vmatpush1.bf16.msra.mxu1 %v7847_v31 }
 0x817   :  { %5970 = vmatprep.subr.bf16.mxu0 %v7754_v19  ;;  %6002 = vmatprep.subr.bf16.mxu1 %v7756_v32  ;;  %v1139_v19 = vrot.slane %v1126_v44, %v7640_v23  ;;  %v1143_v32 = vrot.slane %v1126_v44, %v7643_v40 }
 0x8cc   :  { %v1214_v51 = vpop.f32.mrb[8].mxu0  ;;  %v1285_v54 = vpop.f32.mrb[8].mxu1 }
 0x8cd   :  { %v1215_v63 = vadd.f32 %v1214_v51, %v1131_v3  ;;  %v1216_v6 = vpop.f32.mrb[9].mxu0  ;;  %v1287_v5 = vpop.f32.mrb[9].mxu1  ;;  %v1286_v28 = vadd.f32 %v1285_v54, %v1139_v19 }
 0x8ce   :  { %v1217_v12 = vadd.f32 %v1216_v6, %v1135_v33  ;;  %v1288_v30 = vadd.f32 %v1287_v5, %v1143_v32 }
 0x8cf   :  { %v5582_v16 = vmul.f32 -1.442695, %v1215_v63  ;;  %v5584_v38 = vmul.f32 -1.442695, %v1286_v28 }
 0x8d0   :  { %v5583_v21 = vmul.f32 -1.442695, %v1217_v12 }
 0x8d1   :  { %7014 = vpow2.f32 %v5582_v16 }
 0x8d2   :  { %7016 = vpow2.f32 %v5583_v21 }
 0x8d3   :  { %7018 = vtanh.f32 %v1288_v30 }
 0x8d4   :  { %7020 = vpow2.f32 %v5584_v38 }
 0x8db   :  { %v7015_v43 = vpop.eup %7014 }
 0x8dc   :  { %v1299_v48 = vadd.f32 1.0, %v7015_v43  ;;  %v7017_v50 = vpop.eup %7016 }
 0x8dd   :  { %v1300_v41 = vadd.f32 1.0, %v7017_v50  ;;  %v7019_v45 = vpop.eup %7018 }
 0x8de   :  { %7022 = vrcp.f32 %v1299_v48  ;;  %v7021_v57 = vpop.eup %7020 }
 0x8df   :  { %7024 = vrcp.f32 %v1300_v41  ;;  %v1301_v47 = vadd.f32 1.0, %v7021_v57  ;;  %v1654_v57 = vld [vmem:[%s8914_s4] sm:$0xf] }
 0x8e1   :  { %7026 = vrcp.f32 %v1301_v47 }
 0x8e8   :  { %v7023_v7 = vpop.eup %7022 }
 0x8e9   :  { %v1310_v10 = vmul.f32 %v7023_v7, %v7019_v45  ;;  %v7025_v22 = vpop.eup %7024  ;;  %v1659_v7 = vrot.slane %v1654_v57, %v7631_v15 }
 0x8ea   :  { %v1309_v52 = vmul.f32 %v7025_v22, %v7747_v58 }
 0x8eb   :  { %v7027_v44 = vpop.eup %7026 }
 0x8ec   :  { %v7896_v60 = vadd.f32 %v1310_v10, %v1309_v52  ;;  %v1663_v10 = vrot.slane %v1654_v57, %v7636_v17 }
 0x8ee   :  { %7028 = vtanh.f32 %v7896_v60 }
 0x8f8   :  { %v7029_v3 = vpop.eup %7028 }
 0x8f9   :  { %v1313_v33 = vmul.f32 %v7029_v3, %v7027_v44 }
 0x8fb   :  { %v1314_v51 = vsel %vm521_vm1, %v1313_v33, -inf }
 0x8fc   :  { %1315 = vmax.xlane.f32.xlu0 %v1314_v51 }
 0x989   :  { %v1316_v54 = vpop.xlane.xlu0 %1315 }
 0x98a   :  { %v1317_v63 = vsub.f32 %v1313_v33, %v1316_v54  ;;  %v1667_v54 = vrot.slane %v1654_v57, %v7640_v23 }
 0x98c   :  { %v1318_v6 = vmul.f32 1.442695, %v1317_v63  ;;  %v1671_v63 = vrot.slane %v1654_v57, %v7643_v40  ;;  %v1873_v57 = vld [vmem:[#allocation7 + $0x98] sm:$0xff] }
 0x98e   :  { %7030 = vpow2.f32 %v1318_v6 }
 0x998   :  { %v7031_v5 = vpop.eup %7030 }
 0x999   :  { %v1320_v12 = vsel %vm521_vm1, %v7031_v5, 0.0 }
 0x99a   :  { %1321 = vadd.xlane.f32.xlu1 %v1320_v12 }
 0xa27   :  { %v1322_v58 = vpop.xlane.xlu1 %1321 }
 0xa28   :  { %7032 = vrcp.f32 %v1322_v58 }
 0xa32   :  { %v7033_v16 = vpop.eup %7032 }
 0xa33   :  { %v1324_v21 = vmul.f32 %v7033_v16, %v7031_v5 }
 0xa35   :  { %1325 = vst [vmem:[#allocation8 + $0x3] sm:$0x1] %v1324_v21  ;;  %1477 = vmatmul.mubr.f32.vlgmr.msra.gmra.mrb[10].mxu0 %v1324_v21  ;;  %1548 = vmatmul.mubr.f32.vlgmr.msra.gmra.mrb[10].mxu1 %v1324_v21 }
 0xa36   :  { %5972 = vmatpush1.bf16.msra.mxu0 %v7758_v39  ;;  %6004 = vmatpush1.bf16.msra.mxu1 %v7761_v59  ;;  %v1390_v39 = vld [vmem:[%s8914_s4] sm:$0xf] }
 0xa37   :  { %5974 = vmatprep.subr.bf16.mxu0 %v7765_v11  ;;  %6006 = vmatprep.subr.bf16.mxu1 %v7767_v29  ;;  %v1395_v59 = vrot.slane %v1390_v39, %v7631_v15  ;;  %v1399_v11 = vrot.slane %v1390_v39, %v7636_v17 }
 0xa38   :  { %1740 = vmatprep.mubr.f32.mxu0 %v7453_v0  ;;  %1811 = vmatprep.mubr.f32.mxu1 %v7453_v0 }
 0xa3a   :  { %5976 = vmatpush1.bf16.msra.mxu0 %v7770_v55  ;;  %6008 = vmatpush1.bf16.msra.mxu1 %v7774_v1 }
 0xa3b   :  { %5978 = vmatprep.subr.bf16.mxu0 %v7776_v4  ;;  %6010 = vmatprep.subr.bf16.mxu1 %v7778_v13 }
 0xa3e   :  { %5980 = vmatpush1.bf16.msra.mxu0 %v7781_v25  ;;  %6012 = vmatpush1.bf16.msra.mxu1 %v7785_v35 }
 0xa3f   :  { %5982 = vmatprep.subr.bf16.mxu0 %v7787_v36  ;;  %6014 = vmatprep.subr.bf16.mxu1 %v7790_v20  ;;  %v1403_v20 = vrot.slane %v1390_v39, %v7640_v23 }
 0xa42   :  { %5984 = vmatpush1.bf16.msra.mxu0 %v7793_v46  ;;  %6016 = vmatpush1.bf16.msra.mxu1 %v7797_v49  ;;  %v1407_v46 = vrot.slane %v1390_v39, %v7643_v40 }
 0xa43   :  { %5986 = vmatprep.subr.bf16.mxu0 %v7799_v53  ;;  %6018 = vmatprep.subr.bf16.mxu1 %v7802_v2 }
 0xa46   :  { %5988 = vmatpush1.bf16.msra.mxu0 %v7805_v14  ;;  %6020 = vmatpush1.bf16.msra.mxu1 %v7809_v18 }
 0xa47   :  { %5990 = vmatprep.subr.bf16.mxu0 %v7816_v9  ;;  %6022 = vmatprep.subr.bf16.mxu1 %v7818_v56 }
 0xa4a   :  { %5992 = vmatpush1.bf16.msra.mxu0 %v7820_v62  ;;  %6024 = vmatpush1.bf16.msra.mxu1 %v7823_v8 }
 0xa4b   :  { %5994 = vmatprep.subr.bf16.mxu0 %v7827_v24  ;;  %6026 = vmatprep.subr.bf16.mxu1 %v7829_v27 }
 0xa4e   :  { %5996 = vmatpush1.bf16.msra.mxu0 %v7832_v42  ;;  %6028 = vmatpush1.bf16.msra.mxu1 %v7836_v34 }
 0xa4f   :  { %5998 = vmatprep.subr.bf16.mxu0 %v7838_v37  ;;  %6030 = vmatprep.subr.bf16.mxu1 %v7840_v61 }
 0xa52   :  { %6000 = vmatpush1.bf16.msra.mxu0 %v7843_v26  ;;  %6032 = vmatpush1.bf16.msra.mxu1 %v7847_v31 }
 0xb08   :  { %v1478_v29 = vpop.f32.mrb[10].mxu0  ;;  %v1549_v55 = vpop.f32.mrb[10].mxu1 }
 0xb09   :  { %v1479_v1 = vadd.f32 %v1478_v29, %v1395_v59  ;;  %v1480_v4 = vpop.f32.mrb[11].mxu0  ;;  %v1551_v13 = vpop.f32.mrb[11].mxu1  ;;  %v1550_v49 = vadd.f32 %v1549_v55, %v1403_v20 }
 0xb0a   :  { %v1481_v25 = vadd.f32 %v1480_v4, %v1399_v11  ;;  %v1552_v53 = vadd.f32 %v1551_v13, %v1407_v46 }
 0xb0b   :  { %v5585_v35 = vmul.f32 -1.442695, %v1479_v1  ;;  %v5587_v2 = vmul.f32 -1.442695, %v1550_v49  ;;  %v1855_v49 = vld [vmem:[#allocation7 + $0x8] sm:$0xff] }
 0xb0c   :  { %v5586_v36 = vmul.f32 -1.442695, %v1481_v25 }
 0xb0d   :  { %7034 = vpow2.f32 %v5585_v35 }
 0xb0e   :  { %7036 = vpow2.f32 %v5586_v36 }
 0xb0f   :  { %7038 = vtanh.f32 %v1552_v53  ;;  %v1859_v53 = vld [vmem:[#allocation7 + $0x28] sm:$0xff] }
 0xb10   :  { %7040 = vpow2.f32 %v5587_v2  ;;  %v1857_v2 = vld [vmem:[#allocation7 + $0x18] sm:$0xff] }
 0xb17   :  { %v7035_v14 = vpop.eup %7034 }
 0xb18   :  { %v1563_v18 = vadd.f32 1.0, %v7035_v14  ;;  %v7037_v9 = vpop.eup %7036  ;;  %v7959_v14 = vpack.c.bf16 %v1859_v53, %v1855_v49  ;;  %v1892_v49 = vld [vmem:[#allocation7 + $0x130] sm:$0xff] }
 0xb19   :  { %v1564_v56 = vadd.f32 1.0, %v7037_v9  ;;  %v7039_v62 = vpop.eup %7038  ;;  %v1854_v9 = vld [vmem:[#allocation7] sm:$0xff] }
 0xb1a   :  { %7042 = vrcp.f32 %v1563_v18  ;;  %v7041_v8 = vpop.eup %7040  ;;  %v1861_v18 = vld [vmem:[#allocation7 + $0x38] sm:$0xff]  ;;  %6034 = vmatprep.subr.bf16.mxu0 %v7959_v14 }
 0xb1b   :  { %7044 = vrcp.f32 %v1564_v56  ;;  %v1565_v34 = vadd.f32 1.0, %v7041_v8  ;;  %v1858_v56 = vld [vmem:[#allocation7 + $0x20] sm:$0xff] }
 0xb1c   :  { %v7963_v8 = vpack.c.bf16 %v1858_v56, %v1854_v9 }
 0xb1d   :  { %7046 = vrcp.f32 %v1565_v34 }
 0xb24   :  { %v7043_v24 = vpop.eup %7042 }
 0xb25   :  { %v1574_v27 = vmul.f32 %v7043_v24, %v7039_v62  ;;  %v7045_v42 = vpop.eup %7044  ;;  %v7961_v62 = vpack.c.bf16 %v1861_v18, %v1857_v2  ;;  %v1856_v24 = vld [vmem:[#allocation7 + $0x10] sm:$0xff] }
 0xb26   :  { %v1573_v37 = vmul.f32 %v7045_v42, %v7896_v60  ;;  %v1863_v42 = vld [vmem:[#allocation7 + $0x48] sm:$0xff] }
 0xb27   :  { %v7047_v26 = vpop.eup %7046  ;;  %6066 = vmatprep.subr.bf16.mxu1 %v7961_v62 }
 0xb28   :  { %v1575_v61 = vadd.f32 %v1574_v27, %v1573_v37  ;;  %v1860_v27 = vld [vmem:[#allocation7 + $0x30] sm:$0xff]  ;;  %v1867_v37 = vld [vmem:[#allocation7 + $0x68] sm:$0xff] }
 0xb29   :  { %v7966_v34 = vpack.c.bf16 %v1860_v27, %v1856_v24 }
 0xb2a   :  { %7048 = vtanh.f32 %v1575_v61 }
 0xb34   :  { %v7049_v31 = vpop.eup %7048 }
 0xb35   :  { %v1577_v19 = vmul.f32 %v7049_v31, %v7047_v26  ;;  %v1869_v26 = vld [vmem:[#allocation7 + $0x78] sm:$0xff]  ;;  %v7970_v31 = vpack.c.bf16 %v1867_v37, %v1863_v42  ;;  %v1895_v42 = vld [vmem:[#allocation7 + $0x148] sm:$0xff] }
 0xb36   :  { %v1899_v37 = vld [vmem:[#allocation7 + $0x168] sm:$0xff] }
 0xb37   :  { %v1578_v32 = vsel %vm521_vm1, %v1577_v19, -inf }
 0xb38   :  { %1579 = vmax.xlane.f32.xlu0 %v1578_v32  ;;  %v1862_v32 = vld [vmem:[#allocation7 + $0x40] sm:$0xff] }
 0xbc5   :  { %v1580_v28 = vpop.xlane.xlu0 %1579 }
 0xbc6   :  { %v1581_v30 = vsub.f32 %v1577_v19, %v1580_v28  ;;  %v1866_v28 = vld [vmem:[#allocation7 + $0x60] sm:$0xff] }
 0xbc8   :  { %v1582_v38 = vmul.f32 1.442695, %v1581_v30  ;;  %v1864_v30 = vld [vmem:[#allocation7 + $0x50] sm:$0xff] }
 0xbca   :  { %7050 = vpow2.f32 %v1582_v38  ;;  %v7975_v38 = vpack.c.bf16 %v1866_v28, %v1862_v32  ;;  %v1901_v32 = vld [vmem:[#allocation7 + $0x178] sm:$0xff]  ;;  %v1894_v28 = vld [vmem:[#allocation7 + $0x140] sm:$0xff] }
 0xbd4   :  { %v7051_v43 = vpop.eup %7050 }
 0xbd5   :  { %v1584_v48 = vsel %vm521_vm1, %v7051_v43, 0.0 }
 0xbd6   :  { %1585 = vadd.xlane.f32.xlu1 %v1584_v48  ;;  %v1871_v48 = vld [vmem:[#allocation7 + $0x88] sm:$0xff] }
 0xc63   :  { %v1586_v50 = vpop.xlane.xlu1 %1585 }
 0xc64   :  { %7052 = vrcp.f32 %v1586_v50  ;;  %v1875_v50 = vld [vmem:[#allocation7 + $0xa8] sm:$0xff] }
 0xc6e   :  { %v7053_v41 = vpop.eup %7052 }
 0xc6f   :  { %v1588_v45 = vmul.f32 %v7053_v41, %v7051_v43  ;;  %v1868_v43 = vld [vmem:[#allocation7 + $0x70] sm:$0xff] }
 0xc70   :  { %v7979_v41 = vpack.c.bf16 %v1868_v43, %v1864_v30  ;;  %v1898_v30 = vld [vmem:[#allocation7 + $0x160] sm:$0xff] }
 0xc71   :  { %1589 = vst [vmem:[#allocation8 + $0x4] sm:$0x1] %v1588_v45  ;;  %1741 = vmatmul.mubr.f32.vlgmr.msra.gmra.mrb[12].mxu0 %v1588_v45  ;;  %1812 = vmatmul.mubr.f32.vlgmr.msra.gmra.mrb[12].mxu1 %v1588_v45  ;;  %v7981_v45 = vpack.c.bf16 %v1875_v50, %v1871_v48  ;;  %v8025_v48 = vpack.c.bf16 %v1898_v30, %v1894_v28  ;;  %v1896_v50 = vld [vmem:[#allocation7 + $0x150] sm:$0xff] }
 0xc72   :  { %2004 = vmatprep.mubr.f32.mxu0 %v7453_v0  ;;  %2075 = vmatprep.mubr.f32.mxu1 %v7453_v0 }
 0xc73   :  { %6036 = vmatpush1.bf16.msra.mxu0 %v7963_v8  ;;  %6068 = vmatpush1.bf16.msra.mxu1 %v7966_v34 }
 0xc74   :  { %6038 = vmatprep.subr.bf16.mxu0 %v7970_v31 }
 0xc77   :  { %6040 = vmatpush1.bf16.msra.mxu0 %v7975_v38 }
 0xc78   :  { %6042 = vmatprep.subr.bf16.mxu0 %v7981_v45 }
 0xd44   :  { %v1742_v22 = vpop.f32.mrb[12].mxu0  ;;  %v1813_v47 = vpop.f32.mrb[12].mxu1 }
 0xd45   :  { %v1743_v52 = vadd.f32 %v1742_v22, %v1659_v7  ;;  %v1744_v60 = vpop.f32.mrb[13].mxu0  ;;  %v1815_v44 = vpop.f32.mrb[13].mxu1  ;;  %v1814_v6 = vadd.f32 %v1813_v47, %v1667_v54  ;;  %v1877_v7 = vld [vmem:[#allocation7 + $0xb8] sm:$0xff]  ;;  %v1874_v47 = vld [vmem:[#allocation7 + $0xa0] sm:$0xff] }
 0xd46   :  { %v1745_v3 = vadd.f32 %v1744_v60, %v1663_v10  ;;  %v1816_v5 = vadd.f32 %v1815_v44, %v1671_v63  ;;  %v1870_v10 = vld [vmem:[#allocation7 + $0x80] sm:$0xff]  ;;  %v7983_v22 = vpack.c.bf16 %v1877_v7, %v1873_v57  ;;  %v1876_v60 = vld [vmem:[#allocation7 + $0xb0] sm:$0xff]  ;;  %v1903_v57 = vld [vmem:[#allocation7 + $0x188] sm:$0xff] }
 0xd47   :  { %v5588_v33 = vmul.f32 -1.442695, %v1743_v52  ;;  %v5590_v12 = vmul.f32 -1.442695, %v1814_v6  ;;  %v1872_v52 = vld [vmem:[#allocation7 + $0x90] sm:$0xff]  ;;  %v7986_v44 = vpack.c.bf16 %v1874_v47, %v1870_v10  ;;  %v1885_v6 = vld [vmem:[#allocation7 + $0xf8] sm:$0xff] }
 0xd48   :  { %v5589_v51 = vmul.f32 -1.442695, %v1745_v3  ;;  %v1879_v3 = vld [vmem:[#allocation7 + $0xc8] sm:$0xff]  ;;  %v7990_v54 = vpack.c.bf16 %v1876_v60, %v1872_v52  ;;  %v1905_v47 = vld [vmem:[#allocation7 + $0x198] sm:$0xff] }
 0xd49   :  { %7054 = vpow2.f32 %v5588_v33  ;;  %v1883_v33 = vld [vmem:[#allocation7 + $0xe8] sm:$0xff]  ;;  %6044 = vmatpush1.bf16.msra.mxu0 %v7986_v44  ;;  %v1909_v52 = vld [vmem:[#allocation7 + $0x1b8] sm:$0xff] }
 0xd4a   :  { %7056 = vpow2.f32 %v5589_v51  ;;  %v1881_v51 = vld [vmem:[#allocation7 + $0xd8] sm:$0xff]  ;;  %v7992_v63 = vpack.c.bf16 %v1883_v33, %v1879_v3  ;;  %v1907_v10 = vld [vmem:[#allocation7 + $0x1a8] sm:$0xff]  ;;  %v8034_v3 = vpack.c.bf16 %v1909_v52, %v1905_v47  ;;  %v1902_v33 = vld [vmem:[#allocation7 + $0x180] sm:$0xff] }
 0xd4b   :  { %7058 = vtanh.f32 %v1816_v5  ;;  %v1878_v5 = vld [vmem:[#allocation7 + $0xc0] sm:$0xff]  ;;  %v8032_v60 = vpack.c.bf16 %v1907_v10, %v1903_v57 }
 0xd4c   :  { %7060 = vpow2.f32 %v5590_v12  ;;  %v1882_v12 = vld [vmem:[#allocation7 + $0xe0] sm:$0xff]  ;;  %6046 = vmatprep.subr.bf16.mxu0 %v7992_v63 }
 0xd53   :  { %v7055_v58 = vpop.eup %7054 }
 0xd54   :  { %v1827_v16 = vadd.f32 1.0, %v7055_v58  ;;  %v7057_v21 = vpop.eup %7056  ;;  %v7995_v58 = vpack.c.bf16 %v1885_v6, %v1881_v51  ;;  %v1906_v51 = vld [vmem:[#allocation7 + $0x1a0] sm:$0xff]  ;;  %v1904_v6 = vld [vmem:[#allocation7 + $0x190] sm:$0xff] }
 0xd55   :  { %v1828_v39 = vadd.f32 1.0, %v7057_v21  ;;  %v7059_v59 = vpop.eup %7058  ;;  %v1884_v21 = vld [vmem:[#allocation7 + $0xf0] sm:$0xff] }
 0xd56   :  { %7062 = vrcp.f32 %v1827_v16  ;;  %v7061_v11 = vpop.eup %7060  ;;  %v1880_v16 = vld [vmem:[#allocation7 + $0xd0] sm:$0xff] }
 0xd57   :  { %7064 = vrcp.f32 %v1828_v39  ;;  %v1829_v4 = vadd.f32 1.0, %v7061_v11  ;;  %v1887_v39 = vld [vmem:[#allocation7 + $0x108] sm:$0xff]  ;;  %v1889_v11 = vld [vmem:[#allocation7 + $0x118] sm:$0xff] }
 0xd59   :  { %7066 = vrcp.f32 %v1829_v4 }
 0xd60   :  { %v7063_v29 = vpop.eup %7062 }
 0xd61   :  { %v1838_v55 = vmul.f32 %v7063_v29, %v7059_v59  ;;  %v7065_v1 = vpop.eup %7064  ;;  %v1891_v59 = vld [vmem:[#allocation7 + $0x128] sm:$0xff]  ;;  %v1893_v29 = vld [vmem:[#allocation7 + $0x138] sm:$0xff] }
 0xd62   :  { %v1837_v13 = vmul.f32 %v7065_v1, %v1575_v61  ;;  %v1865_v61 = vld [vmem:[#allocation7 + $0x58] sm:$0xff]  ;;  %v8002_v1 = vpack.c.bf16 %v1884_v21, %v1880_v16  ;;  %v8004_v4 = vpack.c.bf16 %v1891_v59, %v1887_v39  ;;  %v1911_v16 = vld [vmem:[#allocation7 + $0x1c8] sm:$0xff] }
 0xd63   :  { %v7067_v35 = vpop.eup %7066  ;;  %v7972_v19 = vpack.c.bf16 %v1869_v26, %v1865_v61  ;;  %v1897_v61 = vld [vmem:[#allocation7 + $0x158] sm:$0xff]  ;;  %v8021_v26 = vpack.c.bf16 %v1899_v37, %v1895_v42  ;;  %v1915_v21 = vld [vmem:[#allocation7 + $0x1e8] sm:$0xff] }
 0xd64   :  { %v7952_v25 = vadd.f32 %v1838_v55, %v1837_v13  ;;  %v7998_v55 = vpack.c.bf16 %v1882_v12, %v1878_v5  ;;  %v1886_v13 = vld [vmem:[#allocation7 + $0x100] sm:$0xff]  ;;  %v8023_v43 = vpack.c.bf16 %v1901_v32, %v1897_v61  ;;  %v8037_v5 = vpack.c.bf16 %v1906_v51, %v1902_v33  ;;  %v1908_v12 = vld [vmem:[#allocation7 + $0x1b0] sm:$0xff] }
 0xd65   :  { %6070 = vmatprep.subr.bf16.mxu1 %v7972_v19  ;;  %v8041_v39 = vpack.c.bf16 %v1908_v12, %v1904_v6  ;;  %v8043_v59 = vpack.c.bf16 %v1915_v21, %v1911_v16 }
 0xd66   :  { %7068 = vtanh.f32 %v7952_v25  ;;  %6072 = vmatpush1.bf16.msra.mxu1 %v7979_v41  ;;  %6048 = vmatpush1.bf16.msra.mxu0 %v7998_v55 }
 0xd67   :  { %6074 = vmatprep.subr.bf16.mxu1 %v7983_v22  ;;  %6050 = vmatprep.subr.bf16.mxu0 %v8004_v4 }
 0xd6a   :  { %6076 = vmatpush1.bf16.msra.mxu1 %v7990_v54 }
 0xd6b   :  { %6078 = vmatprep.subr.bf16.mxu1 %v7995_v58 }
 0xd6e   :  { %6080 = vmatpush1.bf16.msra.mxu1 %v8002_v1 }
 0xd70   :  { %v7069_v36 = vpop.eup %7068 }
 0xd71   :  { %v7955_v20 = vmul.f32 %v7069_v36, %v7067_v35  ;;  %v1890_v35 = vld [vmem:[#allocation7 + $0x120] sm:$0xff]  ;;  %v8007_v36 = vpack.c.bf16 %v1893_v29, %v1889_v11  ;;  %v1913_v11 = vld [vmem:[#allocation7 + $0x1d8] sm:$0xff] }
 0xd72   :  { %v8010_v53 = vpack.c.bf16 %v1890_v35, %v1886_v13  ;;  %v1917_v29 = vld [vmem:[#allocation7 + $0x1f8] sm:$0xff]  ;;  %v1910_v13 = vld [vmem:[#allocation7 + $0x1c0] sm:$0xff] }
 0xd73   :  { %v1842_v46 = vsel %vm521_vm1, %v7955_v20, -inf  ;;  %6082 = vmatprep.subr.bf16.mxu1 %v8007_v36  ;;  %v8045_v35 = vpack.c.bf16 %v1917_v29, %v1913_v11 }
 0xd74   :  { %1843 = vmax.xlane.f32.xlu0 %v1842_v46  ;;  %v1888_v46 = vld [vmem:[#allocation7 + $0x110] sm:$0xff]  ;;  %6052 = vmatpush1.bf16.msra.mxu0 %v8010_v53 }
 0xd75   :  { %v8014_v2 = vpack.c.bf16 %v1892_v49, %v1888_v46  ;;  %6054 = vmatprep.subr.bf16.mxu0 %v8021_v26  ;;  %v1914_v46 = vld [vmem:[#allocation7 + $0x1e0] sm:$0xff]  ;;  %v1912_v49 = vld [vmem:[#allocation7 + $0x1d0] sm:$0xff] }
 0xd77   :  { %6084 = vmatpush1.bf16.msra.mxu1 %v8014_v2 }
 0xd78   :  { %6086 = vmatprep.subr.bf16.mxu1 %v8023_v43  ;;  %6056 = vmatpush1.bf16.msra.mxu0 %v8025_v48 }
 0xd79   :  { %6058 = vmatprep.subr.bf16.mxu0 %v8032_v60 }
 0xd7c   :  { %6060 = vmatpush1.bf16.msra.mxu0 %v8037_v5 }
 0xd7d   :  { %6062 = vmatprep.subr.bf16.mxu0 %v8043_v59 }
 0xe01   :  { %v1844_v18 = vpop.xlane.xlu0 %1843 }
 0xe02   :  { %v1845_v9 = vsub.f32 %v7955_v20, %v1844_v18  ;;  %v1900_v20 = vld [vmem:[#allocation7 + $0x170] sm:$0xff] }
 0xe03   :  { %v8028_v7 = vpack.c.bf16 %v1900_v20, %v1896_v50  ;;  %v1916_v18 = vld [vmem:[#allocation7 + $0x1f0] sm:$0xff] }
 0xe04   :  { %v1846_v56 = vmul.f32 1.442695, %v1845_v9  ;;  %v8048_v9 = vpack.c.bf16 %v1914_v46, %v1910_v13 }
 0xe05   :  { %6088 = vmatpush1.bf16.msra.mxu1 %v8028_v7 }
 0xe06   :  { %7070 = vpow2.f32 %v1846_v56  ;;  %6090 = vmatprep.subr.bf16.mxu1 %v8034_v3  ;;  %v8052_v56 = vpack.c.bf16 %v1916_v18, %v1912_v49  ;;  %6064 = vmatpush1.bf16.msra.mxu0 %v8048_v9 }
 0xe07   :  { %6098 = vmatprep.subr.bf16.mxu0 %v7959_v14 }
 0xe09   :  { %6092 = vmatpush1.bf16.msra.mxu1 %v8041_v39 }
 0xe0a   :  { %6094 = vmatprep.subr.bf16.mxu1 %v8045_v35 }
 0xe0d   :  { %6096 = vmatpush1.bf16.msra.mxu1 %v8052_v56 }
 0xe0e   :  { %6130 = vmatprep.subr.bf16.mxu1 %v7961_v62 }
 0xe10   :  { %v7071_v24 = vpop.eup %7070 }
 0xe11   :  { %v1848_v27 = vsel %vm521_vm1, %v7071_v24, 0.0 }
 0xe12   :  { %1849 = vadd.xlane.f32.xlu1 %v1848_v27 }
 0xe9f   :  { %v1850_v27 = vpop.xlane.xlu1 %1849 }
 0xea0   :  { %7072 = vrcp.f32 %v1850_v27 }
 0xeaa   :  { %v7073_v42 = vpop.eup %7072 }
 0xeab   :  { %v1852_v37 = vmul.f32 %v7073_v42, %v7071_v24  ;;  %v1918_v24 = vld [vmem:[%s8914_s4] sm:$0xf] }
 0xeac   :  { %v1923_v61 = vrot.slane %v1918_v24, %v7631_v15  ;;  %v1927_v32 = vrot.slane %v1918_v24, %v7636_v17 }
 0xead   :  { %1853 = vst [vmem:[#allocation8 + $0x5] sm:$0x1] %v1852_v37  ;;  %2005 = vmatmul.mubr.f32.vlgmr.msra.gmra.mrb[14].mxu0 %v1852_v37  ;;  %2076 = vmatmul.mubr.f32.vlgmr.msra.gmra.mrb[14].mxu1 %v1852_v37 }
 0xeae   :  { %6100 = vmatpush1.bf16.msra.mxu0 %v7963_v8  ;;  %6132 = vmatpush1.bf16.msra.mxu1 %v7966_v34 }
 0xeaf   :  { %6102 = vmatprep.subr.bf16.mxu0 %v7970_v31  ;;  %6134 = vmatprep.subr.bf16.mxu1 %v7972_v19 }
 0xeb0   :  { %2268 = vmatprep.mubr.f32.mxu0 %v7453_v0  ;;  %2339 = vmatprep.mubr.f32.mxu1 %v7453_v0 }
 0xeb2   :  { %6104 = vmatpush1.bf16.msra.mxu0 %v7975_v38  ;;  %6136 = vmatpush1.bf16.msra.mxu1 %v7979_v41 }
 0xeb3   :  { %6106 = vmatprep.subr.bf16.mxu0 %v7981_v45  ;;  %6138 = vmatprep.subr.bf16.mxu1 %v7983_v22 }
 0xeb6   :  { %6108 = vmatpush1.bf16.msra.mxu0 %v7986_v44  ;;  %6140 = vmatpush1.bf16.msra.mxu1 %v7990_v54 }
 0xeb7   :  { %6110 = vmatprep.subr.bf16.mxu0 %v7992_v63  ;;  %6142 = vmatprep.subr.bf16.mxu1 %v7995_v58 }
 0xeba   :  { %6112 = vmatpush1.bf16.msra.mxu0 %v7998_v55  ;;  %6144 = vmatpush1.bf16.msra.mxu1 %v8002_v1 }
 0xebb   :  { %6114 = vmatprep.subr.bf16.mxu0 %v8004_v4  ;;  %6146 = vmatprep.subr.bf16.mxu1 %v8007_v36 }
 0xebe   :  { %6116 = vmatpush1.bf16.msra.mxu0 %v8010_v53  ;;  %6148 = vmatpush1.bf16.msra.mxu1 %v8014_v2 }
 0xebf   :  { %6118 = vmatprep.subr.bf16.mxu0 %v8021_v26  ;;  %6150 = vmatprep.subr.bf16.mxu1 %v8023_v43 }
 0xec2   :  { %6120 = vmatpush1.bf16.msra.mxu0 %v8025_v48  ;;  %6152 = vmatpush1.bf16.msra.mxu1 %v8028_v7 }
 0xec3   :  { %6122 = vmatprep.subr.bf16.mxu0 %v8032_v60  ;;  %6154 = vmatprep.subr.bf16.mxu1 %v8034_v3 }
 0xec6   :  { %6124 = vmatpush1.bf16.msra.mxu0 %v8037_v5  ;;  %6156 = vmatpush1.bf16.msra.mxu1 %v8041_v39 }
 0xec7   :  { %6126 = vmatprep.subr.bf16.mxu0 %v8043_v59  ;;  %6158 = vmatprep.subr.bf16.mxu1 %v8045_v35 }
 0xeca   :  { %6128 = vmatpush1.bf16.msra.mxu0 %v8048_v9  ;;  %6160 = vmatpush1.bf16.msra.mxu1 %v8052_v56 }
 0xecb   :  { %6162 = vmatprep.subr.bf16.mxu0 %v7959_v14  ;;  %6194 = vmatprep.subr.bf16.mxu1 %v7961_v62  ;;  %v1931_v14 = vrot.slane %v1918_v24, %v7640_v23  ;;  %v1935_v62 = vrot.slane %v1918_v24, %v7643_v40 }
 0xf80   :  { %v2006_v28 = vpop.f32.mrb[14].mxu0  ;;  %v2077_v30 = vpop.f32.mrb[14].mxu1 }
 0xf81   :  { %v2007_v50 = vadd.f32 %v2006_v28, %v1923_v61  ;;  %v2008_v20 = vpop.f32.mrb[15].mxu0  ;;  %v2079_v57 = vpop.f32.mrb[15].mxu1  ;;  %v2078_v33 = vadd.f32 %v2077_v30, %v1931_v14 }
 0xf82   :  { %v2009_v10 = vadd.f32 %v2008_v20, %v1927_v32  ;;  %v2080_v51 = vadd.f32 %v2079_v57, %v1935_v62 }
 0xf83   :  { %v5591_v47 = vmul.f32 -1.442695, %v2007_v50  ;;  %v5593_v6 = vmul.f32 -1.442695, %v2078_v33 }
 0xf84   :  { %v5592_v52 = vmul.f32 -1.442695, %v2009_v10 }
 0xf85   :  { %7074 = vpow2.f32 %v5591_v47 }
 0xf86   :  { %7076 = vpow2.f32 %v5592_v52 }
 0xf87   :  { %7078 = vtanh.f32 %v2080_v51 }
 0xf88   :  { %7080 = vpow2.f32 %v5593_v6 }
 0xf8f   :  { %v7075_v12 = vpop.eup %7074 }
 0xf90   :  { %v2091_v16 = vadd.f32 1.0, %v7075_v12  ;;  %v7077_v21 = vpop.eup %7076 }
 0xf91   :  { %v2092_v11 = vadd.f32 1.0, %v7077_v21  ;;  %v7079_v29 = vpop.eup %7078 }
 0xf92   :  { %7082 = vrcp.f32 %v2091_v16  ;;  %v7081_v13 = vpop.eup %7080 }
 0xf93   :  { %7084 = vrcp.f32 %v2092_v11  ;;  %v2093_v27 = vadd.f32 1.0, %v7081_v13  ;;  %v2446_v13 = vld [vmem:[%s8914_s4] sm:$0xf] }
 0xf95   :  { %7086 = vrcp.f32 %v2093_v27 }
 0xf9c   :  { %v7083_v46 = vpop.eup %7082 }
 0xf9d   :  { %v2102_v49 = vmul.f32 %v7083_v46, %v7079_v29  ;;  %v7085_v18 = vpop.eup %7084  ;;  %v2451_v46 = vrot.slane %v2446_v13, %v7631_v15 }
 0xf9e   :  { %v2101_v42 = vmul.f32 %v7085_v18, %v7952_v25 }
 0xf9f   :  { %v7087_v24 = vpop.eup %7086 }
 0xfa0   :  { %v8101_v37 = vadd.f32 %v2102_v49, %v2101_v42  ;;  %v2455_v49 = vrot.slane %v2446_v13, %v7636_v17 }
 0xfa2   :  { %7088 = vtanh.f32 %v8101_v37 }
 0xfac   :  { %v7089_v61 = vpop.eup %7088 }
 0xfad   :  { %v2105_v32 = vmul.f32 %v7089_v61, %v7087_v24 }
 0xfaf   :  { %v2106_v28 = vsel %vm521_vm1, %v2105_v32, -inf }
 0xfb0   :  { %2107 = vmax.xlane.f32.xlu0 %v2106_v28 }
0x103d   :  { %v2108_v30 = vpop.xlane.xlu0 %2107 }
0x103e   :  { %v2109_v50 = vsub.f32 %v2105_v32, %v2108_v30  ;;  %v2459_v30 = vrot.slane %v2446_v13, %v7640_v23 }
0x1040   :  { %v2110_v20 = vmul.f32 1.442695, %v2109_v50  ;;  %v2463_v50 = vrot.slane %v2446_v13, %v7643_v40  ;;  %v2665_v13 = vld [vmem:[#allocation7 + $0x98] sm:$0xff] }
0x1042   :  { %7090 = vpow2.f32 %v2110_v20 }
0x104c   :  { %v7091_v57 = vpop.eup %7090 }
0x104d   :  { %v2112_v10 = vsel %vm521_vm1, %v7091_v57, 0.0 }
0x104e   :  { %2113 = vadd.xlane.f32.xlu1 %v2112_v10 }
0x10db   :  { %v2114_v25 = vpop.xlane.xlu1 %2113 }
0x10dc   :  { %7092 = vrcp.f32 %v2114_v25 }
0x10e6   :  { %v7093_v47 = vpop.eup %7092 }
0x10e7   :  { %v2116_v52 = vmul.f32 %v7093_v47, %v7091_v57 }
0x10e9   :  { %2117 = vst [vmem:[#allocation8 + $0x6] sm:$0x1] %v2116_v52  ;;  %2269 = vmatmul.mubr.f32.vlgmr.msra.gmra.mrb[16].mxu0 %v2116_v52  ;;  %2340 = vmatmul.mubr.f32.vlgmr.msra.gmra.mrb[16].mxu1 %v2116_v52 }
0x10ea   :  { %6164 = vmatpush1.bf16.msra.mxu0 %v7963_v8  ;;  %6196 = vmatpush1.bf16.msra.mxu1 %v7966_v34  ;;  %v2182_v8 = vld [vmem:[%s8914_s4] sm:$0xf] }
0x10eb   :  { %6166 = vmatprep.subr.bf16.mxu0 %v7970_v31  ;;  %6198 = vmatprep.subr.bf16.mxu1 %v7972_v19  ;;  %v2187_v34 = vrot.slane %v2182_v8, %v7631_v15  ;;  %v2191_v31 = vrot.slane %v2182_v8, %v7636_v17 }
0x10ec   :  { %2532 = vmatprep.mubr.f32.mxu0 %v7453_v0  ;;  %2603 = vmatprep.mubr.f32.mxu1 %v7453_v0 }
0x10ee   :  { %6168 = vmatpush1.bf16.msra.mxu0 %v7975_v38  ;;  %6200 = vmatpush1.bf16.msra.mxu1 %v7979_v41 }
0x10ef   :  { %6170 = vmatprep.subr.bf16.mxu0 %v7981_v45  ;;  %6202 = vmatprep.subr.bf16.mxu1 %v7983_v22 }
0x10f2   :  { %6172 = vmatpush1.bf16.msra.mxu0 %v7986_v44  ;;  %6204 = vmatpush1.bf16.msra.mxu1 %v7990_v54 }
0x10f3   :  { %6174 = vmatprep.subr.bf16.mxu0 %v7992_v63  ;;  %6206 = vmatprep.subr.bf16.mxu1 %v7995_v58  ;;  %v2195_v58 = vrot.slane %v2182_v8, %v7640_v23 }
0x10f6   :  { %6176 = vmatpush1.bf16.msra.mxu0 %v7998_v55  ;;  %6208 = vmatpush1.bf16.msra.mxu1 %v8002_v1  ;;  %v2199_v55 = vrot.slane %v2182_v8, %v7643_v40 }
0x10f7   :  { %6178 = vmatprep.subr.bf16.mxu0 %v8004_v4  ;;  %6210 = vmatprep.subr.bf16.mxu1 %v8007_v36 }
0x10fa   :  { %6180 = vmatpush1.bf16.msra.mxu0 %v8010_v53  ;;  %6212 = vmatpush1.bf16.msra.mxu1 %v8014_v2 }
0x10fb   :  { %6182 = vmatprep.subr.bf16.mxu0 %v8021_v26  ;;  %6214 = vmatprep.subr.bf16.mxu1 %v8023_v43 }
0x10fe   :  { %6184 = vmatpush1.bf16.msra.mxu0 %v8025_v48  ;;  %6216 = vmatpush1.bf16.msra.mxu1 %v8028_v7 }
0x10ff   :  { %6186 = vmatprep.subr.bf16.mxu0 %v8032_v60  ;;  %6218 = vmatprep.subr.bf16.mxu1 %v8034_v3 }
0x1102   :  { %6188 = vmatpush1.bf16.msra.mxu0 %v8037_v5  ;;  %6220 = vmatpush1.bf16.msra.mxu1 %v8041_v39 }
0x1103   :  { %6190 = vmatprep.subr.bf16.mxu0 %v8043_v59  ;;  %6222 = vmatprep.subr.bf16.mxu1 %v8045_v35 }
0x1106   :  { %6192 = vmatpush1.bf16.msra.mxu0 %v8048_v9  ;;  %6224 = vmatpush1.bf16.msra.mxu1 %v8052_v56 }
0x11bc   :  { %v2270_v19 = vpop.f32.mrb[16].mxu0  ;;  %v2341_v38 = vpop.f32.mrb[16].mxu1 }
0x11bd   :  { %v2271_v41 = vadd.f32 %v2270_v19, %v2187_v34  ;;  %v2272_v45 = vpop.f32.mrb[17].mxu0  ;;  %v2343_v22 = vpop.f32.mrb[17].mxu1  ;;  %v2342_v1 = vadd.f32 %v2341_v38, %v2195_v58 }
0x11be   :  { %v2273_v44 = vadd.f32 %v2272_v45, %v2191_v31  ;;  %v2344_v4 = vadd.f32 %v2343_v22, %v2199_v55 }
0x11bf   :  { %v5594_v54 = vmul.f32 -1.442695, %v2271_v41  ;;  %v5596_v36 = vmul.f32 -1.442695, %v2342_v1  ;;  %v2647_v1 = vld [vmem:[#allocation7 + $0x8] sm:$0xff] }
0x11c0   :  { %v5595_v63 = vmul.f32 -1.442695, %v2273_v44 }
0x11c1   :  { %7094 = vpow2.f32 %v5594_v54 }
0x11c2   :  { %7096 = vpow2.f32 %v5595_v63 }
0x11c3   :  { %7098 = vtanh.f32 %v2344_v4  ;;  %v2651_v4 = vld [vmem:[#allocation7 + $0x28] sm:$0xff] }
0x11c4   :  { %7100 = vpow2.f32 %v5596_v36  ;;  %v2649_v36 = vld [vmem:[#allocation7 + $0x18] sm:$0xff] }
0x11cb   :  { %v7095_v53 = vpop.eup %7094 }
0x11cc   :  { %v2355_v2 = vadd.f32 1.0, %v7095_v53  ;;  %v7097_v26 = vpop.eup %7096  ;;  %v8164_v53 = vpack.c.bf16 %v2651_v4, %v2647_v1  ;;  %v2684_v1 = vld [vmem:[#allocation7 + $0x130] sm:$0xff] }
0x11cd   :  { %v2356_v43 = vadd.f32 1.0, %v7097_v26  ;;  %v7099_v48 = vpop.eup %7098  ;;  %v2646_v26 = vld [vmem:[#allocation7] sm:$0xff] }
0x11ce   :  { %7102 = vrcp.f32 %v2355_v2  ;;  %v7101_v7 = vpop.eup %7100  ;;  %v2653_v2 = vld [vmem:[#allocation7 + $0x38] sm:$0xff]  ;;  %6226 = vmatprep.subr.bf16.mxu0 %v8164_v53 }
0x11cf   :  { %7104 = vrcp.f32 %v2356_v43  ;;  %v2357_v39 = vadd.f32 1.0, %v7101_v7  ;;  %v2650_v43 = vld [vmem:[#allocation7 + $0x20] sm:$0xff] }
0x11d0   :  { %v8168_v7 = vpack.c.bf16 %v2650_v43, %v2646_v26 }
0x11d1   :  { %7106 = vrcp.f32 %v2357_v39 }
0x11d8   :  { %v7103_v60 = vpop.eup %7102 }
0x11d9   :  { %v2366_v3 = vmul.f32 %v7103_v60, %v7099_v48  ;;  %v7105_v5 = vpop.eup %7104  ;;  %v8166_v48 = vpack.c.bf16 %v2653_v2, %v2649_v36  ;;  %v2648_v60 = vld [vmem:[#allocation7 + $0x10] sm:$0xff] }
0x11da   :  { %v2365_v59 = vmul.f32 %v7105_v5, %v8101_v37  ;;  %v2655_v5 = vld [vmem:[#allocation7 + $0x48] sm:$0xff] }
0x11db   :  { %v7107_v9 = vpop.eup %7106  ;;  %6258 = vmatprep.subr.bf16.mxu1 %v8166_v48 }
0x11dc   :  { %v2367_v35 = vadd.f32 %v2366_v3, %v2365_v59  ;;  %v2652_v3 = vld [vmem:[#allocation7 + $0x30] sm:$0xff]  ;;  %v2659_v59 = vld [vmem:[#allocation7 + $0x68] sm:$0xff] }
0x11dd   :  { %v8171_v39 = vpack.c.bf16 %v2652_v3, %v2648_v60 }
0x11de   :  { %7108 = vtanh.f32 %v2367_v35 }
0x11e8   :  { %v7109_v56 = vpop.eup %7108 }
0x11e9   :  { %v2369_v14 = vmul.f32 %v7109_v56, %v7107_v9  ;;  %v2661_v9 = vld [vmem:[#allocation7 + $0x78] sm:$0xff]  ;;  %v8175_v56 = vpack.c.bf16 %v2659_v59, %v2655_v5  ;;  %v2687_v5 = vld [vmem:[#allocation7 + $0x148] sm:$0xff] }
0x11ea   :  { %v2691_v59 = vld [vmem:[#allocation7 + $0x168] sm:$0xff] }
0x11eb   :  { %v2370_v62 = vsel %vm521_vm1, %v2369_v14, -inf }
0x11ec   :  { %2371 = vmax.xlane.f32.xlu0 %v2370_v62  ;;  %v2654_v62 = vld [vmem:[#allocation7 + $0x40] sm:$0xff] }
0x1279   :  { %v2372_v33 = vpop.xlane.xlu0 %2371 }
0x127a   :  { %v2373_v51 = vsub.f32 %v2369_v14, %v2372_v33  ;;  %v2658_v33 = vld [vmem:[#allocation7 + $0x60] sm:$0xff] }
0x127c   :  { %v2374_v6 = vmul.f32 1.442695, %v2373_v51  ;;  %v2656_v51 = vld [vmem:[#allocation7 + $0x50] sm:$0xff] }
0x127e   :  { %7110 = vpow2.f32 %v2374_v6  ;;  %v8180_v6 = vpack.c.bf16 %v2658_v33, %v2654_v62  ;;  %v2693_v62 = vld [vmem:[#allocation7 + $0x178] sm:$0xff]  ;;  %v2686_v33 = vld [vmem:[#allocation7 + $0x140] sm:$0xff] }
0x1288   :  { %v7111_v12 = vpop.eup %7110 }
0x1289   :  { %v2376_v16 = vsel %vm521_vm1, %v7111_v12, 0.0 }
0x128a   :  { %2377 = vadd.xlane.f32.xlu1 %v2376_v16  ;;  %v2663_v16 = vld [vmem:[#allocation7 + $0x88] sm:$0xff] }
0x1317   :  { %v2378_v21 = vpop.xlane.xlu1 %2377 }
0x1318   :  { %7112 = vrcp.f32 %v2378_v21  ;;  %v2667_v21 = vld [vmem:[#allocation7 + $0xa8] sm:$0xff] }
0x1322   :  { %v7113_v11 = vpop.eup %7112 }
0x1323   :  { %v2380_v29 = vmul.f32 %v7113_v11, %v7111_v12  ;;  %v2660_v12 = vld [vmem:[#allocation7 + $0x70] sm:$0xff] }
0x1324   :  { %v8184_v11 = vpack.c.bf16 %v2660_v12, %v2656_v51  ;;  %v2690_v51 = vld [vmem:[#allocation7 + $0x160] sm:$0xff] }
0x1325   :  { %2381 = vst [vmem:[#allocation8 + $0x7] sm:$0x1] %v2380_v29  ;;  %2533 = vmatmul.mubr.f32.vlgmr.msra.gmra.mrb[18].mxu0 %v2380_v29  ;;  %2604 = vmatmul.mubr.f32.vlgmr.msra.gmra.mrb[18].mxu1 %v2380_v29  ;;  %v8186_v29 = vpack.c.bf16 %v2667_v21, %v2663_v16  ;;  %v8230_v16 = vpack.c.bf16 %v2690_v51, %v2686_v33  ;;  %v2688_v21 = vld [vmem:[#allocation7 + $0x150] sm:$0xff] }
0x1326   :  { %2796 = vmatprep.mubr.f32.mxu0 %v7453_v0  ;;  %2867 = vmatprep.mubr.f32.mxu1 %v7453_v0 }
0x1327   :  { %6228 = vmatpush1.bf16.msra.mxu0 %v8168_v7  ;;  %6260 = vmatpush1.bf16.msra.mxu1 %v8171_v39 }
0x1328   :  { %6230 = vmatprep.subr.bf16.mxu0 %v8175_v56 }
0x132b   :  { %6232 = vmatpush1.bf16.msra.mxu0 %v8180_v6 }
0x132c   :  { %6234 = vmatprep.subr.bf16.mxu0 %v8186_v29 }
0x13f8   :  { %v2534_v18 = vpop.f32.mrb[18].mxu0  ;;  %v2605_v27 = vpop.f32.mrb[18].mxu1 }
0x13f9   :  { %v2535_v42 = vadd.f32 %v2534_v18, %v2451_v46  ;;  %v2536_v37 = vpop.f32.mrb[19].mxu0  ;;  %v2607_v24 = vpop.f32.mrb[19].mxu1  ;;  %v2606_v20 = vadd.f32 %v2605_v27, %v2459_v30  ;;  %v2669_v46 = vld [vmem:[#allocation7 + $0xb8] sm:$0xff]  ;;  %v2666_v27 = vld [vmem:[#allocation7 + $0xa0] sm:$0xff] }
0x13fa   :  { %v2537_v61 = vadd.f32 %v2536_v37, %v2455_v49  ;;  %v2608_v57 = vadd.f32 %v2607_v24, %v2463_v50  ;;  %v2662_v49 = vld [vmem:[#allocation7 + $0x80] sm:$0xff]  ;;  %v8188_v18 = vpack.c.bf16 %v2669_v46, %v2665_v13  ;;  %v2668_v37 = vld [vmem:[#allocation7 + $0xb0] sm:$0xff]  ;;  %v2695_v13 = vld [vmem:[#allocation7 + $0x188] sm:$0xff] }
0x13fb   :  { %v5597_v32 = vmul.f32 -1.442695, %v2535_v42  ;;  %v5599_v10 = vmul.f32 -1.442695, %v2606_v20  ;;  %v2664_v42 = vld [vmem:[#allocation7 + $0x90] sm:$0xff]  ;;  %v8191_v24 = vpack.c.bf16 %v2666_v27, %v2662_v49  ;;  %v2677_v20 = vld [vmem:[#allocation7 + $0xf8] sm:$0xff] }
0x13fc   :  { %v5598_v28 = vmul.f32 -1.442695, %v2537_v61  ;;  %v2671_v61 = vld [vmem:[#allocation7 + $0xc8] sm:$0xff]  ;;  %v8195_v30 = vpack.c.bf16 %v2668_v37, %v2664_v42  ;;  %v2697_v27 = vld [vmem:[#allocation7 + $0x198] sm:$0xff] }
0x13fd   :  { %7114 = vpow2.f32 %v5597_v32  ;;  %v2675_v32 = vld [vmem:[#allocation7 + $0xe8] sm:$0xff]  ;;  %6236 = vmatpush1.bf16.msra.mxu0 %v8191_v24  ;;  %v2701_v42 = vld [vmem:[#allocation7 + $0x1b8] sm:$0xff] }
0x13fe   :  { %7116 = vpow2.f32 %v5598_v28  ;;  %v2673_v28 = vld [vmem:[#allocation7 + $0xd8] sm:$0xff]  ;;  %v8197_v50 = vpack.c.bf16 %v2675_v32, %v2671_v61  ;;  %v2699_v49 = vld [vmem:[#allocation7 + $0x1a8] sm:$0xff]  ;;  %v8239_v61 = vpack.c.bf16 %v2701_v42, %v2697_v27  ;;  %v2694_v32 = vld [vmem:[#allocation7 + $0x180] sm:$0xff] }
0x13ff   :  { %7118 = vtanh.f32 %v2608_v57  ;;  %v2670_v57 = vld [vmem:[#allocation7 + $0xc0] sm:$0xff]  ;;  %v8237_v37 = vpack.c.bf16 %v2699_v49, %v2695_v13 }
0x1400   :  { %7120 = vpow2.f32 %v5599_v10  ;;  %v2674_v10 = vld [vmem:[#allocation7 + $0xe0] sm:$0xff]  ;;  %6238 = vmatprep.subr.bf16.mxu0 %v8197_v50 }
0x1407   :  { %v7115_v25 = vpop.eup %7114 }
0x1408   :  { %v2619_v47 = vadd.f32 1.0, %v7115_v25  ;;  %v7117_v52 = vpop.eup %7116  ;;  %v8200_v25 = vpack.c.bf16 %v2677_v20, %v2673_v28  ;;  %v2698_v28 = vld [vmem:[#allocation7 + $0x1a0] sm:$0xff]  ;;  %v2696_v20 = vld [vmem:[#allocation7 + $0x190] sm:$0xff] }
0x1409   :  { %v2620_v8 = vadd.f32 1.0, %v7117_v52  ;;  %v7119_v34 = vpop.eup %7118  ;;  %v2676_v52 = vld [vmem:[#allocation7 + $0xf0] sm:$0xff] }
0x140a   :  { %7122 = vrcp.f32 %v2619_v47  ;;  %v7121_v31 = vpop.eup %7120  ;;  %v2672_v47 = vld [vmem:[#allocation7 + $0xd0] sm:$0xff] }
0x140b   :  { %7124 = vrcp.f32 %v2620_v8  ;;  %v2621_v45 = vadd.f32 1.0, %v7121_v31  ;;  %v2679_v8 = vld [vmem:[#allocation7 + $0x108] sm:$0xff]  ;;  %v2681_v31 = vld [vmem:[#allocation7 + $0x118] sm:$0xff] }
0x140d   :  { %7126 = vrcp.f32 %v2621_v45 }
0x1414   :  { %v7123_v19 = vpop.eup %7122 }
0x1415   :  { %v2630_v38 = vmul.f32 %v7123_v19, %v7119_v34  ;;  %v7125_v41 = vpop.eup %7124  ;;  %v2683_v34 = vld [vmem:[#allocation7 + $0x128] sm:$0xff]  ;;  %v2685_v19 = vld [vmem:[#allocation7 + $0x138] sm:$0xff] }
0x1416   :  { %v2629_v22 = vmul.f32 %v7125_v41, %v2367_v35  ;;  %v2657_v35 = vld [vmem:[#allocation7 + $0x58] sm:$0xff]  ;;  %v8207_v41 = vpack.c.bf16 %v2676_v52, %v2672_v47  ;;  %v8209_v45 = vpack.c.bf16 %v2683_v34, %v2679_v8  ;;  %v2703_v47 = vld [vmem:[#allocation7 + $0x1c8] sm:$0xff] }
0x1417   :  { %v7127_v54 = vpop.eup %7126  ;;  %v8177_v14 = vpack.c.bf16 %v2661_v9, %v2657_v35  ;;  %v2689_v35 = vld [vmem:[#allocation7 + $0x158] sm:$0xff]  ;;  %v8226_v9 = vpack.c.bf16 %v2691_v59, %v2687_v5  ;;  %v2707_v52 = vld [vmem:[#allocation7 + $0x1e8] sm:$0xff] }
0x1418   :  { %v8157_v44 = vadd.f32 %v2630_v38, %v2629_v22  ;;  %v8203_v38 = vpack.c.bf16 %v2674_v10, %v2670_v57  ;;  %v2678_v22 = vld [vmem:[#allocation7 + $0x100] sm:$0xff]  ;;  %v8228_v12 = vpack.c.bf16 %v2693_v62, %v2689_v35  ;;  %v8242_v57 = vpack.c.bf16 %v2698_v28, %v2694_v32  ;;  %v2700_v10 = vld [vmem:[#allocation7 + $0x1b0] sm:$0xff] }
0x1419   :  { %6262 = vmatprep.subr.bf16.mxu1 %v8177_v14  ;;  %v8246_v8 = vpack.c.bf16 %v2700_v10, %v2696_v20  ;;  %v8248_v34 = vpack.c.bf16 %v2707_v52, %v2703_v47 }
0x141a   :  { %7128 = vtanh.f32 %v8157_v44  ;;  %6264 = vmatpush1.bf16.msra.mxu1 %v8184_v11  ;;  %6240 = vmatpush1.bf16.msra.mxu0 %v8203_v38 }
0x141b   :  { %6266 = vmatprep.subr.bf16.mxu1 %v8188_v18  ;;  %6242 = vmatprep.subr.bf16.mxu0 %v8209_v45 }
0x141e   :  { %6268 = vmatpush1.bf16.msra.mxu1 %v8195_v30 }
0x141f   :  { %6270 = vmatprep.subr.bf16.mxu1 %v8200_v25 }
0x1422   :  { %6272 = vmatpush1.bf16.msra.mxu1 %v8207_v41 }
0x1424   :  { %v7129_v63 = vpop.eup %7128 }
0x1425   :  { %v8160_v58 = vmul.f32 %v7129_v63, %v7127_v54  ;;  %v2682_v54 = vld [vmem:[#allocation7 + $0x120] sm:$0xff]  ;;  %v8212_v63 = vpack.c.bf16 %v2685_v19, %v2681_v31  ;;  %v2705_v31 = vld [vmem:[#allocation7 + $0x1d8] sm:$0xff] }
0x1426   :  { %v8215_v4 = vpack.c.bf16 %v2682_v54, %v2678_v22  ;;  %v2709_v19 = vld [vmem:[#allocation7 + $0x1f8] sm:$0xff]  ;;  %v2702_v22 = vld [vmem:[#allocation7 + $0x1c0] sm:$0xff] }
0x1427   :  { %v2634_v55 = vsel %vm521_vm1, %v8160_v58, -inf  ;;  %6274 = vmatprep.subr.bf16.mxu1 %v8212_v63  ;;  %v8250_v54 = vpack.c.bf16 %v2709_v19, %v2705_v31 }
0x1428   :  { %2635 = vmax.xlane.f32.xlu0 %v2634_v55  ;;  %v2680_v55 = vld [vmem:[#allocation7 + $0x110] sm:$0xff]  ;;  %6244 = vmatpush1.bf16.msra.mxu0 %v8215_v4 }
0x1429   :  { %v8219_v36 = vpack.c.bf16 %v2684_v1, %v2680_v55  ;;  %6246 = vmatprep.subr.bf16.mxu0 %v8226_v9  ;;  %v2706_v55 = vld [vmem:[#allocation7 + $0x1e0] sm:$0xff]  ;;  %v2704_v1 = vld [vmem:[#allocation7 + $0x1d0] sm:$0xff] }
0x142b   :  { %6276 = vmatpush1.bf16.msra.mxu1 %v8219_v36 }
0x142c   :  { %6278 = vmatprep.subr.bf16.mxu1 %v8228_v12  ;;  %6248 = vmatpush1.bf16.msra.mxu0 %v8230_v16 }
0x142d   :  { %6250 = vmatprep.subr.bf16.mxu0 %v8237_v37 }
0x1430   :  { %6252 = vmatpush1.bf16.msra.mxu0 %v8242_v57 }
0x1431   :  { %6254 = vmatprep.subr.bf16.mxu0 %v8248_v34 }
0x14b5   :  { %v2636_v2 = vpop.xlane.xlu0 %2635 }
0x14b6   :  { %v2637_v26 = vsub.f32 %v8160_v58, %v2636_v2  ;;  %v2692_v58 = vld [vmem:[#allocation7 + $0x170] sm:$0xff] }
0x14b7   :  { %v8233_v46 = vpack.c.bf16 %v2692_v58, %v2688_v21  ;;  %v2708_v2 = vld [vmem:[#allocation7 + $0x1f0] sm:$0xff] }
0x14b8   :  { %v2638_v43 = vmul.f32 1.442695, %v2637_v26  ;;  %v8253_v26 = vpack.c.bf16 %v2706_v55, %v2702_v22 }
0x14b9   :  { %6280 = vmatpush1.bf16.msra.mxu1 %v8233_v46 }
0x14ba   :  { %7130 = vpow2.f32 %v2638_v43  ;;  %6282 = vmatprep.subr.bf16.mxu1 %v8239_v61  ;;  %v8257_v43 = vpack.c.bf16 %v2708_v2, %v2704_v1  ;;  %6256 = vmatpush1.bf16.msra.mxu0 %v8253_v26 }
0x14bb   :  { %6290 = vmatprep.subr.bf16.mxu0 %v8164_v53 }
0x14bd   :  { %6284 = vmatpush1.bf16.msra.mxu1 %v8246_v8 }
0x14be   :  { %6286 = vmatprep.subr.bf16.mxu1 %v8250_v54 }
0x14c1   :  { %6288 = vmatpush1.bf16.msra.mxu1 %v8257_v43 }
0x14c2   :  { %6322 = vmatprep.subr.bf16.mxu1 %v8166_v48 }
0x14c4   :  { %v7131_v60 = vpop.eup %7130 }
0x14c5   :  { %v2640_v3 = vsel %vm521_vm1, %v7131_v60, 0.0 }
0x14c6   :  { %2641 = vadd.xlane.f32.xlu1 %v2640_v3 }
0x1553   :  { %v2642_v3 = vpop.xlane.xlu1 %2641 }
0x1554   :  { %7132 = vrcp.f32 %v2642_v3 }
0x155e   :  { %v7133_v5 = vpop.eup %7132 }
0x155f   :  { %v2644_v59 = vmul.f32 %v7133_v5, %v7131_v60  ;;  %v2710_v60 = vld [vmem:[%s8914_s4] sm:$0xf] }
0x1560   :  { %v2715_v35 = vrot.slane %v2710_v60, %v7631_v15  ;;  %v2719_v62 = vrot.slane %v2710_v60, %v7636_v17 }
0x1561   :  { %2645 = vst [vmem:[#allocation8 + $0x8] sm:$0x1] %v2644_v59  ;;  %2797 = vmatmul.mubr.f32.vlgmr.msra.gmra.mrb[20].mxu0 %v2644_v59  ;;  %2868 = vmatmul.mubr.f32.vlgmr.msra.gmra.mrb[20].mxu1 %v2644_v59 }
0x1562   :  { %6292 = vmatpush1.bf16.msra.mxu0 %v8168_v7  ;;  %6324 = vmatpush1.bf16.msra.mxu1 %v8171_v39 }
0x1563   :  { %6294 = vmatprep.subr.bf16.mxu0 %v8175_v56  ;;  %6326 = vmatprep.subr.bf16.mxu1 %v8177_v14 }
0x1564   :  { %3060 = vmatprep.mubr.f32.mxu0 %v7453_v0  ;;  %3131 = vmatprep.mubr.f32.mxu1 %v7453_v0 }
0x1566   :  { %6296 = vmatpush1.bf16.msra.mxu0 %v8180_v6  ;;  %6328 = vmatpush1.bf16.msra.mxu1 %v8184_v11 }
0x1567   :  { %6298 = vmatprep.subr.bf16.mxu0 %v8186_v29  ;;  %6330 = vmatprep.subr.bf16.mxu1 %v8188_v18 }
0x156a   :  { %6300 = vmatpush1.bf16.msra.mxu0 %v8191_v24  ;;  %6332 = vmatpush1.bf16.msra.mxu1 %v8195_v30 }
0x156b   :  { %6302 = vmatprep.subr.bf16.mxu0 %v8197_v50  ;;  %6334 = vmatprep.subr.bf16.mxu1 %v8200_v25 }
0x156e   :  { %6304 = vmatpush1.bf16.msra.mxu0 %v8203_v38  ;;  %6336 = vmatpush1.bf16.msra.mxu1 %v8207_v41 }
0x156f   :  { %6306 = vmatprep.subr.bf16.mxu0 %v8209_v45  ;;  %6338 = vmatprep.subr.bf16.mxu1 %v8212_v63 }
0x1572   :  { %6308 = vmatpush1.bf16.msra.mxu0 %v8215_v4  ;;  %6340 = vmatpush1.bf16.msra.mxu1 %v8219_v36 }
0x1573   :  { %6310 = vmatprep.subr.bf16.mxu0 %v8226_v9  ;;  %6342 = vmatprep.subr.bf16.mxu1 %v8228_v12 }
0x1576   :  { %6312 = vmatpush1.bf16.msra.mxu0 %v8230_v16  ;;  %6344 = vmatpush1.bf16.msra.mxu1 %v8233_v46 }
0x1577   :  { %6314 = vmatprep.subr.bf16.mxu0 %v8237_v37  ;;  %6346 = vmatprep.subr.bf16.mxu1 %v8239_v61 }
0x157a   :  { %6316 = vmatpush1.bf16.msra.mxu0 %v8242_v57  ;;  %6348 = vmatpush1.bf16.msra.mxu1 %v8246_v8 }
0x157b   :  { %6318 = vmatprep.subr.bf16.mxu0 %v8248_v34  ;;  %6350 = vmatprep.subr.bf16.mxu1 %v8250_v54 }
0x157e   :  { %6320 = vmatpush1.bf16.msra.mxu0 %v8253_v26  ;;  %6352 = vmatpush1.bf16.msra.mxu1 %v8257_v43 }
0x157f   :  { %6354 = vmatprep.subr.bf16.mxu0 %v8164_v53  ;;  %6386 = vmatprep.subr.bf16.mxu1 %v8166_v48  ;;  %v2723_v53 = vrot.slane %v2710_v60, %v7640_v23  ;;  %v2727_v48 = vrot.slane %v2710_v60, %v7643_v40 }
0x1634   :  { %v2798_v33 = vpop.f32.mrb[20].mxu0  ;;  %v2869_v51 = vpop.f32.mrb[20].mxu1 }
0x1635   :  { %v2799_v21 = vadd.f32 %v2798_v33, %v2715_v35  ;;  %v2800_v58 = vpop.f32.mrb[21].mxu0  ;;  %v2871_v13 = vpop.f32.mrb[21].mxu1  ;;  %v2870_v32 = vadd.f32 %v2869_v51, %v2723_v53 }
0x1636   :  { %v2801_v49 = vadd.f32 %v2800_v58, %v2719_v62  ;;  %v2872_v28 = vadd.f32 %v2871_v13, %v2727_v48 }
0x1637   :  { %v5600_v27 = vmul.f32 -1.442695, %v2799_v21  ;;  %v5602_v20 = vmul.f32 -1.442695, %v2870_v32 }
0x1638   :  { %v5601_v42 = vmul.f32 -1.442695, %v2801_v49 }
0x1639   :  { %7134 = vpow2.f32 %v5600_v27 }
0x163a   :  { %7136 = vpow2.f32 %v5601_v42 }
0x163b   :  { %7138 = vtanh.f32 %v2872_v28 }
0x163c   :  { %7140 = vpow2.f32 %v5602_v20 }
0x1643   :  { %v7135_v10 = vpop.eup %7134 }
0x1644   :  { %v2883_v47 = vadd.f32 1.0, %v7135_v10  ;;  %v7137_v52 = vpop.eup %7136 }
0x1645   :  { %v2884_v31 = vadd.f32 1.0, %v7137_v52  ;;  %v7139_v19 = vpop.eup %7138 }
0x1646   :  { %7142 = vrcp.f32 %v2883_v47  ;;  %v7141_v22 = vpop.eup %7140 }
0x1647   :  { %7144 = vrcp.f32 %v2884_v31  ;;  %v2885_v3 = vadd.f32 1.0, %v7141_v22  ;;  %v3238_v22 = vld [vmem:[%s8914_s4] sm:$0xf] }
0x1649   :  { %7146 = vrcp.f32 %v2885_v3 }
0x1650   :  { %v7143_v55 = vpop.eup %7142 }
0x1651   :  { %v2894_v1 = vmul.f32 %v7143_v55, %v7139_v19  ;;  %v7145_v2 = vpop.eup %7144  ;;  %v3243_v55 = vrot.slane %v3238_v22, %v7631_v15 }
0x1652   :  { %v2893_v5 = vmul.f32 %v7145_v2, %v8157_v44 }
0x1653   :  { %v7147_v60 = vpop.eup %7146 }
0x1654   :  { %v8306_v59 = vadd.f32 %v2894_v1, %v2893_v5  ;;  %v3247_v1 = vrot.slane %v3238_v22, %v7636_v17 }
0x1656   :  { %7148 = vtanh.f32 %v8306_v59 }
0x1660   :  { %v7149_v35 = vpop.eup %7148 }
0x1661   :  { %v2897_v62 = vmul.f32 %v7149_v35, %v7147_v60 }
0x1663   :  { %v2898_v33 = vsel %vm521_vm1, %v2897_v62, -inf }
0x1664   :  { %2899 = vmax.xlane.f32.xlu0 %v2898_v33 }
0x16f1   :  { %v2900_v51 = vpop.xlane.xlu0 %2899 }
0x16f2   :  { %v2901_v21 = vsub.f32 %v2897_v62, %v2900_v51  ;;  %v3251_v51 = vrot.slane %v3238_v22, %v7640_v23 }
0x16f4   :  { %v2902_v58 = vmul.f32 1.442695, %v2901_v21  ;;  %v3255_v21 = vrot.slane %v3238_v22, %v7643_v40  ;;  %v3457_v22 = vld [vmem:[#allocation7 + $0x98] sm:$0xff] }
0x16f6   :  { %7150 = vpow2.f32 %v2902_v58 }
0x1700   :  { %v7151_v13 = vpop.eup %7150 }
0x1701   :  { %v2904_v49 = vsel %vm521_vm1, %v7151_v13, 0.0 }
0x1702   :  { %2905 = vadd.xlane.f32.xlu1 %v2904_v49 }
0x178f   :  { %v2906_v44 = vpop.xlane.xlu1 %2905 }
0x1790   :  { %7152 = vrcp.f32 %v2906_v44 }
0x179a   :  { %v7153_v27 = vpop.eup %7152 }
0x179b   :  { %v2908_v42 = vmul.f32 %v7153_v27, %v7151_v13 }
0x179d   :  { %2909 = vst [vmem:[#allocation8 + $0x9] sm:$0x1] %v2908_v42  ;;  %3061 = vmatmul.mubr.f32.vlgmr.msra.gmra.mrb[22].mxu0 %v2908_v42  ;;  %3132 = vmatmul.mubr.f32.vlgmr.msra.gmra.mrb[22].mxu1 %v2908_v42 }
0x179e   :  { %6356 = vmatpush1.bf16.msra.mxu0 %v8168_v7  ;;  %6388 = vmatpush1.bf16.msra.mxu1 %v8171_v39  ;;  %v2974_v7 = vld [vmem:[%s8914_s4] sm:$0xf] }
0x179f   :  { %6358 = vmatprep.subr.bf16.mxu0 %v8175_v56  ;;  %6390 = vmatprep.subr.bf16.mxu1 %v8177_v14  ;;  %v2979_v39 = vrot.slane %v2974_v7, %v7631_v15  ;;  %v2983_v56 = vrot.slane %v2974_v7, %v7636_v17 }
0x17a0   :  { %3324 = vmatprep.mubr.f32.mxu0 %v7453_v0  ;;  %3395 = vmatprep.mubr.f32.mxu1 %v7453_v0 }
0x17a2   :  { %6360 = vmatpush1.bf16.msra.mxu0 %v8180_v6  ;;  %6392 = vmatpush1.bf16.msra.mxu1 %v8184_v11 }
0x17a3   :  { %6362 = vmatprep.subr.bf16.mxu0 %v8186_v29  ;;  %6394 = vmatprep.subr.bf16.mxu1 %v8188_v18 }
0x17a6   :  { %6364 = vmatpush1.bf16.msra.mxu0 %v8191_v24  ;;  %6396 = vmatpush1.bf16.msra.mxu1 %v8195_v30 }
0x17a7   :  { %6366 = vmatprep.subr.bf16.mxu0 %v8197_v50  ;;  %6398 = vmatprep.subr.bf16.mxu1 %v8200_v25  ;;  %v2987_v25 = vrot.slane %v2974_v7, %v7640_v23 }
0x17aa   :  { %6368 = vmatpush1.bf16.msra.mxu0 %v8203_v38  ;;  %6400 = vmatpush1.bf16.msra.mxu1 %v8207_v41  ;;  %v2991_v38 = vrot.slane %v2974_v7, %v7643_v40 }
0x17ab   :  { %6370 = vmatprep.subr.bf16.mxu0 %v8209_v45  ;;  %6402 = vmatprep.subr.bf16.mxu1 %v8212_v63 }
0x17ae   :  { %6372 = vmatpush1.bf16.msra.mxu0 %v8215_v4  ;;  %6404 = vmatpush1.bf16.msra.mxu1 %v8219_v36 }
0x17af   :  { %6374 = vmatprep.subr.bf16.mxu0 %v8226_v9  ;;  %6406 = vmatprep.subr.bf16.mxu1 %v8228_v12 }
0x17b2   :  { %6376 = vmatpush1.bf16.msra.mxu0 %v8230_v16  ;;  %6408 = vmatpush1.bf16.msra.mxu1 %v8233_v46 }
0x17b3   :  { %6378 = vmatprep.subr.bf16.mxu0 %v8237_v37  ;;  %6410 = vmatprep.subr.bf16.mxu1 %v8239_v61 }
0x17b6   :  { %6380 = vmatpush1.bf16.msra.mxu0 %v8242_v57  ;;  %6412 = vmatpush1.bf16.msra.mxu1 %v8246_v8 }
0x17b7   :  { %6382 = vmatprep.subr.bf16.mxu0 %v8248_v34  ;;  %6414 = vmatprep.subr.bf16.mxu1 %v8250_v54 }
0x17ba   :  { %6384 = vmatpush1.bf16.msra.mxu0 %v8253_v26  ;;  %6416 = vmatpush1.bf16.msra.mxu1 %v8257_v43 }
0x1870   :  { %v3062_v14 = vpop.f32.mrb[22].mxu0  ;;  %v3133_v6 = vpop.f32.mrb[22].mxu1 }
0x1871   :  { %v3063_v11 = vadd.f32 %v3062_v14, %v2979_v39  ;;  %v3064_v29 = vpop.f32.mrb[23].mxu0  ;;  %v3135_v18 = vpop.f32.mrb[23].mxu1  ;;  %v3134_v41 = vadd.f32 %v3133_v6, %v2987_v25 }
0x1872   :  { %v3065_v24 = vadd.f32 %v3064_v29, %v2983_v56  ;;  %v3136_v45 = vadd.f32 %v3135_v18, %v2991_v38 }
0x1873   :  { %v5603_v30 = vmul.f32 -1.442695, %v3063_v11  ;;  %v5605_v63 = vmul.f32 -1.442695, %v3134_v41  ;;  %v3439_v41 = vld [vmem:[#allocation7 + $0x8] sm:$0xff] }
0x1874   :  { %v5604_v50 = vmul.f32 -1.442695, %v3065_v24 }
0x1875   :  { %7154 = vpow2.f32 %v5603_v30 }
0x1876   :  { %7156 = vpow2.f32 %v5604_v50 }
0x1877   :  { %7158 = vtanh.f32 %v3136_v45  ;;  %v3443_v45 = vld [vmem:[#allocation7 + $0x28] sm:$0xff] }
0x1878   :  { %7160 = vpow2.f32 %v5605_v63  ;;  %v3441_v63 = vld [vmem:[#allocation7 + $0x18] sm:$0xff] }
0x187f   :  { %v7155_v4 = vpop.eup %7154 }
0x1880   :  { %v3147_v36 = vadd.f32 1.0, %v7155_v4  ;;  %v7157_v9 = vpop.eup %7156  ;;  %v8369_v4 = vpack.c.bf16 %v3443_v45, %v3439_v41  ;;  %v3476_v41 = vld [vmem:[#allocation7 + $0x130] sm:$0xff] }
0x1881   :  { %v3148_v12 = vadd.f32 1.0, %v7157_v9  ;;  %v7159_v16 = vpop.eup %7158  ;;  %v3438_v9 = vld [vmem:[#allocation7] sm:$0xff] }
0x1882   :  { %7162 = vrcp.f32 %v3147_v36  ;;  %v7161_v46 = vpop.eup %7160  ;;  %v3445_v36 = vld [vmem:[#allocation7 + $0x38] sm:$0xff]  ;;  %6418 = vmatprep.subr.bf16.mxu0 %v8369_v4 }
0x1883   :  { %7164 = vrcp.f32 %v3148_v12  ;;  %v3149_v8 = vadd.f32 1.0, %v7161_v46  ;;  %v3442_v12 = vld [vmem:[#allocation7 + $0x20] sm:$0xff] }
0x1884   :  { %v8373_v46 = vpack.c.bf16 %v3442_v12, %v3438_v9 }
0x1885   :  { %7166 = vrcp.f32 %v3149_v8 }
0x188c   :  { %v7163_v37 = vpop.eup %7162 }
0x188d   :  { %v3158_v61 = vmul.f32 %v7163_v37, %v7159_v16  ;;  %v7165_v57 = vpop.eup %7164  ;;  %v8371_v16 = vpack.c.bf16 %v3445_v36, %v3441_v63  ;;  %v3440_v37 = vld [vmem:[#allocation7 + $0x10] sm:$0xff] }
0x188e   :  { %v3157_v34 = vmul.f32 %v7165_v57, %v8306_v59  ;;  %v3447_v57 = vld [vmem:[#allocation7 + $0x48] sm:$0xff] }
0x188f   :  { %v7167_v26 = vpop.eup %7166  ;;  %6450 = vmatprep.subr.bf16.mxu1 %v8371_v16 }
0x1890   :  { %v3159_v54 = vadd.f32 %v3158_v61, %v3157_v34  ;;  %v3444_v61 = vld [vmem:[#allocation7 + $0x30] sm:$0xff]  ;;  %v3451_v34 = vld [vmem:[#allocation7 + $0x68] sm:$0xff] }
0x1891   :  { %v8376_v8 = vpack.c.bf16 %v3444_v61, %v3440_v37 }
0x1892   :  { %7168 = vtanh.f32 %v3159_v54 }
0x189c   :  { %v7169_v43 = vpop.eup %7168 }
0x189d   :  { %v3161_v53 = vmul.f32 %v7169_v43, %v7167_v26  ;;  %v3453_v26 = vld [vmem:[#allocation7 + $0x78] sm:$0xff]  ;;  %v8380_v43 = vpack.c.bf16 %v3451_v34, %v3447_v57  ;;  %v3479_v57 = vld [vmem:[#allocation7 + $0x148] sm:$0xff] }
0x189e   :  { %v3483_v34 = vld [vmem:[#allocation7 + $0x168] sm:$0xff] }
0x189f   :  { %v3162_v48 = vsel %vm521_vm1, %v3161_v53, -inf }
0x18a0   :  { %3163 = vmax.xlane.f32.xlu0 %v3162_v48  ;;  %v3446_v48 = vld [vmem:[#allocation7 + $0x40] sm:$0xff] }
0x192d   :  { %v3164_v32 = vpop.xlane.xlu0 %3163 }
0x192e   :  { %v3165_v28 = vsub.f32 %v3161_v53, %v3164_v32  ;;  %v3450_v32 = vld [vmem:[#allocation7 + $0x60] sm:$0xff] }
0x1930   :  { %v3166_v20 = vmul.f32 1.442695, %v3165_v28  ;;  %v3448_v28 = vld [vmem:[#allocation7 + $0x50] sm:$0xff] }
0x1932   :  { %7170 = vpow2.f32 %v3166_v20  ;;  %v8385_v20 = vpack.c.bf16 %v3450_v32, %v3446_v48  ;;  %v3485_v48 = vld [vmem:[#allocation7 + $0x178] sm:$0xff]  ;;  %v3478_v32 = vld [vmem:[#allocation7 + $0x140] sm:$0xff] }
0x193c   :  { %v7171_v10 = vpop.eup %7170 }
0x193d   :  { %v3168_v47 = vsel %vm521_vm1, %v7171_v10, 0.0 }
0x193e   :  { %3169 = vadd.xlane.f32.xlu1 %v3168_v47  ;;  %v3455_v47 = vld [vmem:[#allocation7 + $0x88] sm:$0xff] }
0x19cb   :  { %v3170_v52 = vpop.xlane.xlu1 %3169 }
0x19cc   :  { %7172 = vrcp.f32 %v3170_v52  ;;  %v3459_v52 = vld [vmem:[#allocation7 + $0xa8] sm:$0xff] }
0x19d6   :  { %v7173_v31 = vpop.eup %7172 }
0x19d7   :  { %v3172_v19 = vmul.f32 %v7173_v31, %v7171_v10  ;;  %v3452_v10 = vld [vmem:[#allocation7 + $0x70] sm:$0xff] }
0x19d8   :  { %v8389_v31 = vpack.c.bf16 %v3452_v10, %v3448_v28  ;;  %v3482_v28 = vld [vmem:[#allocation7 + $0x160] sm:$0xff] }
0x19d9   :  { %3173 = vst [vmem:[#allocation8 + $0xa] sm:$0x1] %v3172_v19  ;;  %3325 = vmatmul.mubr.f32.vlgmr.msra.gmra.mrb[24].mxu0 %v3172_v19  ;;  %3396 = vmatmul.mubr.f32.vlgmr.msra.gmra.mrb[24].mxu1 %v3172_v19  ;;  %v8391_v19 = vpack.c.bf16 %v3459_v52, %v3455_v47  ;;  %v8435_v47 = vpack.c.bf16 %v3482_v28, %v3478_v32  ;;  %v3480_v52 = vld [vmem:[#allocation7 + $0x150] sm:$0xff] }
0x19da   :  { %3588 = vmatprep.mubr.f32.mxu0 %v7453_v0  ;;  %3659 = vmatprep.mubr.f32.mxu1 %v7453_v0 }
0x19db   :  { %6420 = vmatpush1.bf16.msra.mxu0 %v8373_v46  ;;  %6452 = vmatpush1.bf16.msra.mxu1 %v8376_v8 }
0x19dc   :  { %6422 = vmatprep.subr.bf16.mxu0 %v8380_v43 }
0x19df   :  { %6424 = vmatpush1.bf16.msra.mxu0 %v8385_v20 }
0x19e0   :  { %6426 = vmatprep.subr.bf16.mxu0 %v8391_v19 }
0x1aac   :  { %v3326_v2 = vpop.f32.mrb[24].mxu0  ;;  %v3397_v3 = vpop.f32.mrb[24].mxu1 }
0x1aad   :  { %v3327_v5 = vadd.f32 %v3326_v2, %v3243_v55  ;;  %v3328_v59 = vpop.f32.mrb[25].mxu0  ;;  %v3399_v60 = vpop.f32.mrb[25].mxu1  ;;  %v3398_v58 = vadd.f32 %v3397_v3, %v3251_v51  ;;  %v3461_v55 = vld [vmem:[#allocation7 + $0xb8] sm:$0xff]  ;;  %v3458_v3 = vld [vmem:[#allocation7 + $0xa0] sm:$0xff] }
0x1aae   :  { %v3329_v35 = vadd.f32 %v3328_v59, %v3247_v1  ;;  %v3400_v13 = vadd.f32 %v3399_v60, %v3255_v21  ;;  %v3454_v1 = vld [vmem:[#allocation7 + $0x80] sm:$0xff]  ;;  %v8393_v2 = vpack.c.bf16 %v3461_v55, %v3457_v22  ;;  %v3460_v59 = vld [vmem:[#allocation7 + $0xb0] sm:$0xff]  ;;  %v3487_v22 = vld [vmem:[#allocation7 + $0x188] sm:$0xff] }
0x1aaf   :  { %v5606_v62 = vmul.f32 -1.442695, %v3327_v5  ;;  %v5608_v49 = vmul.f32 -1.442695, %v3398_v58  ;;  %v3456_v5 = vld [vmem:[#allocation7 + $0x90] sm:$0xff]  ;;  %v8396_v60 = vpack.c.bf16 %v3458_v3, %v3454_v1  ;;  %v3469_v58 = vld [vmem:[#allocation7 + $0xf8] sm:$0xff] }
0x1ab0   :  { %v5607_v33 = vmul.f32 -1.442695, %v3329_v35  ;;  %v3463_v35 = vld [vmem:[#allocation7 + $0xc8] sm:$0xff]  ;;  %v8400_v51 = vpack.c.bf16 %v3460_v59, %v3456_v5  ;;  %v3489_v3 = vld [vmem:[#allocation7 + $0x198] sm:$0xff] }
0x1ab1   :  { %7174 = vpow2.f32 %v5606_v62  ;;  %v3467_v62 = vld [vmem:[#allocation7 + $0xe8] sm:$0xff]  ;;  %6428 = vmatpush1.bf16.msra.mxu0 %v8396_v60  ;;  %v3493_v5 = vld [vmem:[#allocation7 + $0x1b8] sm:$0xff] }
0x1ab2   :  { %7176 = vpow2.f32 %v5607_v33  ;;  %v3465_v33 = vld [vmem:[#allocation7 + $0xd8] sm:$0xff]  ;;  %v8402_v21 = vpack.c.bf16 %v3467_v62, %v3463_v35  ;;  %v3491_v1 = vld [vmem:[#allocation7 + $0x1a8] sm:$0xff]  ;;  %v8444_v35 = vpack.c.bf16 %v3493_v5, %v3489_v3  ;;  %v3486_v62 = vld [vmem:[#allocation7 + $0x180] sm:$0xff] }
0x1ab3   :  { %7178 = vtanh.f32 %v3400_v13  ;;  %v3462_v13 = vld [vmem:[#allocation7 + $0xc0] sm:$0xff]  ;;  %v8442_v59 = vpack.c.bf16 %v3491_v1, %v3487_v22 }
0x1ab4   :  { %7180 = vpow2.f32 %v5608_v49  ;;  %v3466_v49 = vld [vmem:[#allocation7 + $0xe0] sm:$0xff]  ;;  %6430 = vmatprep.subr.bf16.mxu0 %v8402_v21 }
0x1abb   :  { %v7175_v44 = vpop.eup %7174 }
0x1abc   :  { %v3411_v27 = vadd.f32 1.0, %v7175_v44  ;;  %v7177_v42 = vpop.eup %7176  ;;  %v8405_v44 = vpack.c.bf16 %v3469_v58, %v3465_v33  ;;  %v3490_v33 = vld [vmem:[#allocation7 + $0x1a0] sm:$0xff]  ;;  %v3488_v58 = vld [vmem:[#allocation7 + $0x190] sm:$0xff] }
0x1abd   :  { %v3412_v7 = vadd.f32 1.0, %v7177_v42  ;;  %v7179_v39 = vpop.eup %7178  ;;  %v3468_v42 = vld [vmem:[#allocation7 + $0xf0] sm:$0xff] }
0x1abe   :  { %7182 = vrcp.f32 %v3411_v27  ;;  %v7181_v56 = vpop.eup %7180  ;;  %v3464_v27 = vld [vmem:[#allocation7 + $0xd0] sm:$0xff] }
0x1abf   :  { %7184 = vrcp.f32 %v3412_v7  ;;  %v3413_v29 = vadd.f32 1.0, %v7181_v56  ;;  %v3471_v7 = vld [vmem:[#allocation7 + $0x108] sm:$0xff]  ;;  %v3473_v56 = vld [vmem:[#allocation7 + $0x118] sm:$0xff] }
0x1ac1   :  { %7186 = vrcp.f32 %v3413_v29 }
0x1ac8   :  { %v7183_v14 = vpop.eup %7182 }
0x1ac9   :  { %v3422_v6 = vmul.f32 %v7183_v14, %v7179_v39  ;;  %v7185_v11 = vpop.eup %7184  ;;  %v3475_v39 = vld [vmem:[#allocation7 + $0x128] sm:$0xff]  ;;  %v3477_v14 = vld [vmem:[#allocation7 + $0x138] sm:$0xff] }
0x1aca   :  { %v3421_v18 = vmul.f32 %v7185_v11, %v3159_v54  ;;  %v3449_v54 = vld [vmem:[#allocation7 + $0x58] sm:$0xff]  ;;  %v8412_v11 = vpack.c.bf16 %v3468_v42, %v3464_v27  ;;  %v8414_v29 = vpack.c.bf16 %v3475_v39, %v3471_v7  ;;  %v3495_v27 = vld [vmem:[#allocation7 + $0x1c8] sm:$0xff] }
0x1acb   :  { %v7187_v30 = vpop.eup %7186  ;;  %v8382_v53 = vpack.c.bf16 %v3453_v26, %v3449_v54  ;;  %v3481_v54 = vld [vmem:[#allocation7 + $0x158] sm:$0xff]  ;;  %v8431_v26 = vpack.c.bf16 %v3483_v34, %v3479_v57  ;;  %v3499_v42 = vld [vmem:[#allocation7 + $0x1e8] sm:$0xff] }
0x1acc   :  { %v8362_v24 = vadd.f32 %v3422_v6, %v3421_v18  ;;  %v8408_v6 = vpack.c.bf16 %v3466_v49, %v3462_v13  ;;  %v3470_v18 = vld [vmem:[#allocation7 + $0x100] sm:$0xff]  ;;  %v8433_v10 = vpack.c.bf16 %v3485_v48, %v3481_v54  ;;  %v8447_v13 = vpack.c.bf16 %v3490_v33, %v3486_v62  ;;  %v3492_v49 = vld [vmem:[#allocation7 + $0x1b0] sm:$0xff] }
0x1acd   :  { %6454 = vmatprep.subr.bf16.mxu1 %v8382_v53  ;;  %v8451_v7 = vpack.c.bf16 %v3492_v49, %v3488_v58  ;;  %v8453_v39 = vpack.c.bf16 %v3499_v42, %v3495_v27 }
0x1ace   :  { %7188 = vtanh.f32 %v8362_v24  ;;  %6456 = vmatpush1.bf16.msra.mxu1 %v8389_v31  ;;  %6432 = vmatpush1.bf16.msra.mxu0 %v8408_v6 }
0x1acf   :  { %6458 = vmatprep.subr.bf16.mxu1 %v8393_v2  ;;  %6434 = vmatprep.subr.bf16.mxu0 %v8414_v29 }
0x1ad2   :  { %6460 = vmatpush1.bf16.msra.mxu1 %v8400_v51 }
0x1ad3   :  { %6462 = vmatprep.subr.bf16.mxu1 %v8405_v44 }
0x1ad6   :  { %6464 = vmatpush1.bf16.msra.mxu1 %v8412_v11 }
0x1ad8   :  { %v7189_v50 = vpop.eup %7188 }
0x1ad9   :  { %v8365_v25 = vmul.f32 %v7189_v50, %v7187_v30  ;;  %v3474_v30 = vld [vmem:[#allocation7 + $0x120] sm:$0xff]  ;;  %v8417_v50 = vpack.c.bf16 %v3477_v14, %v3473_v56  ;;  %v3497_v56 = vld [vmem:[#allocation7 + $0x1d8] sm:$0xff] }
0x1ada   :  { %v8420_v45 = vpack.c.bf16 %v3474_v30, %v3470_v18  ;;  %v3501_v14 = vld [vmem:[#allocation7 + $0x1f8] sm:$0xff]  ;;  %v3494_v18 = vld [vmem:[#allocation7 + $0x1c0] sm:$0xff] }
0x1adb   :  { %v3426_v38 = vsel %vm521_vm1, %v8365_v25, -inf  ;;  %6466 = vmatprep.subr.bf16.mxu1 %v8417_v50  ;;  %v8455_v30 = vpack.c.bf16 %v3501_v14, %v3497_v56 }
0x1adc   :  { %3427 = vmax.xlane.f32.xlu0 %v3426_v38  ;;  %v3472_v38 = vld [vmem:[#allocation7 + $0x110] sm:$0xff]  ;;  %6436 = vmatpush1.bf16.msra.mxu0 %v8420_v45 }
0x1add   :  { %v8424_v63 = vpack.c.bf16 %v3476_v41, %v3472_v38  ;;  %6438 = vmatprep.subr.bf16.mxu0 %v8431_v26  ;;  %v3498_v38 = vld [vmem:[#allocation7 + $0x1e0] sm:$0xff]  ;;  %v3496_v41 = vld [vmem:[#allocation7 + $0x1d0] sm:$0xff] }
0x1adf   :  { %6468 = vmatpush1.bf16.msra.mxu1 %v8424_v63 }
0x1ae0   :  { %6470 = vmatprep.subr.bf16.mxu1 %v8433_v10  ;;  %6440 = vmatpush1.bf16.msra.mxu0 %v8435_v47 }
0x1ae1   :  { %6442 = vmatprep.subr.bf16.mxu0 %v8442_v59 }
0x1ae4   :  { %6444 = vmatpush1.bf16.msra.mxu0 %v8447_v13 }
0x1ae5   :  { %6446 = vmatprep.subr.bf16.mxu0 %v8453_v39 }
0x1b69   :  { %v3428_v36 = vpop.xlane.xlu0 %3427 }
0x1b6a   :  { %v3429_v9 = vsub.f32 %v8365_v25, %v3428_v36  ;;  %v3484_v25 = vld [vmem:[#allocation7 + $0x170] sm:$0xff] }
0x1b6b   :  { %v8438_v55 = vpack.c.bf16 %v3484_v25, %v3480_v52  ;;  %v3500_v36 = vld [vmem:[#allocation7 + $0x1f0] sm:$0xff] }
0x1b6c   :  { %v3430_v12 = vmul.f32 1.442695, %v3429_v9  ;;  %v8458_v9 = vpack.c.bf16 %v3498_v38, %v3494_v18 }
0x1b6d   :  { %6472 = vmatpush1.bf16.msra.mxu1 %v8438_v55 }
0x1b6e   :  { %7190 = vpow2.f32 %v3430_v12  ;;  %6474 = vmatprep.subr.bf16.mxu1 %v8444_v35  ;;  %v8462_v12 = vpack.c.bf16 %v3500_v36, %v3496_v41  ;;  %6448 = vmatpush1.bf16.msra.mxu0 %v8458_v9 }
0x1b6f   :  { %6482 = vmatprep.subr.bf16.mxu0 %v8369_v4 }
0x1b71   :  { %6476 = vmatpush1.bf16.msra.mxu1 %v8451_v7 }
0x1b72   :  { %6478 = vmatprep.subr.bf16.mxu1 %v8455_v30 }
0x1b75   :  { %6480 = vmatpush1.bf16.msra.mxu1 %v8462_v12 }
0x1b76   :  { %6514 = vmatprep.subr.bf16.mxu1 %v8371_v16 }
0x1b78   :  { %v7191_v37 = vpop.eup %7190 }
0x1b79   :  { %v3432_v61 = vsel %vm521_vm1, %v7191_v37, 0.0 }
0x1b7a   :  { %3433 = vadd.xlane.f32.xlu1 %v3432_v61 }
0x1c07   :  { %v3434_v61 = vpop.xlane.xlu1 %3433 }
0x1c08   :  { %7192 = vrcp.f32 %v3434_v61 }
0x1c12   :  { %v7193_v57 = vpop.eup %7192 }
0x1c13   :  { %v3436_v34 = vmul.f32 %v7193_v57, %v7191_v37  ;;  %v3502_v37 = vld [vmem:[%s8914_s4] sm:$0xf] }
0x1c14   :  { %v3507_v54 = vrot.slane %v3502_v37, %v7631_v15  ;;  %v3511_v48 = vrot.slane %v3502_v37, %v7636_v17 }
0x1c15   :  { %3437 = vst [vmem:[#allocation8 + $0xb] sm:$0x1] %v3436_v34  ;;  %3589 = vmatmul.mubr.f32.vlgmr.msra.gmra.mrb[26].mxu0 %v3436_v34  ;;  %3660 = vmatmul.mubr.f32.vlgmr.msra.gmra.mrb[26].mxu1 %v3436_v34 }
0x1c16   :  { %6484 = vmatpush1.bf16.msra.mxu0 %v8373_v46  ;;  %6516 = vmatpush1.bf16.msra.mxu1 %v8376_v8 }
0x1c17   :  { %6486 = vmatprep.subr.bf16.mxu0 %v8380_v43  ;;  %6518 = vmatprep.subr.bf16.mxu1 %v8382_v53 }
0x1c18   :  { %3852 = vmatprep.mubr.f32.mxu0 %v7453_v0  ;;  %3923 = vmatprep.mubr.f32.mxu1 %v7453_v0 }
0x1c1a   :  { %6488 = vmatpush1.bf16.msra.mxu0 %v8385_v20  ;;  %6520 = vmatpush1.bf16.msra.mxu1 %v8389_v31 }
0x1c1b   :  { %6490 = vmatprep.subr.bf16.mxu0 %v8391_v19  ;;  %6522 = vmatprep.subr.bf16.mxu1 %v8393_v2 }
0x1c1e   :  { %6492 = vmatpush1.bf16.msra.mxu0 %v8396_v60  ;;  %6524 = vmatpush1.bf16.msra.mxu1 %v8400_v51 }
0x1c1f   :  { %6494 = vmatprep.subr.bf16.mxu0 %v8402_v21  ;;  %6526 = vmatprep.subr.bf16.mxu1 %v8405_v44 }
0x1c22   :  { %6496 = vmatpush1.bf16.msra.mxu0 %v8408_v6  ;;  %6528 = vmatpush1.bf16.msra.mxu1 %v8412_v11 }
0x1c23   :  { %6498 = vmatprep.subr.bf16.mxu0 %v8414_v29  ;;  %6530 = vmatprep.subr.bf16.mxu1 %v8417_v50 }
0x1c26   :  { %6500 = vmatpush1.bf16.msra.mxu0 %v8420_v45  ;;  %6532 = vmatpush1.bf16.msra.mxu1 %v8424_v63 }
0x1c27   :  { %6502 = vmatprep.subr.bf16.mxu0 %v8431_v26  ;;  %6534 = vmatprep.subr.bf16.mxu1 %v8433_v10 }
0x1c2a   :  { %6504 = vmatpush1.bf16.msra.mxu0 %v8435_v47  ;;  %6536 = vmatpush1.bf16.msra.mxu1 %v8438_v55 }
0x1c2b   :  { %6506 = vmatprep.subr.bf16.mxu0 %v8442_v59  ;;  %6538 = vmatprep.subr.bf16.mxu1 %v8444_v35 }
0x1c2e   :  { %6508 = vmatpush1.bf16.msra.mxu0 %v8447_v13  ;;  %6540 = vmatpush1.bf16.msra.mxu1 %v8451_v7 }
0x1c2f   :  { %6510 = vmatprep.subr.bf16.mxu0 %v8453_v39  ;;  %6542 = vmatprep.subr.bf16.mxu1 %v8455_v30 }
0x1c32   :  { %6512 = vmatpush1.bf16.msra.mxu0 %v8458_v9  ;;  %6544 = vmatpush1.bf16.msra.mxu1 %v8462_v12 }
0x1c33   :  { %6546 = vmatprep.subr.bf16.mxu0 %v8369_v4  ;;  %6578 = vmatprep.subr.bf16.mxu1 %v8371_v16  ;;  %v3515_v4 = vrot.slane %v3502_v37, %v7640_v23  ;;  %v3519_v16 = vrot.slane %v3502_v37, %v7643_v40 }
0x1ce8   :  { %v3590_v32 = vpop.f32.mrb[26].mxu0  ;;  %v3661_v28 = vpop.f32.mrb[26].mxu1 }
0x1ce9   :  { %v3591_v52 = vadd.f32 %v3590_v32, %v3507_v54  ;;  %v3592_v25 = vpop.f32.mrb[27].mxu0  ;;  %v3663_v22 = vpop.f32.mrb[27].mxu1  ;;  %v3662_v62 = vadd.f32 %v3661_v28, %v3515_v4 }
0x1cea   :  { %v3593_v1 = vadd.f32 %v3592_v25, %v3511_v48  ;;  %v3664_v33 = vadd.f32 %v3663_v22, %v3519_v16 }
0x1ceb   :  { %v5609_v3 = vmul.f32 -1.442695, %v3591_v52  ;;  %v5611_v58 = vmul.f32 -1.442695, %v3662_v62 }
0x1cec   :  { %v5610_v5 = vmul.f32 -1.442695, %v3593_v1 }
0x1ced   :  { %7194 = vpow2.f32 %v5609_v3 }
0x1cee   :  { %7196 = vpow2.f32 %v5610_v5 }
0x1cef   :  { %7198 = vtanh.f32 %v3664_v33 }
0x1cf0   :  { %7200 = vpow2.f32 %v5611_v58 }
0x1cf7   :  { %v7195_v49 = vpop.eup %7194 }
0x1cf8   :  { %v3675_v27 = vadd.f32 1.0, %v7195_v49  ;;  %v7197_v42 = vpop.eup %7196 }
0x1cf9   :  { %v3676_v56 = vadd.f32 1.0, %v7197_v42  ;;  %v7199_v14 = vpop.eup %7198 }
0x1cfa   :  { %7202 = vrcp.f32 %v3675_v27  ;;  %v7201_v18 = vpop.eup %7200 }
0x1cfb   :  { %7204 = vrcp.f32 %v3676_v56  ;;  %v3677_v61 = vadd.f32 1.0, %v7201_v18  ;;  %v4030_v18 = vld [vmem:[%s8914_s4] sm:$0xf] }
0x1cfd   :  { %7206 = vrcp.f32 %v3677_v61 }
0x1d04   :  { %v7203_v38 = vpop.eup %7202 }
0x1d05   :  { %v3686_v41 = vmul.f32 %v7203_v38, %v7199_v14  ;;  %v7205_v36 = vpop.eup %7204  ;;  %v4035_v38 = vrot.slane %v4030_v18, %v7631_v15 }
0x1d06   :  { %v3685_v57 = vmul.f32 %v7205_v36, %v8362_v24 }
0x1d07   :  { %v7207_v37 = vpop.eup %7206 }
0x1d08   :  { %v8511_v34 = vadd.f32 %v3686_v41, %v3685_v57  ;;  %v4039_v41 = vrot.slane %v4030_v18, %v7636_v17 }
0x1d0a   :  { %7208 = vtanh.f32 %v8511_v34 }
0x1d14   :  { %v7209_v54 = vpop.eup %7208 }
0x1d15   :  { %v3689_v48 = vmul.f32 %v7209_v54, %v7207_v37 }
0x1d17   :  { %v3690_v32 = vsel %vm521_vm1, %v3689_v48, -inf }
0x1d18   :  { %3691 = vmax.xlane.f32.xlu0 %v3690_v32 }
0x1da5   :  { %v3692_v28 = vpop.xlane.xlu0 %3691 }
0x1da6   :  { %v3693_v52 = vsub.f32 %v3689_v48, %v3692_v28  ;;  %v4043_v28 = vrot.slane %v4030_v18, %v7640_v23 }
0x1da8   :  { %v3694_v25 = vmul.f32 1.442695, %v3693_v52  ;;  %v4047_v52 = vrot.slane %v4030_v18, %v7643_v40  ;;  %v4249_v18 = vld [vmem:[#allocation7 + $0x98] sm:$0xff] }
0x1daa   :  { %7210 = vpow2.f32 %v3694_v25 }
0x1db4   :  { %v7211_v22 = vpop.eup %7210 }
0x1db5   :  { %v3696_v1 = vsel %vm521_vm1, %v7211_v22, 0.0 }
0x1db6   :  { %3697 = vadd.xlane.f32.xlu1 %v3696_v1 }
0x1e43   :  { %v3698_v24 = vpop.xlane.xlu1 %3697 }
0x1e44   :  { %7212 = vrcp.f32 %v3698_v24 }
0x1e4e   :  { %v7213_v3 = vpop.eup %7212 }
0x1e4f   :  { %v3700_v5 = vmul.f32 %v7213_v3, %v7211_v22 }
0x1e51   :  { %3701 = vst [vmem:[#allocation8 + $0xc] sm:$0x1] %v3700_v5  ;;  %3853 = vmatmul.mubr.f32.vlgmr.msra.gmra.mrb[28].mxu0 %v3700_v5  ;;  %3924 = vmatmul.mubr.f32.vlgmr.msra.gmra.mrb[28].mxu1 %v3700_v5 }
0x1e52   :  { %6548 = vmatpush1.bf16.msra.mxu0 %v8373_v46  ;;  %6580 = vmatpush1.bf16.msra.mxu1 %v8376_v8  ;;  %v3766_v46 = vld [vmem:[%s8914_s4] sm:$0xf] }
0x1e53   :  { %6550 = vmatprep.subr.bf16.mxu0 %v8380_v43  ;;  %6582 = vmatprep.subr.bf16.mxu1 %v8382_v53  ;;  %v3771_v8 = vrot.slane %v3766_v46, %v7631_v15  ;;  %v3775_v43 = vrot.slane %v3766_v46, %v7636_v17 }
0x1e54   :  { %4116 = vmatprep.mubr.f32.mxu0 %v7453_v0  ;;  %4187 = vmatprep.mubr.f32.mxu1 %v7453_v0 }
0x1e56   :  { %6552 = vmatpush1.bf16.msra.mxu0 %v8385_v20  ;;  %6584 = vmatpush1.bf16.msra.mxu1 %v8389_v31 }
0x1e57   :  { %6554 = vmatprep.subr.bf16.mxu0 %v8391_v19  ;;  %6586 = vmatprep.subr.bf16.mxu1 %v8393_v2 }
0x1e5a   :  { %6556 = vmatpush1.bf16.msra.mxu0 %v8396_v60  ;;  %6588 = vmatpush1.bf16.msra.mxu1 %v8400_v51 }
0x1e5b   :  { %6558 = vmatprep.subr.bf16.mxu0 %v8402_v21  ;;  %6590 = vmatprep.subr.bf16.mxu1 %v8405_v44  ;;  %v3779_v44 = vrot.slane %v3766_v46, %v7640_v23 }
0x1e5e   :  { %6560 = vmatpush1.bf16.msra.mxu0 %v8408_v6  ;;  %6592 = vmatpush1.bf16.msra.mxu1 %v8412_v11  ;;  %v3783_v6 = vrot.slane %v3766_v46, %v7643_v40 }
0x1e5f   :  { %6562 = vmatprep.subr.bf16.mxu0 %v8414_v29  ;;  %6594 = vmatprep.subr.bf16.mxu1 %v8417_v50 }
0x1e62   :  { %6564 = vmatpush1.bf16.msra.mxu0 %v8420_v45  ;;  %6596 = vmatpush1.bf16.msra.mxu1 %v8424_v63 }
0x1e63   :  { %6566 = vmatprep.subr.bf16.mxu0 %v8431_v26  ;;  %6598 = vmatprep.subr.bf16.mxu1 %v8433_v10 }
0x1e66   :  { %6568 = vmatpush1.bf16.msra.mxu0 %v8435_v47  ;;  %6600 = vmatpush1.bf16.msra.mxu1 %v8438_v55 }
0x1e67   :  { %6570 = vmatprep.subr.bf16.mxu0 %v8442_v59  ;;  %6602 = vmatprep.subr.bf16.mxu1 %v8444_v35 }
0x1e6a   :  { %6572 = vmatpush1.bf16.msra.mxu0 %v8447_v13  ;;  %6604 = vmatpush1.bf16.msra.mxu1 %v8451_v7 }
0x1e6b   :  { %6574 = vmatprep.subr.bf16.mxu0 %v8453_v39  ;;  %6606 = vmatprep.subr.bf16.mxu1 %v8455_v30 }
0x1e6e   :  { %6576 = vmatpush1.bf16.msra.mxu0 %v8458_v9  ;;  %6608 = vmatpush1.bf16.msra.mxu1 %v8462_v12 }
0x1f24   :  { %v3854_v53 = vpop.f32.mrb[28].mxu0  ;;  %v3925_v20 = vpop.f32.mrb[28].mxu1 }
0x1f25   :  { %v3855_v31 = vadd.f32 %v3854_v53, %v3771_v8  ;;  %v3856_v19 = vpop.f32.mrb[29].mxu0  ;;  %v3927_v2 = vpop.f32.mrb[29].mxu1  ;;  %v3926_v11 = vadd.f32 %v3925_v20, %v3779_v44 }
0x1f26   :  { %v3857_v60 = vadd.f32 %v3856_v19, %v3775_v43  ;;  %v3928_v29 = vadd.f32 %v3927_v2, %v3783_v6 }
0x1f27   :  { %v5612_v51 = vmul.f32 -1.442695, %v3855_v31  ;;  %v5614_v50 = vmul.f32 -1.442695, %v3926_v11  ;;  %v4231_v11 = vld [vmem:[#allocation7 + $0x8] sm:$0xff] }
0x1f28   :  { %v5613_v21 = vmul.f32 -1.442695, %v3857_v60 }
0x1f29   :  { %7214 = vpow2.f32 %v5612_v51 }
0x1f2a   :  { %7216 = vpow2.f32 %v5613_v21 }
0x1f2b   :  { %7218 = vtanh.f32 %v3928_v29  ;;  %v4235_v29 = vld [vmem:[#allocation7 + $0x28] sm:$0xff] }
0x1f2c   :  { %7220 = vpow2.f32 %v5614_v50  ;;  %v4233_v50 = vld [vmem:[#allocation7 + $0x18] sm:$0xff] }
0x1f33   :  { %v7215_v45 = vpop.eup %7214 }
0x1f34   :  { %v3939_v63 = vadd.f32 1.0, %v7215_v45  ;;  %v7217_v26 = vpop.eup %7216  ;;  %v8574_v45 = vpack.c.bf16 %v4235_v29, %v4231_v11  ;;  %v4268_v11 = vld [vmem:[#allocation7 + $0x130] sm:$0xff] }
0x1f35   :  { %v3940_v10 = vadd.f32 1.0, %v7217_v26  ;;  %v7219_v47 = vpop.eup %7218  ;;  %v4230_v26 = vld [vmem:[#allocation7] sm:$0xff] }
0x1f36   :  { %7222 = vrcp.f32 %v3939_v63  ;;  %v7221_v55 = vpop.eup %7220  ;;  %v4237_v63 = vld [vmem:[#allocation7 + $0x38] sm:$0xff]  ;;  %6610 = vmatprep.subr.bf16.mxu0 %v8574_v45 }
0x1f37   :  { %7224 = vrcp.f32 %v3940_v10  ;;  %v3941_v7 = vadd.f32 1.0, %v7221_v55  ;;  %v4234_v10 = vld [vmem:[#allocation7 + $0x20] sm:$0xff] }
0x1f38   :  { %v8578_v55 = vpack.c.bf16 %v4234_v10, %v4230_v26 }
0x1f39   :  { %7226 = vrcp.f32 %v3941_v7 }
0x1f40   :  { %v7223_v59 = vpop.eup %7222 }
0x1f41   :  { %v3950_v35 = vmul.f32 %v7223_v59, %v7219_v47  ;;  %v7225_v13 = vpop.eup %7224  ;;  %v8576_v47 = vpack.c.bf16 %v4237_v63, %v4233_v50  ;;  %v4232_v59 = vld [vmem:[#allocation7 + $0x10] sm:$0xff] }
0x1f42   :  { %v3949_v39 = vmul.f32 %v7225_v13, %v8511_v34  ;;  %v4239_v13 = vld [vmem:[#allocation7 + $0x48] sm:$0xff] }
0x1f43   :  { %v7227_v9 = vpop.eup %7226  ;;  %6642 = vmatprep.subr.bf16.mxu1 %v8576_v47 }
0x1f44   :  { %v3951_v30 = vadd.f32 %v3950_v35, %v3949_v39  ;;  %v4236_v35 = vld [vmem:[#allocation7 + $0x30] sm:$0xff]  ;;  %v4243_v39 = vld [vmem:[#allocation7 + $0x68] sm:$0xff] }
0x1f45   :  { %v8581_v7 = vpack.c.bf16 %v4236_v35, %v4232_v59 }
0x1f46   :  { %7228 = vtanh.f32 %v3951_v30 }
0x1f50   :  { %v7229_v12 = vpop.eup %7228 }
0x1f51   :  { %v3953_v4 = vmul.f32 %v7229_v12, %v7227_v9  ;;  %v4245_v9 = vld [vmem:[#allocation7 + $0x78] sm:$0xff]  ;;  %v8585_v12 = vpack.c.bf16 %v4243_v39, %v4239_v13  ;;  %v4271_v13 = vld [vmem:[#allocation7 + $0x148] sm:$0xff] }
0x1f52   :  { %v4275_v39 = vld [vmem:[#allocation7 + $0x168] sm:$0xff] }
0x1f53   :  { %v3954_v16 = vsel %vm521_vm1, %v3953_v4, -inf }
0x1f54   :  { %3955 = vmax.xlane.f32.xlu0 %v3954_v16  ;;  %v4238_v16 = vld [vmem:[#allocation7 + $0x40] sm:$0xff] }
0x1fe1   :  { %v3956_v62 = vpop.xlane.xlu0 %3955 }
0x1fe2   :  { %v3957_v33 = vsub.f32 %v3953_v4, %v3956_v62  ;;  %v4242_v62 = vld [vmem:[#allocation7 + $0x60] sm:$0xff] }
0x1fe4   :  { %v3958_v58 = vmul.f32 1.442695, %v3957_v33  ;;  %v4240_v33 = vld [vmem:[#allocation7 + $0x50] sm:$0xff] }
0x1fe6   :  { %7230 = vpow2.f32 %v3958_v58  ;;  %v8590_v58 = vpack.c.bf16 %v4242_v62, %v4238_v16  ;;  %v4277_v16 = vld [vmem:[#allocation7 + $0x178] sm:$0xff]  ;;  %v4270_v62 = vld [vmem:[#allocation7 + $0x140] sm:$0xff] }
0x1ff0   :  { %v7231_v49 = vpop.eup %7230 }
0x1ff1   :  { %v3960_v27 = vsel %vm521_vm1, %v7231_v49, 0.0 }
0x1ff2   :  { %3961 = vadd.xlane.f32.xlu1 %v3960_v27  ;;  %v4247_v27 = vld [vmem:[#allocation7 + $0x88] sm:$0xff] }
0x207f   :  { %v3962_v42 = vpop.xlane.xlu1 %3961 }
0x2080   :  { %7232 = vrcp.f32 %v3962_v42  ;;  %v4251_v42 = vld [vmem:[#allocation7 + $0xa8] sm:$0xff] }
0x208a   :  { %v7233_v56 = vpop.eup %7232 }
0x208b   :  { %v3964_v14 = vmul.f32 %v7233_v56, %v7231_v49  ;;  %v4244_v49 = vld [vmem:[#allocation7 + $0x70] sm:$0xff] }
0x208c   :  { %v8594_v56 = vpack.c.bf16 %v4244_v49, %v4240_v33  ;;  %v4274_v33 = vld [vmem:[#allocation7 + $0x160] sm:$0xff] }
0x208d   :  { %3965 = vst [vmem:[#allocation8 + $0xd] sm:$0x1] %v3964_v14  ;;  %4117 = vmatmul.mubr.f32.vlgmr.msra.gmra.mrb[30].mxu0 %v3964_v14  ;;  %4188 = vmatmul.mubr.f32.vlgmr.msra.gmra.mrb[30].mxu1 %v3964_v14  ;;  %v8596_v14 = vpack.c.bf16 %v4251_v42, %v4247_v27  ;;  %v8640_v27 = vpack.c.bf16 %v4274_v33, %v4270_v62  ;;  %v4272_v42 = vld [vmem:[#allocation7 + $0x150] sm:$0xff] }
0x208e   :  { %4380 = vmatprep.mubr.f32.mxu0 %v7453_v0  ;;  %4451 = vmatprep.mubr.f32.mxu1 %v7453_v0 }
0x208f   :  { %6612 = vmatpush1.bf16.msra.mxu0 %v8578_v55  ;;  %6644 = vmatpush1.bf16.msra.mxu1 %v8581_v7 }
0x2090   :  { %6614 = vmatprep.subr.bf16.mxu0 %v8585_v12 }
0x2093   :  { %6616 = vmatpush1.bf16.msra.mxu0 %v8590_v58 }
0x2094   :  { %6618 = vmatprep.subr.bf16.mxu0 %v8596_v14 }
0x2160   :  { %v4118_v36 = vpop.f32.mrb[30].mxu0  ;;  %v4189_v61 = vpop.f32.mrb[30].mxu1 }
0x2161   :  { %v4119_v57 = vadd.f32 %v4118_v36, %v4035_v38  ;;  %v4120_v34 = vpop.f32.mrb[31].mxu0  ;;  %v4191_v37 = vpop.f32.mrb[31].mxu1  ;;  %v4190_v25 = vadd.f32 %v4189_v61, %v4043_v28  ;;  %v4253_v38 = vld [vmem:[#allocation7 + $0xb8] sm:$0xff]  ;;  %v4250_v61 = vld [vmem:[#allocation7 + $0xa0] sm:$0xff] }
0x2162   :  { %v4121_v54 = vadd.f32 %v4120_v34, %v4039_v41  ;;  %v4192_v22 = vadd.f32 %v4191_v37, %v4047_v52  ;;  %v4246_v41 = vld [vmem:[#allocation7 + $0x80] sm:$0xff]  ;;  %v8598_v36 = vpack.c.bf16 %v4253_v38, %v4249_v18  ;;  %v4252_v34 = vld [vmem:[#allocation7 + $0xb0] sm:$0xff]  ;;  %v4279_v18 = vld [vmem:[#allocation7 + $0x188] sm:$0xff] }
0x2163   :  { %v5615_v48 = vmul.f32 -1.442695, %v4119_v57  ;;  %v5617_v1 = vmul.f32 -1.442695, %v4190_v25  ;;  %v4248_v57 = vld [vmem:[#allocation7 + $0x90] sm:$0xff]  ;;  %v8601_v37 = vpack.c.bf16 %v4250_v61, %v4246_v41  ;;  %v4261_v25 = vld [vmem:[#allocation7 + $0xf8] sm:$0xff] }
0x2164   :  { %v5616_v32 = vmul.f32 -1.442695, %v4121_v54  ;;  %v4255_v54 = vld [vmem:[#allocation7 + $0xc8] sm:$0xff]  ;;  %v8605_v28 = vpack.c.bf16 %v4252_v34, %v4248_v57  ;;  %v4281_v61 = vld [vmem:[#allocation7 + $0x198] sm:$0xff] }
0x2165   :  { %7234 = vpow2.f32 %v5615_v48  ;;  %v4259_v48 = vld [vmem:[#allocation7 + $0xe8] sm:$0xff]  ;;  %6620 = vmatpush1.bf16.msra.mxu0 %v8601_v37  ;;  %v4285_v57 = vld [vmem:[#allocation7 + $0x1b8] sm:$0xff] }
0x2166   :  { %7236 = vpow2.f32 %v5616_v32  ;;  %v4257_v32 = vld [vmem:[#allocation7 + $0xd8] sm:$0xff]  ;;  %v8607_v52 = vpack.c.bf16 %v4259_v48, %v4255_v54  ;;  %v4283_v41 = vld [vmem:[#allocation7 + $0x1a8] sm:$0xff]  ;;  %v8649_v54 = vpack.c.bf16 %v4285_v57, %v4281_v61  ;;  %v4278_v48 = vld [vmem:[#allocation7 + $0x180] sm:$0xff] }
0x2167   :  { %7238 = vtanh.f32 %v4192_v22  ;;  %v4254_v22 = vld [vmem:[#allocation7 + $0xc0] sm:$0xff]  ;;  %v8647_v34 = vpack.c.bf16 %v4283_v41, %v4279_v18 }
0x2168   :  { %7240 = vpow2.f32 %v5617_v1  ;;  %v4258_v1 = vld [vmem:[#allocation7 + $0xe0] sm:$0xff]  ;;  %6622 = vmatprep.subr.bf16.mxu0 %v8607_v52 }
0x216f   :  { %v7235_v24 = vpop.eup %7234 }
0x2170   :  { %v4203_v3 = vadd.f32 1.0, %v7235_v24  ;;  %v7237_v5 = vpop.eup %7236  ;;  %v8610_v24 = vpack.c.bf16 %v4261_v25, %v4257_v32  ;;  %v4282_v32 = vld [vmem:[#allocation7 + $0x1a0] sm:$0xff]  ;;  %v4280_v25 = vld [vmem:[#allocation7 + $0x190] sm:$0xff] }
0x2171   :  { %v4204_v46 = vadd.f32 1.0, %v7237_v5  ;;  %v7239_v8 = vpop.eup %7238  ;;  %v4260_v5 = vld [vmem:[#allocation7 + $0xf0] sm:$0xff] }
0x2172   :  { %7242 = vrcp.f32 %v4203_v3  ;;  %v7241_v43 = vpop.eup %7240  ;;  %v4256_v3 = vld [vmem:[#allocation7 + $0xd0] sm:$0xff] }
0x2173   :  { %7244 = vrcp.f32 %v4204_v46  ;;  %v4205_v19 = vadd.f32 1.0, %v7241_v43  ;;  %v4263_v46 = vld [vmem:[#allocation7 + $0x108] sm:$0xff]  ;;  %v4265_v43 = vld [vmem:[#allocation7 + $0x118] sm:$0xff] }
0x2175   :  { %7246 = vrcp.f32 %v4205_v19 }
0x217c   :  { %v7243_v53 = vpop.eup %7242 }
0x217d   :  { %v4214_v20 = vmul.f32 %v7243_v53, %v7239_v8  ;;  %v7245_v31 = vpop.eup %7244  ;;  %v4267_v8 = vld [vmem:[#allocation7 + $0x128] sm:$0xff]  ;;  %v4269_v53 = vld [vmem:[#allocation7 + $0x138] sm:$0xff] }
0x217e   :  { %v4213_v2 = vmul.f32 %v7245_v31, %v3951_v30  ;;  %v4241_v30 = vld [vmem:[#allocation7 + $0x58] sm:$0xff]  ;;  %v8617_v31 = vpack.c.bf16 %v4260_v5, %v4256_v3  ;;  %v8619_v19 = vpack.c.bf16 %v4267_v8, %v4263_v46  ;;  %v4287_v3 = vld [vmem:[#allocation7 + $0x1c8] sm:$0xff] }
0x217f   :  { %v7247_v51 = vpop.eup %7246  ;;  %v8587_v4 = vpack.c.bf16 %v4245_v9, %v4241_v30  ;;  %v4273_v30 = vld [vmem:[#allocation7 + $0x158] sm:$0xff]  ;;  %v8636_v9 = vpack.c.bf16 %v4275_v39, %v4271_v13  ;;  %v4291_v5 = vld [vmem:[#allocation7 + $0x1e8] sm:$0xff] }
0x2180   :  { %v8567_v60 = vadd.f32 %v4214_v20, %v4213_v2  ;;  %v8613_v20 = vpack.c.bf16 %v4258_v1, %v4254_v22  ;;  %v4262_v2 = vld [vmem:[#allocation7 + $0x100] sm:$0xff]  ;;  %v8638_v49 = vpack.c.bf16 %v4277_v16, %v4273_v30  ;;  %v8652_v22 = vpack.c.bf16 %v4282_v32, %v4278_v48  ;;  %v4284_v1 = vld [vmem:[#allocation7 + $0x1b0] sm:$0xff] }
0x2181   :  { %6646 = vmatprep.subr.bf16.mxu1 %v8587_v4  ;;  %v8656_v46 = vpack.c.bf16 %v4284_v1, %v4280_v25  ;;  %v8658_v8 = vpack.c.bf16 %v4291_v5, %v4287_v3 }
0x2182   :  { %7248 = vtanh.f32 %v8567_v60  ;;  %6648 = vmatpush1.bf16.msra.mxu1 %v8594_v56  ;;  %6624 = vmatpush1.bf16.msra.mxu0 %v8613_v20 }
0x2183   :  { %6650 = vmatprep.subr.bf16.mxu1 %v8598_v36  ;;  %6626 = vmatprep.subr.bf16.mxu0 %v8619_v19 }
0x2186   :  { %6652 = vmatpush1.bf16.msra.mxu1 %v8605_v28 }
0x2187   :  { %6654 = vmatprep.subr.bf16.mxu1 %v8610_v24 }
0x218a   :  { %6656 = vmatpush1.bf16.msra.mxu1 %v8617_v31 }
0x218c   :  { %v7249_v21 = vpop.eup %7248 }
0x218d   :  { %v8570_v44 = vmul.f32 %v7249_v21, %v7247_v51  ;;  %v4266_v51 = vld [vmem:[#allocation7 + $0x120] sm:$0xff]  ;;  %v8622_v21 = vpack.c.bf16 %v4269_v53, %v4265_v43  ;;  %v4289_v43 = vld [vmem:[#allocation7 + $0x1d8] sm:$0xff] }
0x218e   :  { %v8625_v29 = vpack.c.bf16 %v4266_v51, %v4262_v2  ;;  %v4293_v53 = vld [vmem:[#allocation7 + $0x1f8] sm:$0xff]  ;;  %v4286_v2 = vld [vmem:[#allocation7 + $0x1c0] sm:$0xff] }
0x218f   :  { %v4218_v6 = vsel %vm521_vm1, %v8570_v44, -inf  ;;  %6658 = vmatprep.subr.bf16.mxu1 %v8622_v21  ;;  %v8660_v51 = vpack.c.bf16 %v4293_v53, %v4289_v43 }
0x2190   :  { %4219 = vmax.xlane.f32.xlu0 %v4218_v6  ;;  %v4264_v6 = vld [vmem:[#allocation7 + $0x110] sm:$0xff]  ;;  %6628 = vmatpush1.bf16.msra.mxu0 %v8625_v29 }
0x2191   :  { %v8629_v50 = vpack.c.bf16 %v4268_v11, %v4264_v6  ;;  %6630 = vmatprep.subr.bf16.mxu0 %v8636_v9  ;;  %v4290_v6 = vld [vmem:[#allocation7 + $0x1e0] sm:$0xff]  ;;  %v4288_v11 = vld [vmem:[#allocation7 + $0x1d0] sm:$0xff] }
0x2193   :  { %6660 = vmatpush1.bf16.msra.mxu1 %v8629_v50 }
0x2194   :  { %6662 = vmatprep.subr.bf16.mxu1 %v8638_v49  ;;  %6632 = vmatpush1.bf16.msra.mxu0 %v8640_v27 }
0x2195   :  { %6634 = vmatprep.subr.bf16.mxu0 %v8647_v34 }
0x2198   :  { %6636 = vmatpush1.bf16.msra.mxu0 %v8652_v22 }
0x2199   :  { %6638 = vmatprep.subr.bf16.mxu0 %v8658_v8 }
0x221d   :  { %v4220_v63 = vpop.xlane.xlu0 %4219 }
0x221e   :  { %v4221_v26 = vsub.f32 %v8570_v44, %v4220_v63  ;;  %v4276_v44 = vld [vmem:[#allocation7 + $0x170] sm:$0xff] }
0x221f   :  { %v8643_v38 = vpack.c.bf16 %v4276_v44, %v4272_v42  ;;  %v4292_v63 = vld [vmem:[#allocation7 + $0x1f0] sm:$0xff] }
0x2220   :  { %v4222_v10 = vmul.f32 1.442695, %v4221_v26  ;;  %v8663_v26 = vpack.c.bf16 %v4290_v6, %v4286_v2 }
0x2221   :  { %6664 = vmatpush1.bf16.msra.mxu1 %v8643_v38 }
0x2222   :  { %7250 = vpow2.f32 %v4222_v10  ;;  %6666 = vmatprep.subr.bf16.mxu1 %v8649_v54  ;;  %v8667_v10 = vpack.c.bf16 %v4292_v63, %v4288_v11  ;;  %6640 = vmatpush1.bf16.msra.mxu0 %v8663_v26 }
0x2223   :  { %6674 = vmatprep.subr.bf16.mxu0 %v8574_v45 }
0x2225   :  { %6668 = vmatpush1.bf16.msra.mxu1 %v8656_v46 }
0x2226   :  { %6670 = vmatprep.subr.bf16.mxu1 %v8660_v51 }
0x2229   :  { %6672 = vmatpush1.bf16.msra.mxu1 %v8667_v10 }
0x222a   :  { %6706 = vmatprep.subr.bf16.mxu1 %v8576_v47 }
0x222c   :  { %v7251_v59 = vpop.eup %7250 }
0x222d   :  { %v4224_v35 = vsel %vm521_vm1, %v7251_v59, 0.0 }
0x222e   :  { %4225 = vadd.xlane.f32.xlu1 %v4224_v35 }
0x22bb   :  { %v4226_v35 = vpop.xlane.xlu1 %4225 }
0x22bc   :  { %7252 = vrcp.f32 %v4226_v35 }
0x22c6   :  { %v7253_v13 = vpop.eup %7252 }
0x22c7   :  { %v4228_v39 = vmul.f32 %v7253_v13, %v7251_v59  ;;  %v4294_v59 = vld [vmem:[%s8914_s4] sm:$0xf] }
0x22c8   :  { %v4299_v30 = vrot.slane %v4294_v59, %v7631_v15  ;;  %v4303_v16 = vrot.slane %v4294_v59, %v7636_v17 }
0x22c9   :  { %4229 = vst [vmem:[#allocation8 + $0xe] sm:$0x1] %v4228_v39  ;;  %4381 = vmatmul.mubr.f32.vlgmr.msra.gmra.mrb[32].mxu0 %v4228_v39  ;;  %4452 = vmatmul.mubr.f32.vlgmr.msra.gmra.mrb[32].mxu1 %v4228_v39 }
0x22ca   :  { %6676 = vmatpush1.bf16.msra.mxu0 %v8578_v55  ;;  %6708 = vmatpush1.bf16.msra.mxu1 %v8581_v7 }
0x22cb   :  { %6678 = vmatprep.subr.bf16.mxu0 %v8585_v12  ;;  %6710 = vmatprep.subr.bf16.mxu1 %v8587_v4 }
0x22cc   :  { %4644 = vmatprep.mubr.f32.mxu0 %v7453_v0  ;;  %4715 = vmatprep.mubr.f32.mxu1 %v7453_v0 }
0x22ce   :  { %6680 = vmatpush1.bf16.msra.mxu0 %v8590_v58  ;;  %6712 = vmatpush1.bf16.msra.mxu1 %v8594_v56 }
0x22cf   :  { %6682 = vmatprep.subr.bf16.mxu0 %v8596_v14  ;;  %6714 = vmatprep.subr.bf16.mxu1 %v8598_v36 }
0x22d2   :  { %6684 = vmatpush1.bf16.msra.mxu0 %v8601_v37  ;;  %6716 = vmatpush1.bf16.msra.mxu1 %v8605_v28 }
0x22d3   :  { %6686 = vmatprep.subr.bf16.mxu0 %v8607_v52  ;;  %6718 = vmatprep.subr.bf16.mxu1 %v8610_v24 }
0x22d6   :  { %6688 = vmatpush1.bf16.msra.mxu0 %v8613_v20  ;;  %6720 = vmatpush1.bf16.msra.mxu1 %v8617_v31 }
0x22d7   :  { %6690 = vmatprep.subr.bf16.mxu0 %v8619_v19  ;;  %6722 = vmatprep.subr.bf16.mxu1 %v8622_v21 }
0x22da   :  { %6692 = vmatpush1.bf16.msra.mxu0 %v8625_v29  ;;  %6724 = vmatpush1.bf16.msra.mxu1 %v8629_v50 }
0x22db   :  { %6694 = vmatprep.subr.bf16.mxu0 %v8636_v9  ;;  %6726 = vmatprep.subr.bf16.mxu1 %v8638_v49 }
0x22de   :  { %6696 = vmatpush1.bf16.msra.mxu0 %v8640_v27  ;;  %6728 = vmatpush1.bf16.msra.mxu1 %v8643_v38 }
0x22df   :  { %6698 = vmatprep.subr.bf16.mxu0 %v8647_v34  ;;  %6730 = vmatprep.subr.bf16.mxu1 %v8649_v54 }
0x22e2   :  { %6700 = vmatpush1.bf16.msra.mxu0 %v8652_v22  ;;  %6732 = vmatpush1.bf16.msra.mxu1 %v8656_v46 }
0x22e3   :  { %6702 = vmatprep.subr.bf16.mxu0 %v8658_v8  ;;  %6734 = vmatprep.subr.bf16.mxu1 %v8660_v51 }
0x22e6   :  { %6704 = vmatpush1.bf16.msra.mxu0 %v8663_v26  ;;  %6736 = vmatpush1.bf16.msra.mxu1 %v8667_v10 }
0x22e7   :  { %6738 = vmatprep.subr.bf16.mxu0 %v8574_v45  ;;  %6770 = vmatprep.subr.bf16.mxu1 %v8576_v47  ;;  %v4307_v45 = vrot.slane %v4294_v59, %v7640_v23  ;;  %v4311_v47 = vrot.slane %v4294_v59, %v7643_v40 }
0x239c   :  { %v4382_v62 = vpop.f32.mrb[32].mxu0  ;;  %v4453_v33 = vpop.f32.mrb[32].mxu1 }
0x239d   :  { %v4383_v42 = vadd.f32 %v4382_v62, %v4299_v30  ;;  %v4384_v44 = vpop.f32.mrb[33].mxu0  ;;  %v4455_v18 = vpop.f32.mrb[33].mxu1  ;;  %v4454_v48 = vadd.f32 %v4453_v33, %v4307_v45 }
0x239e   :  { %v4385_v41 = vadd.f32 %v4384_v44, %v4303_v16  ;;  %v4456_v32 = vadd.f32 %v4455_v18, %v4311_v47 }
0x239f   :  { %v5618_v61 = vmul.f32 -1.442695, %v4383_v42  ;;  %v5620_v25 = vmul.f32 -1.442695, %v4454_v48 }
0x23a0   :  { %v5619_v57 = vmul.f32 -1.442695, %v4385_v41 }
0x23a1   :  { %7254 = vpow2.f32 %v5618_v61 }
0x23a2   :  { %7256 = vpow2.f32 %v5619_v57 }
0x23a3   :  { %7258 = vtanh.f32 %v4456_v32 }
0x23a4   :  { %7260 = vpow2.f32 %v5620_v25 }
0x23ab   :  { %v7255_v1 = vpop.eup %7254 }
0x23ac   :  { %v4467_v3 = vadd.f32 1.0, %v7255_v1  ;;  %v7257_v5 = vpop.eup %7256 }
0x23ad   :  { %v4468_v43 = vadd.f32 1.0, %v7257_v5  ;;  %v7259_v53 = vpop.eup %7258 }
0x23ae   :  { %7262 = vrcp.f32 %v4467_v3  ;;  %v7261_v2 = vpop.eup %7260 }
0x23af   :  { %7264 = vrcp.f32 %v4468_v43  ;;  %v4469_v35 = vadd.f32 1.0, %v7261_v2  ;;  %v4822_v2 = vld [vmem:[%s8914_s4] sm:$0xf] }
0x23b1   :  { %7266 = vrcp.f32 %v4469_v35 }
0x23b8   :  { %v7263_v6 = vpop.eup %7262 }
0x23b9   :  { %v4478_v11 = vmul.f32 %v7263_v6, %v7259_v53  ;;  %v7265_v63 = vpop.eup %7264  ;;  %v4827_v6 = vrot.slane %v4822_v2, %v7631_v15 }
0x23ba   :  { %v4477_v13 = vmul.f32 %v7265_v63, %v8567_v60 }
0x23bb   :  { %v7267_v59 = vpop.eup %7266 }
0x23bc   :  { %v8716_v39 = vadd.f32 %v4478_v11, %v4477_v13  ;;  %v4831_v11 = vrot.slane %v4822_v2, %v7636_v17 }
0x23be   :  { %7268 = vtanh.f32 %v8716_v39 }
0x23c8   :  { %v7269_v30 = vpop.eup %7268 }
0x23c9   :  { %v4481_v16 = vmul.f32 %v7269_v30, %v7267_v59 }
0x23cb   :  { %v4482_v62 = vsel %vm521_vm1, %v4481_v16, -inf }
0x23cc   :  { %4483 = vmax.xlane.f32.xlu0 %v4482_v62 }
0x2459   :  { %v4484_v33 = vpop.xlane.xlu0 %4483 }
0x245a   :  { %v4485_v42 = vsub.f32 %v4481_v16, %v4484_v33  ;;  %v4835_v33 = vrot.slane %v4822_v2, %v7640_v23 }
0x245c   :  { %v4486_v44 = vmul.f32 1.442695, %v4485_v42  ;;  %v4839_v42 = vrot.slane %v4822_v2, %v7643_v40  ;;  %v5041_v2 = vld [vmem:[#allocation7 + $0x98] sm:$0xff] }
0x245e   :  { %7270 = vpow2.f32 %v4486_v44 }
0x2468   :  { %v7271_v18 = vpop.eup %7270 }
0x2469   :  { %v4488_v41 = vsel %vm521_vm1, %v7271_v18, 0.0 }
0x246a   :  { %4489 = vadd.xlane.f32.xlu1 %v4488_v41 }
0x24f7   :  { %v4490_v60 = vpop.xlane.xlu1 %4489 }
0x24f8   :  { %7272 = vrcp.f32 %v4490_v60 }
0x2502   :  { %v7273_v61 = vpop.eup %7272 }
0x2503   :  { %v4492_v57 = vmul.f32 %v7273_v61, %v7271_v18 }
0x2505   :  { %4493 = vst [vmem:[#allocation8 + $0xf] sm:$0x1] %v4492_v57  ;;  %4645 = vmatmul.mubr.f32.vlgmr.msra.gmra.mrb[34].mxu0 %v4492_v57  ;;  %4716 = vmatmul.mubr.f32.vlgmr.msra.gmra.mrb[34].mxu1 %v4492_v57 }
0x2506   :  { %6740 = vmatpush1.bf16.msra.mxu0 %v8578_v55  ;;  %6772 = vmatpush1.bf16.msra.mxu1 %v8581_v7  ;;  %v4558_v55 = vld [vmem:[%s8914_s4] sm:$0xf] }
0x2507   :  { %6742 = vmatprep.subr.bf16.mxu0 %v8585_v12  ;;  %6774 = vmatprep.subr.bf16.mxu1 %v8587_v4  ;;  %v4563_v7 = vrot.slane %v4558_v55, %v7631_v15  ;;  %v4567_v12 = vrot.slane %v4558_v55, %v7636_v17 }
0x2508   :  { %4908 = vmatprep.mubr.f32.mxu0 %v7453_v0  ;;  %4979 = vmatprep.mubr.f32.mxu1 %v7453_v0 }
0x250a   :  { %6744 = vmatpush1.bf16.msra.mxu0 %v8590_v58  ;;  %6776 = vmatpush1.bf16.msra.mxu1 %v8594_v56 }
0x250b   :  { %6746 = vmatprep.subr.bf16.mxu0 %v8596_v14  ;;  %6778 = vmatprep.subr.bf16.mxu1 %v8598_v36 }
0x250e   :  { %6748 = vmatpush1.bf16.msra.mxu0 %v8601_v37  ;;  %6780 = vmatpush1.bf16.msra.mxu1 %v8605_v28 }
0x250f   :  { %6750 = vmatprep.subr.bf16.mxu0 %v8607_v52  ;;  %6782 = vmatprep.subr.bf16.mxu1 %v8610_v24  ;;  %v4571_v24 = vrot.slane %v4558_v55, %v7640_v23 }
0x2512   :  { %6752 = vmatpush1.bf16.msra.mxu0 %v8613_v20  ;;  %6784 = vmatpush1.bf16.msra.mxu1 %v8617_v31  ;;  %v4575_v20 = vrot.slane %v4558_v55, %v7643_v40 }
0x2513   :  { %6754 = vmatprep.subr.bf16.mxu0 %v8619_v19  ;;  %6786 = vmatprep.subr.bf16.mxu1 %v8622_v21 }
0x2516   :  { %6756 = vmatpush1.bf16.msra.mxu0 %v8625_v29  ;;  %6788 = vmatpush1.bf16.msra.mxu1 %v8629_v50 }
0x2517   :  { %6758 = vmatprep.subr.bf16.mxu0 %v8636_v9  ;;  %6790 = vmatprep.subr.bf16.mxu1 %v8638_v49 }
0x251a   :  { %6760 = vmatpush1.bf16.msra.mxu0 %v8640_v27  ;;  %6792 = vmatpush1.bf16.msra.mxu1 %v8643_v38 }
0x251b   :  { %6762 = vmatprep.subr.bf16.mxu0 %v8647_v34  ;;  %6794 = vmatprep.subr.bf16.mxu1 %v8649_v54 }
0x251e   :  { %6764 = vmatpush1.bf16.msra.mxu0 %v8652_v22  ;;  %6796 = vmatpush1.bf16.msra.mxu1 %v8656_v46 }
0x251f   :  { %6766 = vmatprep.subr.bf16.mxu0 %v8658_v8  ;;  %6798 = vmatprep.subr.bf16.mxu1 %v8660_v51 }
0x2522   :  { %6768 = vmatpush1.bf16.msra.mxu0 %v8663_v26  ;;  %6800 = vmatpush1.bf16.msra.mxu1 %v8667_v10 }
0x25d8   :  { %v4646_v4 = vpop.f32.mrb[34].mxu0  ;;  %v4717_v58 = vpop.f32.mrb[34].mxu1 }
0x25d9   :  { %v4647_v56 = vadd.f32 %v4646_v4, %v4563_v7  ;;  %v4648_v14 = vpop.f32.mrb[35].mxu0  ;;  %v4719_v36 = vpop.f32.mrb[35].mxu1  ;;  %v4718_v31 = vadd.f32 %v4717_v58, %v4571_v24 }
0x25da   :  { %v4649_v37 = vadd.f32 %v4648_v14, %v4567_v12  ;;  %v4720_v19 = vadd.f32 %v4719_v36, %v4575_v20 }
0x25db   :  { %v5621_v28 = vmul.f32 -1.442695, %v4647_v56  ;;  %v5623_v21 = vmul.f32 -1.442695, %v4718_v31  ;;  %v5023_v31 = vld [vmem:[#allocation7 + $0x8] sm:$0xff] }
0x25dc   :  { %v5622_v52 = vmul.f32 -1.442695, %v4649_v37 }
0x25dd   :  { %7274 = vpow2.f32 %v5621_v28 }
0x25de   :  { %7276 = vpow2.f32 %v5622_v52 }
0x25df   :  { %7278 = vtanh.f32 %v4720_v19  ;;  %v5027_v19 = vld [vmem:[#allocation7 + $0x28] sm:$0xff] }
0x25e0   :  { %7280 = vpow2.f32 %v5623_v21  ;;  %v5025_v21 = vld [vmem:[#allocation7 + $0x18] sm:$0xff] }
0x25e7   :  { %v7275_v29 = vpop.eup %7274 }
0x25e8   :  { %v4731_v50 = vadd.f32 1.0, %v7275_v29  ;;  %v7277_v9 = vpop.eup %7276  ;;  %v8779_v29 = vpack.c.bf16 %v5027_v19, %v5023_v31  ;;  %v5060_v31 = vld [vmem:[#allocation7 + $0x130] sm:$0xff] }
0x25e9   :  { %v4732_v49 = vadd.f32 1.0, %v7277_v9  ;;  %v7279_v27 = vpop.eup %7278  ;;  %v5022_v9 = vld [vmem:[#allocation7] sm:$0xff] }
0x25ea   :  { %7282 = vrcp.f32 %v4731_v50  ;;  %v7281_v38 = vpop.eup %7280  ;;  %v5029_v50 = vld [vmem:[#allocation7 + $0x38] sm:$0xff]  ;;  %6802 = vmatprep.subr.bf16.mxu0 %v8779_v29 }
0x25eb   :  { %7284 = vrcp.f32 %v4732_v49  ;;  %v4733_v46 = vadd.f32 1.0, %v7281_v38  ;;  %v5026_v49 = vld [vmem:[#allocation7 + $0x20] sm:$0xff] }
0x25ec   :  { %v8783_v38 = vpack.c.bf16 %v5026_v49, %v5022_v9 }
0x25ed   :  { %7286 = vrcp.f32 %v4733_v46 }
0x25f4   :  { %v7283_v34 = vpop.eup %7282 }
0x25f5   :  { %v4742_v54 = vmul.f32 %v7283_v34, %v7279_v27  ;;  %v7285_v22 = vpop.eup %7284  ;;  %v8781_v27 = vpack.c.bf16 %v5029_v50, %v5025_v21  ;;  %v5024_v34 = vld [vmem:[#allocation7 + $0x10] sm:$0xff] }
0x25f6   :  { %v4741_v8 = vmul.f32 %v7285_v22, %v8716_v39  ;;  %v5031_v22 = vld [vmem:[#allocation7 + $0x48] sm:$0xff] }
0x25f7   :  { %v7287_v26 = vpop.eup %7286  ;;  %6834 = vmatprep.subr.bf16.mxu1 %v8781_v27 }
0x25f8   :  { %v4743_v51 = vadd.f32 %v4742_v54, %v4741_v8  ;;  %v5028_v54 = vld [vmem:[#allocation7 + $0x30] sm:$0xff]  ;;  %v5035_v8 = vld [vmem:[#allocation7 + $0x68] sm:$0xff] }
0x25f9   :  { %v8786_v46 = vpack.c.bf16 %v5028_v54, %v5024_v34 }
0x25fa   :  { %7288 = vtanh.f32 %v4743_v51 }
0x2604   :  { %v7289_v10 = vpop.eup %7288 }
0x2605   :  { %v4745_v45 = vmul.f32 %v7289_v10, %v7287_v26  ;;  %v5037_v26 = vld [vmem:[#allocation7 + $0x78] sm:$0xff]  ;;  %v8790_v10 = vpack.c.bf16 %v5035_v8, %v5031_v22  ;;  %v5063_v22 = vld [vmem:[#allocation7 + $0x148] sm:$0xff] }
0x2606   :  { %v5067_v8 = vld [vmem:[#allocation7 + $0x168] sm:$0xff] }
0x2607   :  { %v4746_v47 = vsel %vm521_vm1, %v4745_v45, -inf }
0x2608   :  { %4747 = vmax.xlane.f32.xlu0 %v4746_v47  ;;  %v5030_v47 = vld [vmem:[#allocation7 + $0x40] sm:$0xff] }
0x2695   :  { %v4748_v48 = vpop.xlane.xlu0 %4747 }
0x2696   :  { %v4749_v32 = vsub.f32 %v4745_v45, %v4748_v48  ;;  %v5034_v48 = vld [vmem:[#allocation7 + $0x60] sm:$0xff] }
0x2698   :  { %v4750_v25 = vmul.f32 1.442695, %v4749_v32  ;;  %v5032_v32 = vld [vmem:[#allocation7 + $0x50] sm:$0xff] }
0x269a   :  { %7290 = vpow2.f32 %v4750_v25  ;;  %v8795_v25 = vpack.c.bf16 %v5034_v48, %v5030_v47  ;;  %v5069_v47 = vld [vmem:[#allocation7 + $0x178] sm:$0xff]  ;;  %v5062_v48 = vld [vmem:[#allocation7 + $0x140] sm:$0xff] }
0x26a4   :  { %v7291_v1 = vpop.eup %7290 }
0x26a5   :  { %v4752_v3 = vsel %vm521_vm1, %v7291_v1, 0.0 }
0x26a6   :  { %4753 = vadd.xlane.f32.xlu1 %v4752_v3  ;;  %v5039_v3 = vld [vmem:[#allocation7 + $0x88] sm:$0xff] }
0x2733   :  { %v4754_v5 = vpop.xlane.xlu1 %4753 }
0x2734   :  { %7292 = vrcp.f32 %v4754_v5  ;;  %v5043_v5 = vld [vmem:[#allocation7 + $0xa8] sm:$0xff] }
0x273e   :  { %v7293_v43 = vpop.eup %7292 }
0x273f   :  { %v4756_v53 = vmul.f32 %v7293_v43, %v7291_v1  ;;  %v5036_v1 = vld [vmem:[#allocation7 + $0x70] sm:$0xff] }
0x2740   :  { %v8799_v43 = vpack.c.bf16 %v5036_v1, %v5032_v32  ;;  %v5066_v32 = vld [vmem:[#allocation7 + $0x160] sm:$0xff] }
0x2741   :  { %4757 = vst [vmem:[#allocation8 + $0x10] sm:$0x1] %v4756_v53  ;;  %4909 = vmatmul.mubr.f32.vlgmr.msra.gmra.mrb[36].mxu0 %v4756_v53  ;;  %4980 = vmatmul.mubr.f32.vlgmr.msra.gmra.mrb[36].mxu1 %v4756_v53  ;;  %v8801_v53 = vpack.c.bf16 %v5043_v5, %v5039_v3  ;;  %v8845_v3 = vpack.c.bf16 %v5066_v32, %v5062_v48  ;;  %v5064_v5 = vld [vmem:[#allocation7 + $0x150] sm:$0xff] }
0x2742   :  { %5172 = vmatprep.mubr.f32.mxu0 %v7453_v0  ;;  %5243 = vmatprep.mubr.f32.mxu1 %v7453_v0 }
0x2743   :  { %6804 = vmatpush1.bf16.msra.mxu0 %v8783_v38  ;;  %6836 = vmatpush1.bf16.msra.mxu1 %v8786_v46 }
0x2744   :  { %6806 = vmatprep.subr.bf16.mxu0 %v8790_v10 }
0x2747   :  { %6808 = vmatpush1.bf16.msra.mxu0 %v8795_v25 }
0x2748   :  { %6810 = vmatprep.subr.bf16.mxu0 %v8801_v53 }
0x2814   :  { %v4910_v63 = vpop.f32.mrb[36].mxu0  ;;  %v4981_v35 = vpop.f32.mrb[36].mxu1 }
0x2815   :  { %v4911_v13 = vadd.f32 %v4910_v63, %v4827_v6  ;;  %v4912_v39 = vpop.f32.mrb[37].mxu0  ;;  %v4983_v59 = vpop.f32.mrb[37].mxu1  ;;  %v4982_v44 = vadd.f32 %v4981_v35, %v4835_v33  ;;  %v5045_v6 = vld [vmem:[#allocation7 + $0xb8] sm:$0xff]  ;;  %v5042_v35 = vld [vmem:[#allocation7 + $0xa0] sm:$0xff] }
0x2816   :  { %v4913_v30 = vadd.f32 %v4912_v39, %v4831_v11  ;;  %v4984_v18 = vadd.f32 %v4983_v59, %v4839_v42  ;;  %v5038_v11 = vld [vmem:[#allocation7 + $0x80] sm:$0xff]  ;;  %v8803_v63 = vpack.c.bf16 %v5045_v6, %v5041_v2  ;;  %v5044_v39 = vld [vmem:[#allocation7 + $0xb0] sm:$0xff]  ;;  %v5071_v2 = vld [vmem:[#allocation7 + $0x188] sm:$0xff] }
0x2817   :  { %v5624_v16 = vmul.f32 -1.442695, %v4911_v13  ;;  %v5626_v41 = vmul.f32 -1.442695, %v4982_v44  ;;  %v5040_v13 = vld [vmem:[#allocation7 + $0x90] sm:$0xff]  ;;  %v8806_v59 = vpack.c.bf16 %v5042_v35, %v5038_v11  ;;  %v5053_v44 = vld [vmem:[#allocation7 + $0xf8] sm:$0xff] }
0x2818   :  { %v5625_v62 = vmul.f32 -1.442695, %v4913_v30  ;;  %v5047_v30 = vld [vmem:[#allocation7 + $0xc8] sm:$0xff]  ;;  %v8810_v33 = vpack.c.bf16 %v5044_v39, %v5040_v13  ;;  %v5073_v35 = vld [vmem:[#allocation7 + $0x198] sm:$0xff] }
0x2819   :  { %7294 = vpow2.f32 %v5624_v16  ;;  %v5051_v16 = vld [vmem:[#allocation7 + $0xe8] sm:$0xff]  ;;  %6812 = vmatpush1.bf16.msra.mxu0 %v8806_v59  ;;  %v5077_v13 = vld [vmem:[#allocation7 + $0x1b8] sm:$0xff] }
0x281a   :  { %7296 = vpow2.f32 %v5625_v62  ;;  %v5049_v62 = vld [vmem:[#allocation7 + $0xd8] sm:$0xff]  ;;  %v8812_v42 = vpack.c.bf16 %v5051_v16, %v5047_v30  ;;  %v5075_v11 = vld [vmem:[#allocation7 + $0x1a8] sm:$0xff]  ;;  %v6857_v30 = vpack.c.bf16 %v5077_v13, %v5073_v35  ;;  %v5070_v16 = vld [vmem:[#allocation7 + $0x180] sm:$0xff] }
0x281b   :  { %7298 = vtanh.f32 %v4984_v18  ;;  %v5046_v18 = vld [vmem:[#allocation7 + $0xc0] sm:$0xff]  ;;  %v6825_v39 = vpack.c.bf16 %v5075_v11, %v5071_v2 }
0x281c   :  { %7300 = vpow2.f32 %v5626_v41  ;;  %v5050_v41 = vld [vmem:[#allocation7 + $0xe0] sm:$0xff]  ;;  %6814 = vmatprep.subr.bf16.mxu0 %v8812_v42 }
0x2823   :  { %v7295_v60 = vpop.eup %7294 }
0x2824   :  { %v4995_v61 = vadd.f32 1.0, %v7295_v60  ;;  %v7297_v57 = vpop.eup %7296  ;;  %v8815_v60 = vpack.c.bf16 %v5053_v44, %v5049_v62  ;;  %v5074_v62 = vld [vmem:[#allocation7 + $0x1a0] sm:$0xff]  ;;  %v5072_v44 = vld [vmem:[#allocation7 + $0x190] sm:$0xff] }
0x2825   :  { %v4996_v55 = vadd.f32 1.0, %v7297_v57  ;;  %v7299_v7 = vpop.eup %7298  ;;  %v5052_v57 = vld [vmem:[#allocation7 + $0xf0] sm:$0xff] }
0x2826   :  { %7302 = vrcp.f32 %v4995_v61  ;;  %v7301_v12 = vpop.eup %7300  ;;  %v5048_v61 = vld [vmem:[#allocation7 + $0xd0] sm:$0xff] }
0x2827   :  { %7304 = vrcp.f32 %v4996_v55  ;;  %v4997_v14 = vadd.f32 1.0, %v7301_v12  ;;  %v5055_v55 = vld [vmem:[#allocation7 + $0x108] sm:$0xff]  ;;  %v5057_v12 = vld [vmem:[#allocation7 + $0x118] sm:$0xff] }
0x2829   :  { %7306 = vrcp.f32 %v4997_v14 }
0x2830   :  { %v7303_v4 = vpop.eup %7302 }
0x2831   :  { %v5006_v58 = vmul.f32 %v7303_v4, %v7299_v7  ;;  %v7305_v56 = vpop.eup %7304  ;;  %v5059_v7 = vld [vmem:[#allocation7 + $0x128] sm:$0xff]  ;;  %v5061_v4 = vld [vmem:[#allocation7 + $0x138] sm:$0xff] }
0x2832   :  { %v5005_v36 = vmul.f32 %v7305_v56, %v4743_v51  ;;  %v5033_v51 = vld [vmem:[#allocation7 + $0x58] sm:$0xff]  ;;  %v8822_v56 = vpack.c.bf16 %v5052_v57, %v5048_v61  ;;  %v8824_v14 = vpack.c.bf16 %v5059_v7, %v5055_v55  ;;  %v5079_v61 = vld [vmem:[#allocation7 + $0x1c8] sm:$0xff] }
0x2833   :  { %v7307_v28 = vpop.eup %7306  ;;  %v8792_v45 = vpack.c.bf16 %v5037_v26, %v5033_v51  ;;  %v5065_v51 = vld [vmem:[#allocation7 + $0x158] sm:$0xff]  ;;  %v8841_v26 = vpack.c.bf16 %v5067_v8, %v5063_v22  ;;  %v5083_v57 = vld [vmem:[#allocation7 + $0x1e8] sm:$0xff] }
0x2834   :  { %v8772_v37 = vadd.f32 %v5006_v58, %v5005_v36  ;;  %v8818_v58 = vpack.c.bf16 %v5050_v41, %v5046_v18  ;;  %v5054_v36 = vld [vmem:[#allocation7 + $0x100] sm:$0xff]  ;;  %v8843_v1 = vpack.c.bf16 %v5069_v47, %v5065_v51  ;;  %v6827_v18 = vpack.c.bf16 %v5074_v62, %v5070_v16  ;;  %v5076_v41 = vld [vmem:[#allocation7 + $0x1b0] sm:$0xff] }
0x2835   :  { %6838 = vmatprep.subr.bf16.mxu1 %v8792_v45  ;;  %v6859_v55 = vpack.c.bf16 %v5076_v41, %v5072_v44  ;;  %v6829_v7 = vpack.c.bf16 %v5083_v57, %v5079_v61  ;;  %v5350_v62 = vld [vmem:[%s8914_s4] sm:$0xf] }
0x2836   :  { %7308 = vtanh.f32 %v8772_v37  ;;  %6840 = vmatpush1.bf16.msra.mxu1 %v8799_v43  ;;  %6816 = vmatpush1.bf16.msra.mxu0 %v8818_v58  ;;  %v5355_v44 = vrot.slane %v5350_v62, %v7631_v15 }
0x2837   :  { %6842 = vmatprep.subr.bf16.mxu1 %v8803_v63  ;;  %6818 = vmatprep.subr.bf16.mxu0 %v8824_v14 }
0x283a   :  { %6844 = vmatpush1.bf16.msra.mxu1 %v8810_v33 }
0x283b   :  { %6846 = vmatprep.subr.bf16.mxu1 %v8815_v60 }
0x283e   :  { %6848 = vmatpush1.bf16.msra.mxu1 %v8822_v56 }
0x2840   :  { %v7309_v52 = vpop.eup %7308 }
0x2841   :  { %v8775_v24 = vmul.f32 %v7309_v52, %v7307_v28  ;;  %v5058_v28 = vld [vmem:[#allocation7 + $0x120] sm:$0xff]  ;;  %v8827_v52 = vpack.c.bf16 %v5061_v4, %v5057_v12  ;;  %v5081_v12 = vld [vmem:[#allocation7 + $0x1d8] sm:$0xff] }
0x2842   :  { %v8830_v19 = vpack.c.bf16 %v5058_v28, %v5054_v36  ;;  %v5085_v4 = vld [vmem:[#allocation7 + $0x1f8] sm:$0xff]  ;;  %v5078_v36 = vld [vmem:[#allocation7 + $0x1c0] sm:$0xff] }
0x2843   :  { %v5010_v20 = vsel %vm521_vm1, %v8775_v24, -inf  ;;  %6850 = vmatprep.subr.bf16.mxu1 %v8827_v52  ;;  %v6861_v28 = vpack.c.bf16 %v5085_v4, %v5081_v12 }
0x2844   :  { %5011 = vmax.xlane.f32.xlu0 %v5010_v20  ;;  %v5056_v20 = vld [vmem:[#allocation7 + $0x110] sm:$0xff]  ;;  %6820 = vmatpush1.bf16.msra.mxu0 %v8830_v19 }
0x2845   :  { %v8834_v21 = vpack.c.bf16 %v5060_v31, %v5056_v20  ;;  %6822 = vmatprep.subr.bf16.mxu0 %v8841_v26  ;;  %v5082_v20 = vld [vmem:[#allocation7 + $0x1e0] sm:$0xff]  ;;  %v5080_v31 = vld [vmem:[#allocation7 + $0x1d0] sm:$0xff] }
0x2847   :  { %6852 = vmatpush1.bf16.msra.mxu1 %v8834_v21 }
0x2848   :  { %6854 = vmatprep.subr.bf16.mxu1 %v8843_v1  ;;  %6824 = vmatpush1.bf16.msra.mxu0 %v8845_v3 }
0x2849   :  { %6826 = vmatprep.subr.bf16.mxu0 %v6825_v39 }
0x284c   :  { %6828 = vmatpush1.bf16.msra.mxu0 %v6827_v18 }
0x284d   :  { %6830 = vmatprep.subr.bf16.mxu0 %v6829_v7 }
0x28d1   :  { %v5012_v50 = vpop.xlane.xlu0 %5011 }
0x28d2   :  { %v5013_v9 = vsub.f32 %v8775_v24, %v5012_v50  ;;  %v5068_v24 = vld [vmem:[#allocation7 + $0x170] sm:$0xff] }
0x28d3   :  { %v8848_v6 = vpack.c.bf16 %v5068_v24, %v5064_v5  ;;  %v5084_v50 = vld [vmem:[#allocation7 + $0x1f0] sm:$0xff] }
0x28d4   :  { %v5014_v49 = vmul.f32 1.442695, %v5013_v9  ;;  %v6831_v9 = vpack.c.bf16 %v5082_v20, %v5078_v36  ;;  %v5367_v20 = vrot.slane %v5350_v62, %v7643_v40 }
0x28d5   :  { %6856 = vmatpush1.bf16.msra.mxu1 %v8848_v6 }
0x28d6   :  { %7310 = vpow2.f32 %v5014_v49  ;;  %6858 = vmatprep.subr.bf16.mxu1 %v6857_v30  ;;  %v6863_v49 = vpack.c.bf16 %v5084_v50, %v5080_v31  ;;  %6832 = vmatpush1.bf16.msra.mxu0 %v6831_v9 }
0x28d7   :  { %6866 = vmatprep.subr.bf16.mxu0 %v8779_v29 }
0x28d9   :  { %6860 = vmatpush1.bf16.msra.mxu1 %v6859_v55 }
0x28da   :  { %6862 = vmatprep.subr.bf16.mxu1 %v6861_v28 }
0x28dd   :  { %6864 = vmatpush1.bf16.msra.mxu1 %v6863_v49 }
0x28de   :  { %6898 = vmatprep.subr.bf16.mxu1 %v8781_v27 }
0x28e0   :  { %v7311_v34 = vpop.eup %7310 }
0x28e1   :  { %v5016_v54 = vsel %vm521_vm1, %v7311_v34, 0.0 }
0x28e2   :  { %5017 = vadd.xlane.f32.xlu1 %v5016_v54 }
0x296f   :  { %v5018_v54 = vpop.xlane.xlu1 %5017 }
0x2970   :  { %7312 = vrcp.f32 %v5018_v54 }
0x297a   :  { %v7313_v22 = vpop.eup %7312 }
0x297b   :  { %v5020_v8 = vmul.f32 %v7313_v22, %v7311_v34 }
0x297d   :  { %5021 = vst [vmem:[#allocation8 + $0x11] sm:$0x1] %v5020_v8  ;;  %5173 = vmatmul.mubr.f32.vlgmr.msra.gmra.mrb[38].mxu0 %v5020_v8  ;;  %5244 = vmatmul.mubr.f32.vlgmr.msra.gmra.mrb[38].mxu1 %v5020_v8 }
0x297e   :  { %6868 = vmatpush1.bf16.msra.mxu0 %v8783_v38  ;;  %6900 = vmatpush1.bf16.msra.mxu1 %v8786_v46 }
0x297f   :  { %6870 = vmatprep.subr.bf16.mxu0 %v8790_v10  ;;  %6902 = vmatprep.subr.bf16.mxu1 %v8792_v45 }
0x2980   :  { %5436 = vmatprep.mubr.f32.mxu0 %v7453_v0  ;;  %5507 = vmatprep.mubr.f32.mxu1 %v7453_v0  ;;  %v5086_v0 = vld [vmem:[%s8914_s4] sm:$0xf]  ;;  %s7454_s4 = smov [#allocation8]  }
0x2981   :  { %v5091_v29 = vrot.slane %v5086_v0, %v7631_v15  ;;  %v5095_v27 = vrot.slane %v5086_v0, %v7636_v17  ;;  %s5555_s16 = sshll.u32 %s7454_s4, 4  ;;  %s5556_s16 = int_to_ptr.vmem [resolvable:$true] %s5555_s16 }
0x2982   :  { %6872 = vmatpush1.bf16.msra.mxu0 %v8795_v25  ;;  %6904 = vmatpush1.bf16.msra.mxu1 %v8799_v43  ;;  %s7420_s17 = scalar_lea.vmem %s5556_s16, 384  ;;  %p7425_p11 = scmp.lt.s32.totalorder %s5556_s16, %s5556_s16 }
0x2983   :  { %6874 = vmatprep.subr.bf16.mxu0 %v8801_v53  ;;  %6906 = vmatprep.subr.bf16.mxu1 %v8803_v63  ;;  %p7421_p10 = scmp.ne.s32.totalorder %s5556_s16, %s7420_s17  ;;  %p7426_p12 = scmp.lt.s32.totalorder %s7420_s17, %s7420_s17 }
0x2985   :  { %p7427_p13 = por %p7426_p12, %p7425_p11 }
0x2986   :  { %6876 = vmatpush1.bf16.msra.mxu0 %v8806_v59  ;;  %6908 = vmatpush1.bf16.msra.mxu1 %v8810_v33  ;;  %v5099_v59 = vrot.slane %v5086_v0, %v7640_v23  ;;  %v5103_v33 = vrot.slane %v5086_v0, %v7643_v40 }
0x2987   :  { %6878 = vmatprep.subr.bf16.mxu0 %v8812_v42  ;;  %6910 = vmatprep.subr.bf16.mxu1 %v8815_v60  ;;  %p7428_p0 = pnand %p7427_p13, %p7421_p10 }
0x298a   :  { %6880 = vmatpush1.bf16.msra.mxu0 %v8818_v58  ;;  %6912 = vmatpush1.bf16.msra.mxu1 %v8822_v56 }
0x298b   :  { %6882 = vmatprep.subr.bf16.mxu0 %v8824_v14  ;;  %6914 = vmatprep.subr.bf16.mxu1 %v8827_v52 }
0x298e   :  { %6884 = vmatpush1.bf16.msra.mxu0 %v8830_v19  ;;  %6916 = vmatpush1.bf16.msra.mxu1 %v8834_v21 }
0x298f   :  { %6886 = vmatprep.subr.bf16.mxu0 %v8841_v26  ;;  %6918 = vmatprep.subr.bf16.mxu1 %v8843_v1 }
0x2992   :  { %6888 = vmatpush1.bf16.msra.mxu0 %v8845_v3  ;;  %6920 = vmatpush1.bf16.msra.mxu1 %v8848_v6 }
0x2993   :  { %6890 = vmatprep.subr.bf16.mxu0 %v6825_v39  ;;  %6922 = vmatprep.subr.bf16.mxu1 %v6857_v30 }
0x2996   :  { %6892 = vmatpush1.bf16.msra.mxu0 %v6827_v18  ;;  %6924 = vmatpush1.bf16.msra.mxu1 %v6859_v55  ;;  %v5359_v18 = vrot.slane %v5350_v62, %v7636_v17 }
0x2997   :  { %6894 = vmatprep.subr.bf16.mxu0 %v6829_v7  ;;  %6926 = vmatprep.subr.bf16.mxu1 %v6861_v28  ;;  %v5363_v28 = vrot.slane %v5350_v62, %v7640_v23 }
0x299a   :  { %6896 = vmatpush1.bf16.msra.mxu0 %v6831_v9  ;;  %6928 = vmatpush1.bf16.msra.mxu1 %v6863_v49 }
0x2a50   :  { %v5174_v38 = vpop.f32.mrb[38].mxu0  ;;  %v5245_v46 = vpop.f32.mrb[38].mxu1 }
0x2a51   :  { %v5175_v10 = vadd.f32 %v5174_v38, %v5091_v29  ;;  %v5176_v45 = vpop.f32.mrb[39].mxu0  ;;  %v5247_v25 = vpop.f32.mrb[39].mxu1  ;;  %v5246_v42 = vadd.f32 %v5245_v46, %v5099_v59 }
0x2a52   :  { %v5177_v43 = vadd.f32 %v5176_v45, %v5095_v27  ;;  %v5248_v60 = vadd.f32 %v5247_v25, %v5103_v33 }
0x2a53   :  { %v5627_v53 = vmul.f32 -1.442695, %v5175_v10  ;;  %v5629_v58 = vmul.f32 -1.442695, %v5246_v42 }
0x2a54   :  { %v5628_v63 = vmul.f32 -1.442695, %v5177_v43 }
0x2a55   :  { %7314 = vpow2.f32 %v5627_v53 }
0x2a56   :  { %7316 = vpow2.f32 %v5628_v63 }
0x2a57   :  { %7318 = vtanh.f32 %v5248_v60 }
0x2a58   :  { %7320 = vpow2.f32 %v5629_v58 }
0x2a5f   :  { %v7315_v56 = vpop.eup %7314 }
0x2a60   :  { %v5259_v14 = vadd.f32 1.0, %v7315_v56  ;;  %v7317_v52 = vpop.eup %7316 }
0x2a61   :  { %v5260_v19 = vadd.f32 1.0, %v7317_v52  ;;  %v7319_v21 = vpop.eup %7318 }
0x2a62   :  { %7322 = vrcp.f32 %v5259_v14  ;;  %v7321_v34 = vpop.eup %7320 }
0x2a63   :  { %7324 = vrcp.f32 %v5260_v19  ;;  %v5261_v48 = vadd.f32 1.0, %v7321_v34 }
0x2a65   :  { %7326 = vrcp.f32 %v5261_v48 }
0x2a6c   :  { %v7323_v51 = vpop.eup %7322 }
0x2a6d   :  { %v5270_v26 = vmul.f32 %v7323_v51, %v7319_v21  ;;  %v7325_v47 = vpop.eup %7324 }
0x2a6e   :  { %v5269_v32 = vmul.f32 %v7325_v47, %v8772_v37 }
0x2a6f   :  { %v7327_v3 = vpop.eup %7326 }
0x2a70   :  { %v5271_v1 = vadd.f32 %v5270_v26, %v5269_v32 }
0x2a72   :  { %7328 = vtanh.f32 %v5271_v1 }
0x2a7c   :  { %v7329_v5 = vpop.eup %7328 }
0x2a7d   :  { %v5273_v24 = vmul.f32 %v7329_v5, %v7327_v3 }
0x2a7f   :  { %v5274_v2 = vsel %vm521_vm1, %v5273_v24, -inf }
0x2a80   :  { %5275 = vmax.xlane.f32.xlu0 %v5274_v2 }
0x2b0d   :  { %v5276_v6 = vpop.xlane.xlu0 %5275 }
0x2b0e   :  { %v5277_v11 = vsub.f32 %v5273_v24, %v5276_v6 }
0x2b10   :  { %v5278_v35 = vmul.f32 1.442695, %v5277_v11 }
0x2b12   :  { %7330 = vpow2.f32 %v5278_v35 }
0x2b1c   :  { %v7331_v13 = vpop.eup %7330 }
0x2b1d   :  { %v5280_v39 = vsel %vm521_vm1, %v7331_v13, 0.0 }
0x2b1e   :  { %5281 = vadd.xlane.f32.xlu1 %v5280_v39 }
0x2bab   :  { %v5282_v30 = vpop.xlane.xlu1 %5281 }
0x2bac   :  { %7332 = vrcp.f32 %v5282_v30 }
0x2bb6   :  { %v7333_v37 = vpop.eup %7332 }
0x2bb7   :  { %v5284_v16 = vmul.f32 %v7333_v37, %v7331_v13 }
0x2bb9   :  { %5285 = vst [vmem:[#allocation8 + $0x12] sm:$0x1] %v5284_v16  ;;  %5437 = vmatmul.mubr.f32.vlgmr.msra.gmra.mrb[40].mxu0 %v5284_v16  ;;  %5508 = vmatmul.mubr.f32.vlgmr.msra.gmra.mrb[40].mxu1 %v5284_v16 }
0x2c8c   :  { %v5438_v41 = vpop.f32.mrb[40].mxu0  ;;  %v5509_v61 = vpop.f32.mrb[40].mxu1 }
0x2c8d   :  { %v5439_v57 = vadd.f32 %v5438_v41, %v5355_v44  ;;  %v5440_v55 = vpop.f32.mrb[41].mxu0  ;;  %v5511_v7 = vpop.f32.mrb[41].mxu1  ;;  %v5510_v31 = vadd.f32 %v5509_v61, %v5363_v28 }
0x2c8e   :  { %v5441_v12 = vadd.f32 %v5440_v55, %v5359_v18  ;;  %v5512_v50 = vadd.f32 %v5511_v7, %v5367_v20 }
0x2c8f   :  { %v5630_v4 = vmul.f32 -1.442695, %v5439_v57  ;;  %v5632_v9 = vmul.f32 -1.442695, %v5510_v31 }
0x2c90   :  { %v5631_v36 = vmul.f32 -1.442695, %v5441_v12 }
0x2c91   :  { %7334 = vpow2.f32 %v5630_v4 }
0x2c92   :  { %7336 = vpow2.f32 %v5631_v36 }
0x2c93   :  { %7338 = vtanh.f32 %v5512_v50 }
0x2c94   :  { %7340 = vpow2.f32 %v5632_v9 }
0x2c9b   :  { %v7335_v15 = vpop.eup %7334 }
0x2c9c   :  { %v5523_v49 = vadd.f32 1.0, %v7335_v15  ;;  %v7337_v17 = vpop.eup %7336 }
0x2c9d   :  { %v5524_v54 = vadd.f32 1.0, %v7337_v17  ;;  %v7339_v22 = vpop.eup %7338 }
0x2c9e   :  { %7342 = vrcp.f32 %v5523_v49  ;;  %v7341_v8 = vpop.eup %7340 }
0x2c9f   :  { %7344 = vrcp.f32 %v5524_v54  ;;  %v5525_v23 = vadd.f32 1.0, %v7341_v8 }
0x2ca1   :  { %7346 = vrcp.f32 %v5525_v23 }
0x2ca8   :  { %v7343_v0 = vpop.eup %7342 }
0x2ca9   :  { %v5534_v29 = vmul.f32 %v7343_v0, %v7339_v22  ;;  %v7345_v27 = vpop.eup %7344 }
0x2caa   :  { %v5533_v38 = vmul.f32 %v7345_v27, %v5271_v1 }
0x2cab   :  { %v7347_v40 = vpop.eup %7346 }
0x2cac   :  { %v5535_v46 = vadd.f32 %v5534_v29, %v5533_v38 }
0x2cae   :  { %7348 = vtanh.f32 %v5535_v46 }
0x2cb8   :  { %v7349_v10 = vpop.eup %7348 }
0x2cb9   :  { %v5537_v45 = vmul.f32 %v7349_v10, %v7347_v40 }
0x2cbb   :  { %v5538_v25 = vsel %vm521_vm1, %v5537_v45, -inf }
0x2cbc   :  { %5539 = vmax.xlane.f32.xlu0 %v5538_v25 }
0x2d49   :  { %v5540_v43 = vpop.xlane.xlu0 %5539 }
0x2d4a   :  { %v5541_v53 = vsub.f32 %v5537_v45, %v5540_v43 }
0x2d4c   :  { %v5542_v63 = vmul.f32 1.442695, %v5541_v53 }
0x2d4e   :  { %7350 = vpow2.f32 %v5542_v63 }
0x2d58   :  { %v7351_v59 = vpop.eup %7350 }
0x2d59   :  { %v5544_v33 = vsel %vm521_vm1, %v7351_v59, 0.0 }
0x2d5a   :  { %5545 = vadd.xlane.f32.xlu1 %v5544_v33 }
0x2de7   :  { %v5546_v42 = vpop.xlane.xlu1 %5545 }
0x2de8   :  { %7352 = vrcp.f32 %v5546_v42 }
0x2df2   :  { %v7353_v60 = vpop.eup %7352 }
0x2df3   :  { %v5548_v58 = vmul.f32 %v7353_v60, %v7351_v59 }
0x2df5   :  { %5549 = vst [vmem:[#allocation8 + $0x13] sm:$0x1] %v5548_v58 }
0x2df6   :  { %7431 = shalt.err (!%p7428_p0)
}
0x2df7   :  { %s7432_s19 = scalar_lea.hbm %s8915_s5, 384 }
0x2df8   :  { %p7433_p1 = scmp.ne.s32.totalorder %s8915_s5, %s7432_s19  ;;  %p7436_p2 = scmp.lt.u32.totalorder %s7432_s19, %s8915_s5 }
0x2dfa   :  { %p7438_p3 = pnand %p7436_p2, %p7433_p1 }
0x2dfc   :  { %7441 = shalt.err (!%p7438_p3)
}
0x2dfd   :  { %s7455_s24 = smov 128   ;;  %s7456_s25 = smov 8  }
0x2dfe   :  { %5561 = dma.vmem_to_hbm [thread:$0]  %s5556_s16, 384, %s8915_s5, [#allocation4], %s7455_s24, %s7455_s24, %s7456_s25  }
0x2dff   :  { %7446 = dma.done.wait [#allocation4], 384  }
0x2e00   :  { %7447 = vsyncadd [#allocation4], 4294966912 }
0x2e01   :  { %5565 = vsyncpa [#allocation3], 1 }
0x2e02   :  { %5566 = vsyncpa [#allocation6], 1 }
0x2e03   :  { %5567 = vsyncpa [#allocation4], 1 }

</bundles_post_ra>
